<compile_context>
chip_gen: v7x
topology: tpu7x:2x2x1
jax: 0.10.0
libtpu: 0.0.40
codegen_flags: <defaults>
</compile_context>

<pallas_src>
import numpy as np
import jax
import jax.numpy as jnp
from jax import lax
from jax.experimental import pallas as pl
from jax.experimental.pallas import tpu as pltpu

# --------------------------- cfg (Faster R-CNN defaults) ---------------------------
RPN_NEGATIVE_OVERLAP = 0.3
RPN_POSITIVE_OVERLAP = 0.7
RPN_CLOBBER_POSITIVES = False
RPN_FG_FRACTION = 0.5
RPN_BATCHSIZE = 256
RPN_BBOX_INSIDE_WEIGHTS = (1.0, 1.0, 1.0, 1.0)
RPN_POSITIVE_WEIGHT = -1.0

G_PAD = 8   # padded gt boxes per image (= f32 sublane tile); 3-bit index packing below
assert G_PAD == 8


# --------------------------- anchor generation (host glue) -------------------------
def _whctrs(anchor):
    w = anchor[2] - anchor[0] + 1
    h = anchor[3] - anchor[1] + 1
    x_ctr = anchor[0] + 0.5 * (w - 1)
    y_ctr = anchor[1] + 0.5 * (h - 1)
    return w, h, x_ctr, y_ctr


def _mkanchors(ws, hs, x_ctr, y_ctr):
    ws = ws[:, np.newaxis]
    hs = hs[:, np.newaxis]
    return np.hstack((x_ctr - 0.5 * (ws - 1), y_ctr - 0.5 * (hs - 1),
                      x_ctr + 0.5 * (ws - 1), y_ctr + 0.5 * (hs - 1)))


def _ratio_enum(anchor, ratios):
    w, h, x_ctr, y_ctr = _whctrs(anchor)
    size = w * h
    size_ratios = size / ratios
    ws = np.round(np.sqrt(size_ratios))
    hs = np.round(ws * ratios)
    return _mkanchors(ws, hs, x_ctr, y_ctr)


def _scale_enum(anchor, scales):
    w, h, x_ctr, y_ctr = _whctrs(anchor)
    ws = w * scales
    hs = h * scales
    return _mkanchors(ws, hs, x_ctr, y_ctr)


def generate_anchors(base_size=16, ratios=(0.5, 1, 2), scales=np.array([8, 16, 32])):
    base_anchor = np.array([1, 1, base_size, base_size], dtype=np.float64) - 1
    ratio_anchors = _ratio_enum(base_anchor, np.array(ratios, dtype=np.float64))
    anchors = np.vstack([_scale_enum(ratio_anchors[i, :], np.array(scales, dtype=np.float64))
                         for i in range(ratio_anchors.shape[0])])
    return anchors


# ------------------- cached anchor constants (A-major lane order) ------------------
_ANCHOR_FEAT_CACHE = {}


def _get_anchor_constants(H, W, feat_stride, anchor_scales):
    """8-row lane-dense anchor constant block, cached per (H, W, stride, scales)."""
    key = (int(H), int(W), float(feat_stride), tuple(float(s) for s in anchor_scales))
    hit = _ANCHOR_FEAT_CACHE.get(key)
    if hit is not None:
        return hit

    base = generate_anchors(scales=np.array(anchor_scales))
    A = base.shape[0]
    shift_x = np.arange(0, W) * feat_stride
    shift_y = np.arange(0, H) * feat_stride
    sx, sy = np.meshgrid(shift_x, shift_y)
    shifts = np.vstack((sx.ravel(), sy.ravel(), sx.ravel(), sy.ravel())).transpose()   # (K, 4)
    K = shifts.shape[0]
    # A-major lane order: n = a * K + k  (k = h * W + w)  => NCHW label reshape is a pure view.
    all_anchors = (base.reshape(A, 1, 4) + shifts.reshape(1, K, 4)).reshape(A * K, 4)
    N = A * K
    N_pad = int(np.ceil(N / 128.0) * 128)
    anchors_pad = np.full((N_pad, 4), -1.0, dtype=np.float32)      # pad anchors => "outside"
    anchors_pad[:N] = all_anchors.astype(np.float32)

    x1, y1, x2, y2 = (anchors_pad[:, i] for i in range(4))
    w = x2 - x1 + 1.0
    h = y2 - y1 + 1.0
    feat = np.zeros((8, N_pad), dtype=np.float32)
    feat[0] = x1; feat[1] = y1; feat[2] = x2; feat[3] = y2
    feat[4] = 1.0 / w; feat[5] = 1.0 / h
    # row 6 (inside flag) is filled per call from im_info; row 7 stays zero.
    entry = (jax.device_put(feat), A, K, N, N_pad)
    _ANCHOR_FEAT_CACHE[key] = entry
    return entry


# --------------------------------- Pallas kernel -----------------------------------
# anchor_feat rows: 0:x1 1:y1 2:x2 3:y2 4:1/w 5:1/h 6:inside 7:pad
# gt rows (lane axis 8 wide): 0..3 coords, 4 area, 5 valid, 6..7 pad
# out rows: 0..3 dx,dy,dw,dh (inside-gated), 4 label(-1/0/1), 5..7 unused
def _anchor_target_kernel(af_ref, gt_ref, out_ref):
    n = af_ref.shape[1]
    g = gt_ref.shape[1]                                   # == G_PAD == 8

    # ---- anchor constants (lane-dense slabs) ----
    a_lo = af_ref[0:2, :]                                 # [x1; y1]           (2, n)
    a_hi = af_ref[2:4, :]                                 # [x2; y2]           (2, n)
    inv_wh = af_ref[4:6, :]                               # [1/w; 1/h]         (2, n)
    inside = af_ref[6:7, :] > 0.5                         # (1, n) bool

    ex_wh = a_hi - a_lo + 1.0                             # [w; h]             (2, n)
    ex_c = a_lo + 0.5 * ex_wh                             # [cx; cy]           (2, n)
    a_area = ex_wh[0:1, :] * ex_wh[1:2, :]                # (1, n)
    ax1 = a_lo[0:1, :]; ay1 = a_lo[1:2, :]
    ax2 = a_hi[0:1, :]; ay2 = a_hi[1:2, :]

    # ---- gt boxes (g, 8) ----
    gt = gt_ref[0, :, :]
    gx1 = gt[:, 0:1]; gy1 = gt[:, 1:2]; gx2 = gt[:, 2:3]; gy2 = gt[:, 3:4]
    g_area = gt[:, 4:5]
    valid = gt[:, 5:6] > 0.5                              # (g, 1) bool

    # ---- IoU matrix (g, n); exact f32 divide (fidelity near the 0.3/0.7 thresholds) ----
    iw = jnp.maximum(jnp.minimum(ax2, gx2) - jnp.maximum(ax1, gx1) + 1.0, 0.0)
    ih = jnp.maximum(jnp.minimum(ay2, gy2) - jnp.maximum(ay1, gy1) + 1.0, 0.0)
    inter = iw * ih
    ov = inter / (a_area + g_area - inter)                # (g, n)

    # ---- fused per-anchor max + first-argmax over valid boxes: ONE sublane reduce ----
    # ov in [0, 1] => ov + 1.0 in [1, 2]; its f32 bit pattern is monotone in ov and fits in
    # 24 bits after subtracting bits(1.0), leaving room for a 3-bit reversed gt index.
    g_idx = lax.broadcasted_iota(jnp.int32, (g, n), 0)
    ov_bits = pltpu.bitcast(ov + 1.0, jnp.int32) - jnp.int32(0x3F800000)
    key = (ov_bits << 3) | (jnp.int32(g - 1) - g_idx)     # ties -> lowest gt index wins
    key = jnp.where(valid, key, jnp.int32(-(2 ** 31)))
    best = jnp.max(key, axis=0, keepdims=True)            # (1, n)
    amax = jnp.int32(g - 1) - (best & jnp.int32(g - 1))   # first-argmax gt index per anchor
    max_ov = pltpu.bitcast((best >> 3) + jnp.int32(0x3F800000), jnp.float32) - 1.0
    onehot = (g_idx == amax).astype(jnp.float32)          # (g, n): exactly one 1 per lane

    # ---- per-box max over inside anchors (gt_argmax rule) ----
    gt_max = jnp.max(jnp.where(inside, ov, -1.0), axis=1, keepdims=True)   # (g, 1)
    hit = jnp.where((ov == gt_max) & valid, 1.0, 0.0)
    anchor_hit = jnp.max(hit, axis=0, keepdims=True) > 0.5                 # (1, n)

    # ---- labels: -1 don't care, 0 bg, 1 fg; outside anchors stay -1 (unmap fill) ----
    lab = jnp.full((1, n), -1.0, dtype=jnp.float32)
    if not RPN_CLOBBER_POSITIVES:
        lab = jnp.where(inside & (max_ov < RPN_NEGATIVE_OVERLAP), 0.0, lab)
    lab = jnp.where(inside & anchor_hit, 1.0, lab)
    lab = jnp.where(inside & (max_ov >= RPN_POSITIVE_OVERLAP), 1.0, lab)
    if RPN_CLOBBER_POSITIVES:
        lab = jnp.where(inside & (max_ov < RPN_NEGATIVE_OVERLAP), 0.0, lab)

    # ---- argmax gt coordinates per anchor: one tiny EXACT MXU matmul ----
    # (g, 8)^T x (g, n) -> (8, n); HIGHEST precision keeps the f32 coordinates exact.
    sel = lax.dot_general(gt, onehot,
                          dimension_numbers=(((0,), (0,)), ((), ())),
                          precision=lax.Precision.HIGHEST,
                          preferred_element_type=jnp.float32)
    gt_wh = sel[2:4, :] - sel[0:2, :] + 1.0               # [gt_w; gt_h]   (2, n)
    gt_c = sel[0:2, :] + 0.5 * gt_wh                      # [gt_cx; gt_cy] (2, n)

    insf = inside.astype(jnp.float32)                     # outside anchors -> 0 (unmap fill)
    out_ref[0, 0:2, :] = (gt_c - ex_c) * inv_wh * insf    # dx, dy
    out_ref[0, 2:4, :] = jnp.log(gt_wh * inv_wh) * insf   # dw, dh
    out_ref[0, 4:5, :] = lab                              # rows 5..7 are never read


# --------------------------------- wrapper (glue) ----------------------------------
def anchor_target_layer(rpn_cls_score, gt_boxes, batch_boxes_index, im_info,
                        feat_stride=16.0, anchor_scales=(8, 16, 32)):
    B = int(rpn_cls_score.shape[0])
    H, W = int(rpn_cls_score.shape[2]), int(rpn_cls_score.shape[3])

    feat_const, A, K, N, N_pad = _get_anchor_constants(H, W, feat_stride, anchor_scales)

    # per-call inside-image mask (depends only on im_info)
    im_info_j = jnp.asarray(im_info, dtype=jnp.float32)
    im_h, im_w = im_info_j[0, 0], im_info_j[0, 1]
    inside = ((feat_const[0] >= 0.0) & (feat_const[1] >= 0.0) &
              (feat_const[2] < im_w) & (feat_const[3] < im_h)).astype(jnp.float32)
    anchor_feat = feat_const.at[6, :].set(inside)                           # (8, N_pad)

    # vectorized per-image gt padding: coords, area, valid flag (no per-image Python loop)
    gt_j = jnp.asarray(gt_boxes, dtype=jnp.float32)[:, :4]                  # (G, 4)
    bbi = jnp.asarray(batch_boxes_index, dtype=jnp.int32)                   # (G,)
    G = int(gt_j.shape[0])
    counts = np.bincount(np.asarray(batch_boxes_index, dtype=np.int64), minlength=B)
    assert counts.min() >= 1 and counts.max() <= G_PAD, "need 1..G_PAD gt boxes per image"
    same = (bbi[:, None] == bbi[None, :]).astype(jnp.int32)
    pos = jnp.sum(jnp.tril(same, k=-1), axis=1)                             # slot within image
    gw = gt_j[:, 2:3] - gt_j[:, 0:1] + 1.0
    gh = gt_j[:, 3:4] - gt_j[:, 1:2] + 1.0
    vals = jnp.concatenate([gt_j, gw * gh, jnp.ones((G, 1), jnp.float32),
                            jnp.zeros((G, 2), jnp.float32)], axis=1)        # (G, 8)
    gt_pad = jnp.zeros((B, G_PAD, 8), jnp.float32).at[:, :, 4].set(1.0)     # pad area -> 1
    gt_pad = gt_pad.at[bbi, pos, :].set(vals)

    grid_spec = pltpu.PrefetchScalarGridSpec(
        num_scalar_prefetch=0,
        grid=(B,),
        in_specs=[
            pl.BlockSpec((8, N_pad), lambda b: (0, 0)),        # anchor constants (resident)
            pl.BlockSpec((1, G_PAD, 8), lambda b: (b, 0, 0)),  # per-image gt boxes
        ],
        out_specs=pl.BlockSpec((1, 8, N_pad), lambda b: (b, 0, 0)),
    )
    # NOTE: v7x-only dual-TensorCore N-tiling (two-pass gt_max prepass) not implemented;
    # with grid=(B,) the second core is only used when B > 1.
    out = pl.pallas_call(
        _anchor_target_kernel,
        grid_spec=grid_spec,
        out_shape=jax.ShapeDtypeStruct((B, 8, N_pad), jnp.float32),
        compiler_params=pltpu.CompilerParams(
            dimension_semantics=("parallel",),
            # v5e's default scoped VMEM (16 MiB) is too small at production N; 64 MiB fits
            # every generation (v7x physical VMEM is 64 MiB/TC).
            vmem_limit_bytes=64 * 1024 * 1024),
    )(anchor_feat, gt_pad)

    labels = out[:, 4, :N]                        # (B, N), n = a*K + k, values in {-1, 0, 1}
    targets = out[:, 0:4, :N]                     # (B, 4, N)
    fg = (labels == 1.0).astype(jnp.float32)      # derived in XLA (reference: labels == 1)
    bg = (labels == 0.0).astype(jnp.float32)

    # TODO(synk): random fg/bg subsampling (npr.choice without replacement, RPN_BATCHSIZE
    # balancing) is host-RNG dependent with no deterministic Pallas equivalent; skipped.

    inside_w = fg[:, None, :] * jnp.asarray(RPN_BBOX_INSIDE_WEIGHTS,
                                            jnp.float32)[None, :, None]     # (B, 4, N)

    if RPN_POSITIVE_WEIGHT < 0:
        # NOTE: replicates the reference quirk of using the *last* image's label counts.
        num_examples = jnp.sum(labels[B - 1] >= 0).astype(jnp.float32)
        pos_w = 1.0 / num_examples
        neg_w = 1.0 / num_examples
    else:
        pos_w = RPN_POSITIVE_WEIGHT / (jnp.sum(labels == 1) + 1)
        neg_w = (1.0 - RPN_POSITIVE_WEIGHT) / (jnp.sum(labels == 0) + 1)
    outside_w = jnp.broadcast_to((fg * pos_w + bg * neg_w)[:, None, :], (B, 4, N))

    # final NCHW outputs, exactly as the PyTorch module
    labels_out = labels.reshape(B, 1, A * H, W).astype(jnp.int32)   # A-major => pure view;
                                                                    # reference uses LongTensor

    def to_nchw(x_b4n):        # (B, 4, N=A*H*W) -> (B, A*4, H, W), channel = a*4 + d
        return (x_b4n.reshape(B, 4, A, H, W)
                      .transpose(0, 2, 1, 3, 4)
                      .reshape(B, A * 4, H, W))

    return labels_out, to_nchw(targets), to_nchw(inside_w), to_nchw(outside_w)


# ------------------------------------- main -----------------------------------------
if __name__ == "__main__":
    key = jax.random.PRNGKey(0)
    B = 2
    H = W = 16
    feat_stride = 16.0
    anchor_scales = (2, 4, 8)     # small scales so plenty of anchors lie inside 256x256
    A = 9
    C = 2 * A

    k1, k2, k3 = jax.random.split(key, 3)
    rpn_cls_score = jax.random.normal(k1, (B, C, H, W), dtype=jnp.float32)      # NCHW
    im_info = np.array([[H * feat_stride, W * feat_stride]], dtype=np.float32)  # (1, 2)

    # 5 gt boxes: first 3 belong to image 0, last 2 to image 1 (boxes carry a class column)
    G = 5
    xy1 = jax.random.uniform(k2, (G, 2), minval=0.0, maxval=180.0)
    wh = jax.random.uniform(k3, (G, 2), minval=16.0, maxval=72.0)
    xy2 = jnp.minimum(xy1 + wh, 255.0)
    gt_boxes = np.asarray(jnp.concatenate([xy1, xy2, jnp.ones((G, 1))], axis=1), dtype=np.float32)
    batch_boxes_index = np.array([0, 0, 0, 1, 1], dtype=np.int32)

    labels, bbox_targets, bbox_inside_w, bbox_outside_w = anchor_target_layer(
        rpn_cls_score, gt_boxes, batch_boxes_index, im_info,
        feat_stride=feat_stride, anchor_scales=anchor_scales)
    jax.block_until_ready((labels, bbox_targets, bbox_inside_w, bbox_outside_w))

    assert labels.shape == (B, 1, A * H, W)
    assert bbox_targets.shape == (B, A * 4, H, W)
    assert bbox_inside_w.shape == (B, A * 4, H, W)
    assert bbox_outside_w.shape == (B, A * 4, H, W)
    assert bool(jnp.all(jnp.isfinite(bbox_targets)))
    assert bool(jnp.all(jnp.isfinite(bbox_outside_w)))
    lab_vals = set(np.unique(np.asarray(labels)).tolist())
    assert lab_vals.issubset({-1, 0, 1})

    print("KERNEL_OK")
</pallas_src>

<mosaic_0001>
module attributes {stable_mosaic.version = 11 : i64} {
  func.func @_anchor_target_kernel(%arg0: i32, %arg1: memref<8x2304xf32, #tpu.memory_space<vmem>>, %arg2: memref<1x8x8xf32, #tpu.memory_space<vmem>>, %arg3: memref<1x8x2304xf32, #tpu.memory_space<vmem>>) attributes {dimension_semantics = [#tpu.dimension_semantics<parallel>], iteration_bounds = array<i64: 2>, scalar_prefetch = 0 : i64, scratch_operands = 0 : i64, tpu.core_type = #tpu.core_type<tc>, window_params = [{pipeline_mode = #tpu.pipeline_mode<synchronous>, transform_indices = @transform_0, window_bounds = array<i64: 8, 2304>}, {transform_indices = @transform_1, window_bounds = array<i64: 1, 8, 8>}, {transform_indices = @transform_2, window_bounds = array<i64: 1, 8, 2304>}]} {
    %c0 = arith.constant 0 : index
    %c0_0 = arith.constant 0 : index
    %0 = vector.load %arg1[%c0, %c0_0] : memref<8x2304xf32, #tpu.memory_space<vmem>>, vector<2x2304xf32>
    %c2 = arith.constant 2 : index
    %c0_1 = arith.constant 0 : index
    %1 = vector.load %arg1[%c2, %c0_1] : memref<8x2304xf32, #tpu.memory_space<vmem>>, vector<2x2304xf32>
    %c4 = arith.constant 4 : index
    %c0_2 = arith.constant 0 : index
    %2 = vector.load %arg1[%c4, %c0_2] : memref<8x2304xf32, #tpu.memory_space<vmem>>, vector<2x2304xf32>
    %c6 = arith.constant 6 : index
    %c0_3 = arith.constant 0 : index
    %3 = vector.load %arg1[%c6, %c0_3] : memref<8x2304xf32, #tpu.memory_space<vmem>>, vector<1x2304xf32>
    %cst = arith.constant 5.000000e-01 : f32
    %4 = vector.broadcast %cst : f32 to vector<1x2304xf32>
    %5 = arith.cmpf ogt, %3, %4 : vector<1x2304xf32>
    %6 = arith.subf %1, %0 : vector<2x2304xf32>
    %cst_4 = arith.constant 1.000000e+00 : f32
    %7 = vector.broadcast %cst_4 : f32 to vector<2x2304xf32>
    %8 = arith.addf %6, %7 : vector<2x2304xf32>
    %cst_5 = arith.constant 5.000000e-01 : f32
    %9 = vector.broadcast %cst_5 : f32 to vector<2x2304xf32>
    %10 = arith.mulf %9, %8 : vector<2x2304xf32>
    %11 = arith.addf %0, %10 : vector<2x2304xf32>
    %12 = vector.extract_strided_slice %8 {offsets = [0, 0], sizes = [1, 2304], strides = [1, 1]} : vector<2x2304xf32> to vector<1x2304xf32>
    %13 = vector.extract_strided_slice %8 {offsets = [1, 0], sizes = [1, 2304], strides = [1, 1]} : vector<2x2304xf32> to vector<1x2304xf32>
    %14 = arith.mulf %12, %13 : vector<1x2304xf32>
    %15 = vector.extract_strided_slice %0 {offsets = [0, 0], sizes = [1, 2304], strides = [1, 1]} : vector<2x2304xf32> to vector<1x2304xf32>
    %16 = vector.extract_strided_slice %0 {offsets = [1, 0], sizes = [1, 2304], strides = [1, 1]} : vector<2x2304xf32> to vector<1x2304xf32>
    %17 = vector.extract_strided_slice %1 {offsets = [0, 0], sizes = [1, 2304], strides = [1, 1]} : vector<2x2304xf32> to vector<1x2304xf32>
    %18 = vector.extract_strided_slice %1 {offsets = [1, 0], sizes = [1, 2304], strides = [1, 1]} : vector<2x2304xf32> to vector<1x2304xf32>
    %c0_6 = arith.constant 0 : index
    %c0_7 = arith.constant 0 : index
    %c0_8 = arith.constant 0 : index
    %19 = vector.load %arg2[%c0_6, %c0_7, %c0_8] : memref<1x8x8xf32, #tpu.memory_space<vmem>>, vector<1x8x8xf32>
    %20 = vector.shape_cast %19 : vector<1x8x8xf32> to vector<8x8xf32>
    %21 = vector.extract_strided_slice %20 {offsets = [0, 0], sizes = [8, 1], strides = [1, 1]} : vector<8x8xf32> to vector<8x1xf32>
    %22 = vector.extract_strided_slice %20 {offsets = [0, 1], sizes = [8, 1], strides = [1, 1]} : vector<8x8xf32> to vector<8x1xf32>
    %23 = vector.extract_strided_slice %20 {offsets = [0, 2], sizes = [8, 1], strides = [1, 1]} : vector<8x8xf32> to vector<8x1xf32>
    %24 = vector.extract_strided_slice %20 {offsets = [0, 3], sizes = [8, 1], strides = [1, 1]} : vector<8x8xf32> to vector<8x1xf32>
    %25 = vector.extract_strided_slice %20 {offsets = [0, 4], sizes = [8, 1], strides = [1, 1]} : vector<8x8xf32> to vector<8x1xf32>
    %26 = vector.extract_strided_slice %20 {offsets = [0, 5], sizes = [8, 1], strides = [1, 1]} : vector<8x8xf32> to vector<8x1xf32>
    %cst_9 = arith.constant 5.000000e-01 : f32
    %27 = vector.broadcast %cst_9 : f32 to vector<8x1xf32>
    %28 = arith.cmpf ogt, %26, %27 : vector<8x1xf32>
    %29 = vector.broadcast %17 : vector<1x2304xf32> to vector<8x2304xf32>
    %30 = vector.broadcast %23 : vector<8x1xf32> to vector<8x2304xf32>
    %31 = arith.minimumf %29, %30 : vector<8x2304xf32>
    %32 = vector.broadcast %15 : vector<1x2304xf32> to vector<8x2304xf32>
    %33 = vector.broadcast %21 : vector<8x1xf32> to vector<8x2304xf32>
    %34 = arith.maximumf %32, %33 : vector<8x2304xf32>
    %35 = arith.subf %31, %34 : vector<8x2304xf32>
    %cst_10 = arith.constant 1.000000e+00 : f32
    %36 = vector.broadcast %cst_10 : f32 to vector<8x2304xf32>
    %37 = arith.addf %35, %36 : vector<8x2304xf32>
    %cst_11 = arith.constant 0.000000e+00 : f32
    %38 = vector.broadcast %cst_11 : f32 to vector<8x2304xf32>
    %39 = arith.maximumf %37, %38 : vector<8x2304xf32>
    %40 = vector.broadcast %18 : vector<1x2304xf32> to vector<8x2304xf32>
    %41 = vector.broadcast %24 : vector<8x1xf32> to vector<8x2304xf32>
    %42 = arith.minimumf %40, %41 : vector<8x2304xf32>
    %43 = vector.broadcast %16 : vector<1x2304xf32> to vector<8x2304xf32>
    %44 = vector.broadcast %22 : vector<8x1xf32> to vector<8x2304xf32>
    %45 = arith.maximumf %43, %44 : vector<8x2304xf32>
    %46 = arith.subf %42, %45 : vector<8x2304xf32>
    %cst_12 = arith.constant 1.000000e+00 : f32
    %47 = vector.broadcast %cst_12 : f32 to vector<8x2304xf32>
    %48 = arith.addf %46, %47 : vector<8x2304xf32>
    %cst_13 = arith.constant 0.000000e+00 : f32
    %49 = vector.broadcast %cst_13 : f32 to vector<8x2304xf32>
    %50 = arith.maximumf %48, %49 : vector<8x2304xf32>
    %51 = arith.mulf %39, %50 : vector<8x2304xf32>
    %52 = vector.broadcast %14 : vector<1x2304xf32> to vector<8x2304xf32>
    %53 = vector.broadcast %25 : vector<8x1xf32> to vector<8x2304xf32>
    %54 = arith.addf %52, %53 : vector<8x2304xf32>
    %55 = arith.subf %54, %51 : vector<8x2304xf32>
    %56 = arith.divf %51, %55 : vector<8x2304xf32>
    %57 = tpu.iota {dimensions = array<i32: 0>} : vector<8x2304xi32>
    %cst_14 = arith.constant 1.000000e+00 : f32
    %58 = vector.broadcast %cst_14 : f32 to vector<8x2304xf32>
    %59 = arith.addf %56, %58 : vector<8x2304xf32>
    %60 = tpu.bitcast %59 : vector<8x2304xf32> -> vector<8x2304xi32>
    %c1065353216_i32 = arith.constant 1065353216 : i32
    %61 = vector.broadcast %c1065353216_i32 : i32 to vector<8x2304xi32>
    %62 = arith.subi %60, %61 : vector<8x2304xi32>
    %c3_i32 = arith.constant 3 : i32
    %63 = vector.broadcast %c3_i32 : i32 to vector<8x2304xi32>
    %64 = arith.shli %62, %63 : vector<8x2304xi32>
    %c7_i32 = arith.constant 7 : i32
    %65 = vector.broadcast %c7_i32 : i32 to vector<8x2304xi32>
    %66 = arith.subi %65, %57 : vector<8x2304xi32>
    %67 = arith.ori %64, %66 : vector<8x2304xi32>
    %c-2147483648_i32 = arith.constant -2147483648 : i32
    %68 = vector.shape_cast %28 : vector<8x1xi1> to vector<8x1xi1>
    %69 = vector.broadcast %68 : vector<8x1xi1> to vector<8x2304xi1>
    %70 = vector.broadcast %c-2147483648_i32 : i32 to vector<8x2304xi32>
    %71 = arith.select %69, %67, %70 : vector<8x2304xi1>, vector<8x2304xi32>
    %cst_15 = arith.constant dense<-2147483648> : vector<2304xi32>
    %72 = vector.multi_reduction <maxsi>, %71, %cst_15 [0] : vector<8x2304xi32> to vector<2304xi32>
    %73 = vector.shape_cast %72 : vector<2304xi32> to vector<1x2304xi32>
    %c7_i32_16 = arith.constant 7 : i32
    %74 = vector.broadcast %c7_i32_16 : i32 to vector<1x2304xi32>
    %75 = arith.andi %73, %74 : vector<1x2304xi32>
    %c7_i32_17 = arith.constant 7 : i32
    %76 = vector.broadcast %c7_i32_17 : i32 to vector<1x2304xi32>
    %77 = arith.subi %76, %75 : vector<1x2304xi32>
    %c3_i32_18 = arith.constant 3 : i32
    %78 = vector.broadcast %c3_i32_18 : i32 to vector<1x2304xi32>
    %79 = arith.shrsi %73, %78 : vector<1x2304xi32>
    %c1065353216_i32_19 = arith.constant 1065353216 : i32
    %80 = vector.broadcast %c1065353216_i32_19 : i32 to vector<1x2304xi32>
    %81 = arith.addi %79, %80 : vector<1x2304xi32>
    %82 = tpu.bitcast %81 : vector<1x2304xi32> -> vector<1x2304xf32>
    %cst_20 = arith.constant 1.000000e+00 : f32
    %83 = vector.broadcast %cst_20 : f32 to vector<1x2304xf32>
    %84 = arith.subf %82, %83 : vector<1x2304xf32>
    %85 = vector.broadcast %77 : vector<1x2304xi32> to vector<8x2304xi32>
    %86 = arith.cmpi eq, %57, %85 : vector<8x2304xi32>
    %87 = arith.extui %86 : vector<8x2304xi1> to vector<8x2304xi32>
    %88 = arith.sitofp %87 : vector<8x2304xi32> to vector<8x2304xf32>
    %cst_21 = arith.constant -1.000000e+00 : f32
    %89 = vector.shape_cast %5 : vector<1x2304xi1> to vector<1x2304xi1>
    %90 = vector.broadcast %89 : vector<1x2304xi1> to vector<8x2304xi1>
    %91 = vector.broadcast %cst_21 : f32 to vector<8x2304xf32>
    %92 = arith.select %90, %56, %91 : vector<8x2304xi1>, vector<8x2304xf32>
    %cst_22 = arith.constant dense<0xFF800000> : vector<8xf32>
    %93 = vector.multi_reduction <maximumf>, %92, %cst_22 [1] : vector<8x2304xf32> to vector<8xf32>
    %94 = vector.shape_cast %93 : vector<8xf32> to vector<8x1xf32>
    %95 = vector.broadcast %94 : vector<8x1xf32> to vector<8x2304xf32>
    %96 = arith.cmpf oeq, %56, %95 : vector<8x2304xf32>
    %97 = vector.broadcast %28 : vector<8x1xi1> to vector<8x2304xi1>
    %98 = arith.andi %96, %97 : vector<8x2304xi1>
    %cst_23 = arith.constant 1.000000e+00 : f32
    %cst_24 = arith.constant 0.000000e+00 : f32
    %99 = vector.broadcast %cst_23 : f32 to vector<8x2304xf32>
    %100 = vector.broadcast %cst_24 : f32 to vector<8x2304xf32>
    %101 = arith.select %98, %99, %100 : vector<8x2304xi1>, vector<8x2304xf32>
    %cst_25 = arith.constant dense<0xFF800000> : vector<2304xf32>
    %102 = vector.multi_reduction <maximumf>, %101, %cst_25 [0] : vector<8x2304xf32> to vector<2304xf32>
    %103 = vector.shape_cast %102 : vector<2304xf32> to vector<1x2304xf32>
    %cst_26 = arith.constant 5.000000e-01 : f32
    %104 = vector.broadcast %cst_26 : f32 to vector<1x2304xf32>
    %105 = arith.cmpf ogt, %103, %104 : vector<1x2304xf32>
    %cst_27 = arith.constant -1.000000e+00 : f32
    %106 = vector.broadcast %cst_27 : f32 to vector<1x2304xf32>
    %cst_28 = arith.constant 3.000000e-01 : f32
    %107 = vector.broadcast %cst_28 : f32 to vector<1x2304xf32>
    %108 = arith.cmpf olt, %84, %107 : vector<1x2304xf32>
    %109 = arith.andi %5, %108 : vector<1x2304xi1>
    %cst_29 = arith.constant 0.000000e+00 : f32
    %110 = vector.broadcast %cst_29 : f32 to vector<1x2304xf32>
    %111 = arith.select %109, %110, %106 : vector<1x2304xi1>, vector<1x2304xf32>
    %112 = arith.andi %5, %105 : vector<1x2304xi1>
    %cst_30 = arith.constant 1.000000e+00 : f32
    %113 = vector.broadcast %cst_30 : f32 to vector<1x2304xf32>
    %114 = arith.select %112, %113, %111 : vector<1x2304xi1>, vector<1x2304xf32>
    %cst_31 = arith.constant 0.699999988 : f32
    %115 = vector.broadcast %cst_31 : f32 to vector<1x2304xf32>
    %116 = arith.cmpf oge, %84, %115 : vector<1x2304xf32>
    %117 = arith.andi %5, %116 : vector<1x2304xi1>
    %cst_32 = arith.constant 1.000000e+00 : f32
    %118 = vector.broadcast %cst_32 : f32 to vector<1x2304xf32>
    %119 = arith.select %117, %118, %114 : vector<1x2304xi1>, vector<1x2304xf32>
    %cst_33 = arith.constant dense<0.000000e+00> : vector<8x2304xf32>
    %120 = tpu.matmul %20, %88, %cst_33 {dimension_numbers = #tpu.dot_dimension_numbers<[0], [0], [1], [1], [0, 1, 1, 1], [], []>, precision = #tpu.contract_precision<fp32>} : vector<8x8xf32>, vector<8x2304xf32>, vector<8x2304xf32> -> vector<8x2304xf32>
    %121 = vector.extract_strided_slice %120 {offsets = [2, 0], sizes = [2, 2304], strides = [1, 1]} : vector<8x2304xf32> to vector<2x2304xf32>
    %122 = vector.extract_strided_slice %120 {offsets = [0, 0], sizes = [2, 2304], strides = [1, 1]} : vector<8x2304xf32> to vector<2x2304xf32>
    %123 = arith.subf %121, %122 : vector<2x2304xf32>
    %cst_34 = arith.constant 1.000000e+00 : f32
    %124 = vector.broadcast %cst_34 : f32 to vector<2x2304xf32>
    %125 = arith.addf %123, %124 : vector<2x2304xf32>
    %126 = vector.extract_strided_slice %120 {offsets = [0, 0], sizes = [2, 2304], strides = [1, 1]} : vector<8x2304xf32> to vector<2x2304xf32>
    %cst_35 = arith.constant 5.000000e-01 : f32
    %127 = vector.broadcast %cst_35 : f32 to vector<2x2304xf32>
    %128 = arith.mulf %127, %125 : vector<2x2304xf32>
    %129 = arith.addf %126, %128 : vector<2x2304xf32>
    %130 = arith.extui %5 : vector<1x2304xi1> to vector<1x2304xi32>
    %131 = arith.sitofp %130 : vector<1x2304xi32> to vector<1x2304xf32>
    %132 = arith.subf %129, %11 : vector<2x2304xf32>
    %133 = arith.mulf %132, %2 : vector<2x2304xf32>
    %134 = vector.broadcast %131 : vector<1x2304xf32> to vector<2x2304xf32>
    %135 = arith.mulf %133, %134 : vector<2x2304xf32>
    %c0_36 = arith.constant 0 : index
    %c0_37 = arith.constant 0 : index
    %c0_38 = arith.constant 0 : index
    %136 = vector.load %arg3[%c0_36, %c0_37, %c0_38] : memref<1x8x2304xf32, #tpu.memory_space<vmem>>, vector<1x2x2304xf32>
    %137 = vector.shape_cast %136 : vector<1x2x2304xf32> to vector<2x2304xf32>
    %138 = vector.shape_cast %135 : vector<2x2304xf32> to vector<1x2x2304xf32>
    tpu.vector_store %arg3[%c0_36, %c0_37, %c0_38], %138 {strides = array<i32>} : memref<1x8x2304xf32, #tpu.memory_space<vmem>>, vector<1x2x2304xf32>,
    %139 = arith.mulf %125, %2 : vector<2x2304xf32>
    %140 = math.log %139 : vector<2x2304xf32>
    %141 = vector.broadcast %131 : vector<1x2304xf32> to vector<2x2304xf32>
    %142 = arith.mulf %140, %141 : vector<2x2304xf32>
    %c0_39 = arith.constant 0 : index
    %c2_40 = arith.constant 2 : index
    %c0_41 = arith.constant 0 : index
    %143 = vector.load %arg3[%c0_39, %c2_40, %c0_41] : memref<1x8x2304xf32, #tpu.memory_space<vmem>>, vector<1x2x2304xf32>
    %144 = vector.shape_cast %143 : vector<1x2x2304xf32> to vector<2x2304xf32>
    %145 = vector.shape_cast %142 : vector<2x2304xf32> to vector<1x2x2304xf32>
    tpu.vector_store %arg3[%c0_39, %c2_40, %c0_41], %145 {strides = array<i32>} : memref<1x8x2304xf32, #tpu.memory_space<vmem>>, vector<1x2x2304xf32>,
    %c0_42 = arith.constant 0 : index
    %c4_43 = arith.constant 4 : index
    %c0_44 = arith.constant 0 : index
    %146 = vector.load %arg3[%c0_42, %c4_43, %c0_44] : memref<1x8x2304xf32, #tpu.memory_space<vmem>>, vector<1x1x2304xf32>
    %147 = vector.shape_cast %146 : vector<1x1x2304xf32> to vector<1x2304xf32>
    %148 = vector.shape_cast %119 : vector<1x2304xf32> to vector<1x1x2304xf32>
    tpu.vector_store %arg3[%c0_42, %c4_43, %c0_44], %148 {strides = array<i32>} : memref<1x8x2304xf32, #tpu.memory_space<vmem>>, vector<1x1x2304xf32>,
    return
  }
  func.func @transform_0(%arg0: i32) -> (i32, i32) {
    %c0_i32 = arith.constant 0 : i32
    %c0_i32_0 = arith.constant 0 : i32
    %c0_i32_1 = arith.constant 0 : i32
    return %c0_i32, %c0_i32_0 : i32, i32
  }
  func.func @transform_1(%arg0: i32) -> (i32, i32, i32) {
    %c0_i32 = arith.constant 0 : i32
    %c0_i32_0 = arith.constant 0 : i32
    %c0_i32_1 = arith.constant 0 : i32
    return %arg0, %c0_i32, %c0_i32_0 : i32, i32, i32
  }
  func.func @transform_2(%arg0: i32) -> (i32, i32, i32) {
    %c0_i32 = arith.constant 0 : i32
    %c0_i32_0 = arith.constant 0 : i32
    %c0_i32_1 = arith.constant 0 : i32
    return %arg0, %c0_i32, %c0_i32_0 : i32, i32, i32
  }
}

</mosaic_0001>

<bundles_post_ra>
// kernel: tpu_custom_call.1
= control target key start
LH: loop header
LB: loop body
LE: loop exit
PB: predicated region body
PF: predicated region fallthrough
CT: control target
= control target key end

     0   :  { %7 = vsyncpa [#allocation3], 0  ;;  %s10653_s0 = inlined_call_operand.hbm [shape: f32[8,2304], index: 0, kind: input, shape index: {}]   ;;  %s10654_s1 = inlined_call_operand.hbm [shape: f32[2,8,8], index: 1, kind: input, shape index: {}]   ;;  %s10655_s2 = inlined_call_operand.hbm [shape: f32[2,8,2304], index: 2, kind: output, shape index: {}]  }
   0x1   :  { %8 = vsyncpa [#allocation6], 0 }
   0x2   :  { %10 = vsyncpa [#allocation6 + $0x1], 0 }
   0x3   :  { %11 = vsyncpa [#allocation4], 0 }
   0x4   :  { %13 = vsyncpa [#allocation4 + $0x1], 0  ;;  %s7750_s9 = smov 0   ;;  %s7752_s10 = smov 0  }
   0x5   :  { %s7754_s11 = smov 0   ;;  %s7756_s12 = smov 0  }
   0x6 LB: > { %s7771_s13 = sadd.s32 4294967295, %s7720_s12   ;;  %s7209_s14 = sadd.s32 4294967294, %s7720_s12   ;;  %s7720_s12 = sphi %s7756_s12, %s11400_s12   ;;  %s7716_s11 = sphi %s7754_s11, %s11399_s11   ;;  %s7712_s10 = sphi %s7752_s10, %s11398_s10   ;;  %s7708_s9 = sphi %s7750_s9, %s11397_s9  }
   0x7   : > { %p60_p0 = scmp.ne.s32.totalorder %s7712_s10, %s7708_s9  ;;  %p10656_p1 = scmp.eq.s32.totalorder %s7771_s13, 0 }
   0x8   : > { %p90_p3 = scmp.eq.s32.totalorder %s7209_s14, 1  ;;  %p7210_p5 = scmp.ge.s32.totalorder %s7720_s12, 1 }
   0x9   : > { %p7780_p4 = por %p10656_p1, %p60_p0  ;;  %p97_p7 = scmp.lt.s32.totalorder %s7720_s12, 3 }
   0xa   : > { %p7785_p6 = por %p90_p3, %p60_p0  ;;  %s7722_s18 = smov [#allocation2]  }
   0xb   : > { %s10861_s15 = scalar_select %p7780_p4, 1, 0 }
   0xc   : > { %s10862_s16 = scalar_select %p7785_p6, 1, 0 }
   0xd   : > { %p7790_p8 = pnand %p7210_p5, %p97_p7  ;;  %s110_s19 = sshll.u32 %s7722_s18, 4  ;;  %s111_s19 = int_to_ptr.vmem [resolvable:$true] %s110_s19 }
   0xe   : > { %s7798_s20 = sadd.s32 1, %s7720_s12   ;;  %s47_s24 = sadd.s32 1, %s7716_s11 }
   0xf   : > { %s10863_s17 = scalar_select %p7790_p8, 1, 0 }
  0x10   : > { %p7437_p10 = pneg %p7790_p8  ;;  %s44_s22 = ssub.s32 %s7720_s12, %s7798_s20 }
  0x11   : > { %p7808_p12 = scmp.eq.s32.totalorder %s44_s22, 0  ;;  %s7592_s27 = scalar_lea.hbm %s10653_s0, 2304 }
  0x12   : > { %p7802_p11 = pnand %p7437_p10, %p10656_p1  ;;  %p7593_p0 = scmp.ne.s32.totalorder %s10653_s0, %s7592_s27 }
  0x13   : > { %s10865_s23 = scalar_select %p7808_p12, 1, 0 }
  0x14   : > { %p7594_p3 = pneg %p7802_p11  ;;  %p7599_p10 = scmp.lt.u32.totalorder %s7592_s27, %s10653_s0 }
  0x16   : > { %p7595_p5 = pnand %p7594_p3, %p7593_p0 }
  0x18   : > { %p7596_p7 = pneg %p7595_p5 }
  0x1a   : > { %p7601_p9 = pnand %p7599_p10, %p7596_p7 }
  0x1c   : > { %7604 = shalt.err (!%p7601_p9)
}
  0x1d   : > { %s7605_s4 = scalar_lea.vmem %s111_s19, 2304  ;;  %p7613_p6 = scmp.lt.s32.totalorder %s111_s19, %s111_s19 }
  0x1e   : > { %p7606_p1 = scmp.ne.s32.totalorder %s111_s19, %s7605_s4  ;;  %p7614_p4 = scmp.lt.s32.totalorder %s7605_s4, %s7605_s4 }
  0x20   : > { %p7608_p2 = pnand %p7606_p1, %p7594_p3  ;;  %p7615_p8 = por %p7614_p4, %p7613_p6 }
  0x22   : > { %p7609_p13 = pneg %p7608_p2 }
  0x24   : > { %p7616_p12 = pnand %p7615_p8, %p7609_p13 }
  0x26   : > { %7619 = shalt.err (!%p7616_p12)
}
  0x27   : > { %7440 = dma.hbm_to_vmem [thread:$0]  (!%p7802_p11), %s10653_s0, 2304, %s111_s19, [#allocation3]  }
  0x28   : > { %p10866_p1 = scmp.ne.s32.totalorder %s10865_s23, 0  ;;  %p55_p2 = scmp.eq.s32.totalorder %s7720_s12, 0 }
  0x29   : > { %p10867_p4 = scmp.ne.s32.totalorder %s7716_s11, %s7712_s10  ;;  %p10868_p6 = scmp.eq.s32.totalorder %s7771_s13, 1 }
  0x2a   : > { %s7834_s7 = scalar_select %p10866_p1, %s7716_s11, %s47_s24  }
  0x2b   : > { %p7842_p8 = por %p10868_p6, %p10867_p4  ;;  %p7450_p9 = scmp.lt.s32.totalorder %s7720_s12, 2 }
  0x2c   : > { %s121_s14 = sand.u32 1, %s7716_s11   ;;  %p10870_p12 = pmov %p10867_p4 }
  0x2d   : > { %s7213_s18 = sshll.u32 %s121_s14, 3  ;;  %s7214_s21 = sshll.u32 %s7720_s12, 7 }
  0x2e   : > { %p56_p13 = por %p55_p2, %p10870_p12  ;;  %s7855_s19 = scalar_lea.hbm %s10654_s1, %s7214_s21 }
  0x2f   : > { %s125_s23 = scalar_lea.vmem [#allocation5], %s7213_s18  ;;  %s122_s27 = scalar_lea.sflag [#allocation6], %s121_s14 }
  0x30   : > { %s132_s24 = sshll.u32 %s125_s23, 4  ;;  %p7857_p11 = pnand %p7450_p9, %p56_p13  ;;  %s7861_s24 = int_to_ptr.vmem [resolvable:$true] %s132_s24 }
  0x31   : > { %s7620_s28 = scalar_lea.hbm %s7855_s19, 128  ;;  %s7625_s3 = scalar_lea.hbm %s10654_s1, 256 }
  0x32   : > { %p7621_p0 = scmp.ne.s32.totalorder %s7855_s19, %s7620_s28  ;;  %p7622_p3 = pneg %p7857_p11 }
  0x33   : > { %p7626_p10 = scmp.lt.u32.totalorder %s7855_s19, %s10654_s1  ;;  %p7627_p1 = scmp.lt.u32.totalorder %s7625_s3, %s7620_s28 }
  0x34   : > { %p7623_p5 = pnand %p7622_p3, %p7621_p0  ;;  %p7629_p4 = scmp.lt.u32.totalorder %s7620_s28, %s7855_s19 }
  0x35   : > { %p7628_p2 = por %p7627_p1, %p7626_p10 }
  0x36   : > { %p7624_p7 = pneg %p7623_p5 }
  0x37   : > { %p7630_p6 = por %p7629_p4, %p7628_p2 }
  0x39   : > { %p7631_p9 = pnand %p7630_p6, %p7624_p7 }
  0x3b   : > { %7634 = shalt.err (!%p7631_p9)
}
  0x3c   : > { %s7635_s6 = scalar_lea.vmem %s7861_s24, 128  ;;  %s7723_s14 = smov [#allocation5]  }
  0x3d   : > { %p7636_p12 = scmp.ne.s32.totalorder %s7861_s24, %s7635_s6  ;;  %s7640_s18 = sshll.u32 %s7723_s14, 4  ;;  %s7641_s18 = int_to_ptr.vmem [resolvable:$false] %s7640_s18 }
  0x3e   : > { %s7642_s21 = scalar_lea.vmem %s7641_s18, 256  ;;  %p7643_p5 = scmp.lt.s32.totalorder %s7861_s24, %s7641_s18 }
  0x3f   : > { %p7638_p13 = pnand %p7636_p12, %p7622_p3  ;;  %p7644_p10 = scmp.lt.s32.totalorder %s7642_s21, %s7635_s6 }
  0x41   : > { %p7639_p0 = pneg %p7638_p13  ;;  %p7645_p1 = por %p7644_p10, %p7643_p5 }
  0x43   : > { %p7646_p2 = pnand %p7645_p1, %p7639_p0 }
  0x45   : > { %7649 = shalt.err (!%p7646_p2)
}
  0x46   : > { %7444 = dma.hbm_to_vmem [thread:$0]  (!%p7857_p11), %s7855_s19, 128, %s7861_s24, %s122_s27  }
  0x47   : > { %p10872_p7 = scmp.ne.s32.totalorder %s10863_s17, 0 }
  0x49   : > { %141 = sbr.rel (%p10872_p7) target bundleno = 804 (0x324), region = 28 }
  0x50   : > { %p10873_p3 = scmp.eq.s32.totalorder %s7771_s13, 0 }
  0x52   : > { %7695 = dma.done.wait (%p10873_p3), [#allocation3], 2304   ;;  %p10874_p4 = pmov %p10873_p3 }
  0x53   : > { %s7895_s22 = sand.u32 1, %s7712_s10   ;;  %p10875_p6 = scmp.ne.s32.totalorder %s10861_s15, 0 }
  0x54   : > { %7697 = vsyncadd (%p10874_p4), [#allocation3], 4294964992  ;;  %s7217_s25 = sshll.u32 %s7895_s22, 3  ;;  %s148_s23 = scalar_lea.sflag [#allocation6], %s7895_s22 }
  0x55   : > { %s151_s26 = scalar_lea.vmem [#allocation5], %s7217_s25 }
  0x56   : > { %7699 = dma.done.wait (%p10875_p6), %s148_s23, 128  }
  0x57   : > { %7701 = vsyncadd (%p10875_p6), %s148_s23, 4294967168  ;;  %v7724_v0 = vmov 3   ;;  %v7725_v1 = vmov 2   ;;  %v491_v2 = vld [vmem:[%s151_s26] sm:$0xff]  ;;  %v7726_v3 = vmov 1   ;;  %v10660_v4 = vmov 0  }
  0x58   : > { %7498 = vset.pattern.permute.xlu1 %v7724_v0  ;;  %7496 = vset.pattern.permute.xlu0 %v7725_v1  ;;  %vm492_vm0 = vcmp.gt.f32.partialorder %v491_v2, 0.5  ;;  %v7728_v6 = vmov 4   ;;  %v7729_v7 = vmov 5   ;;  %v10659_v8 = vlaneseq  ;;  %v7905_v9 = vld [vmem:[#allocation2] sm:$0x3]  ;;  %s7427_s15 = smul.u32 144, %s7895_s22 }
  0x59   : > { %809 = vperm.xlu1 %7498, %v491_v2   ;;  %567 = vperm.xlu0 %7496, %v491_v2   ;;  %v1237_v5 = vsel %vm492_vm0, 1, %v10660_v4  ;;  %10876 = vst [vmem:[#allocation11_spill] sm:$0xff] %v7905_v9  ;;  %v7907_v10 = vld [vmem:[#allocation2 + $0x8] sm:$0x3]  ;;  %v7912_v12 = vld [vmem:[#allocation2 + $0x10] sm:$0x3] }
  0x5a   : > { %10877 = vst [vmem:[#allocation12_spill] sm:$0xff] %v7907_v10  ;;  %v7910_v11 = vshrl.u32 %v10659_v8, 7  ;;  %10879 = vst [vmem:[#allocation14_spill] sm:$0xff] %v7912_v12  ;;  %v7914_v13 = vld [vmem:[#allocation2 + $0x18] sm:$0x3]  ;;  %v257_v15 = vrot.slane %v7905_v9, 6 }
  0x5b   : > { %10880 = vst [vmem:[#allocation15_spill] sm:$0xff] %v7914_v13  ;;  %v7916_v14 = vld [vmem:[#allocation2 + $0x20] sm:$0x3]  ;;  %v258_v16 = vrot.slane %v7907_v10, 6  ;;  %v7920_v17 = vld [vmem:[#allocation2 + $0x28] sm:$0x3] }
  0x5c   : > { %10878 = vst [vmem:[#allocation13_spill] sm:$0xff] %v7910_v11  ;;  %10881 = vst [vmem:[#allocation16_spill] sm:$0xff] %v7916_v14  ;;  %v7922_v18 = vld [vmem:[#allocation2 + $0x30] sm:$0x3]  ;;  %v7924_v19 = vld [vmem:[#allocation2 + $0x38] sm:$0x3] }
  0x5d   : > { %7499 = vset.pattern.permute.xlu1 %v7726_v3  ;;  %7497 = vset.pattern.permute.xlu0 %v10660_v4  ;;  %10882 = vst [vmem:[#allocation17_spill] sm:$0xff] %v7920_v17  ;;  %10883 = vst [vmem:[#allocation18_spill] sm:$0xff] %v7922_v18  ;;  %v7926_v20 = vld [vmem:[#allocation2 + $0x40] sm:$0x3]  ;;  %v7932_v23 = vld [vmem:[#allocation2 + $0x48] sm:$0x3] }
  0x5e   : > { %903 = vperm.xlu1 %7499, %v491_v2   ;;  %661 = vperm.xlu0 %7497, %v491_v2   ;;  %10884 = vst [vmem:[#allocation19_spill] sm:$0xff] %v7924_v19  ;;  %10885 = vst [vmem:[#allocation20_spill] sm:$0xff] %v7926_v20  ;;  %v7928_v21 = vld [vmem:[#allocation2 + $0x6] ss:$8 sm:$0xf]  ;;  %v259_v40 = vrot.slane %v7912_v12, 6 }
  0x5f   : > { %10886 = vst [vmem:[#allocation21_spill] sm:$0xff] %v7928_v21  ;;  %v7930_v22 = vld [vmem:[#allocation2 + $0x6] ss:$8 sm:$0xf0]  ;;  %10888 = vst [vmem:[#allocation23_spill] sm:$0xff] %v7932_v23  ;;  %v260_v41 = vrot.slane %v7914_v13, 6 }
  0x60   : > { %10887 = vst [vmem:[#allocation22_spill] sm:$0xff] %v7930_v22  ;;  %v7934_v24 = vld [vmem:[#allocation2 + $0x50] sm:$0x3]  ;;  %v7936_v25 = vld [vmem:[#allocation2 + $0x58] sm:$0x3]  ;;  %v261_v42 = vrot.slane %v7916_v14, 6 }
  0x61   : > { %10889 = vst [vmem:[#allocation24_spill] sm:$0xff] %v7934_v24  ;;  %10890 = vst [vmem:[#allocation25_spill] sm:$0xff] %v7936_v25  ;;  %v7938_v26 = vld [vmem:[#allocation2 + $0x60] sm:$0x3]  ;;  %v7944_v29 = vld [vmem:[#allocation2 + $0x68] sm:$0x3] }
  0x62   : > { %7500 = vset.pattern.permute.xlu1 %v7728_v6  ;;  %7501 = vset.pattern.permute.xlu0 %v7729_v7  ;;  %10891 = vst [vmem:[#allocation26_spill] sm:$0xff] %v7938_v26  ;;  %v7940_v27 = vld [vmem:[#allocation2 + $0x46] ss:$8 sm:$0xf]  ;;  %10894 = vst [vmem:[#allocation29_spill] sm:$0xff] %v7944_v29  ;;  %v262_v46 = vrot.slane %v7920_v17, 6 }
  0x63   : > { %1069 = vperm.xlu1 %7500, %v491_v2   ;;  %1239 = vperm.xlu0 %7501, %v1237_v5   ;;  %10892 = vst [vmem:[#allocation27_spill] sm:$0xff] %v7940_v27  ;;  %v7942_v28 = vld [vmem:[#allocation2 + $0x46] ss:$8 sm:$0xf0]  ;;  %v7946_v30 = vld [vmem:[#allocation2] sm:$0xc] }
  0x64   : > { %10893 = vst [vmem:[#allocation28_spill] sm:$0xff] %v7942_v28  ;;  %v7948_v31 = vld [vmem:[#allocation2 + $0x8] sm:$0xc]  ;;  %v7950_v32 = vld [vmem:[#allocation2 + $0x70] sm:$0x3]  ;;  %v293_v36 = vsub.f32 %v7946_v30, %v257_v15  ;;  %v263_v47 = vrot.slane %v7922_v18, 6 }
  0x65   : > { %10895 = vst [vmem:[#allocation30_spill] sm:$0xff] %v7950_v32  ;;  %v7952_v33 = vld [vmem:[#allocation2 + $0x78] sm:$0x3]  ;;  %v7954_v34 = vld [vmem:[#allocation2 + $0x80] sm:$0x3]  ;;  %v294_v37 = vsub.f32 %v7948_v31, %v258_v16  ;;  %v264_v48 = vrot.slane %v7924_v19, 6 }
  0x66   : > { %10896 = vst [vmem:[#allocation31_spill] sm:$0xff] %v7952_v33  ;;  %10897 = vst [vmem:[#allocation32_spill] sm:$0xff] %v7954_v34  ;;  %v7960_v38 = vld [vmem:[#allocation2 + $0x88] sm:$0x3]  ;;  %v7967_v43 = vld [vmem:[#allocation2 + $0x10] sm:$0xc] }
  0x67   : > { %10898 = vst [vmem:[#allocation33_spill] sm:$0xff] %v7960_v38  ;;  %v7969_v44 = vld [vmem:[#allocation2 + $0x18] sm:$0xc]  ;;  %v7971_v45 = vld [vmem:[#allocation2 + $0x20] sm:$0xc]  ;;  %v265_v49 = vrot.slane %v7926_v20, 6  ;;  %v295_v1 = vsub.f32 %v7967_v43, %v259_v40 }
  0x68   : > { %v7977_v50 = vld [vmem:[#allocation2 + $0x28] sm:$0xc]  ;;  %v7979_v51 = vld [vmem:[#allocation2 + $0x30] sm:$0xc]  ;;  %v7981_v52 = vld [vmem:[#allocation2 + $0x38] sm:$0xc]  ;;  %v297_v3 = vsub.f32 %v7971_v45, %v261_v42 }
  0x69   : > { %10899 = vst [vmem:[#allocation34_spill] sm:$0xff] %v7977_v50  ;;  %10900 = vst [vmem:[#allocation35_spill] sm:$0xff] %v7979_v51  ;;  %v266_v53 = vrot.slane %v7932_v23, 6  ;;  %v267_v54 = vrot.slane %v7934_v24, 6  ;;  %v268_v55 = vrot.slane %v7936_v25, 6  ;;  %v269_v56 = vrot.slane %v7938_v26, 6 }
  0x6a   : > { %10901 = vst [vmem:[#allocation36_spill] sm:$0xff] %v7981_v52  ;;  %v7987_v57 = vld [vmem:[#allocation2 + $0x40] sm:$0xc]  ;;  %v270_v58 = vrot.slane %v7944_v29, 6  ;;  %v271_v59 = vrot.slane %v7950_v32, 6  ;;  %v272_v60 = vrot.slane %v7952_v33, 6  ;;  %v298_v15 = vsub.f32 %v7977_v50, %v262_v46 }
  0x6b   : > { %10902 = vst [vmem:[#allocation37_spill] sm:$0xff] %v7987_v57  ;;  %v273_v61 = vrot.slane %v7954_v34, 6  ;;  %v7993_v62 = vld [vmem:[#allocation2 + $0x48] sm:$0xc]  ;;  %v7995_v63 = vld [vmem:[#allocation2 + $0x50] sm:$0xc]  ;;  %v299_v16 = vsub.f32 %v7979_v51, %v263_v47  ;;  %v300_v8 = vsub.f32 %v7981_v52, %v264_v48  ;;  %v301_v4 = vsub.f32 %v7987_v57, %v265_v49 }
  0x6c   : > { %10903 = vst [vmem:[#allocation38_spill] sm:$0xff] %v7993_v62  ;;  %10904 = vst [vmem:[#allocation39_spill] sm:$0xff] %v7995_v63  ;;  %v274_v0 = vrot.slane %v7960_v38, 6  ;;  %v8001_v5 = vld [vmem:[#allocation2 + $0x58] sm:$0xc]  ;;  %v302_v42 = vsub.f32 %v7993_v62, %v266_v53  ;;  %v303_v35 = vsub.f32 %v7995_v63, %v267_v54  ;;  %v8028_v38 = vadd.f32 1.0, %v293_v36 }
  0x6d   : > { %10905 = vst [vmem:[#allocation40_spill] sm:$0xff] %v8001_v5  ;;  %v8003_v6 = vld [vmem:[#allocation2 + $0x60] sm:$0xc]  ;;  %v8005_v7 = vld [vmem:[#allocation2 + $0x68] sm:$0xc]  ;;  %v304_v27 = vsub.f32 %v8001_v5, %v268_v55  ;;  %v8030_v53 = vadd.f32 1.0, %v294_v37 }
  0x6e   : > { %10906 = vst [vmem:[#allocation41_spill] sm:$0xff] %v8003_v6  ;;  %10907 = vst [vmem:[#allocation42_spill] sm:$0xff] %v8005_v7  ;;  %v8011_v39 = vld [vmem:[#allocation2 + $0x70] sm:$0xc]  ;;  %v8013_v40 = vld [vmem:[#allocation2 + $0x78] sm:$0xc]  ;;  %v305_v46 = vsub.f32 %v8003_v6, %v269_v56  ;;  %v306_v47 = vsub.f32 %v8005_v7, %v270_v58 }
  0x6f   : > { %10908 = vst [vmem:[#allocation43_spill] sm:$0xff] %v8011_v39  ;;  %10909 = vst [vmem:[#allocation44_spill] sm:$0xff] %v8013_v40  ;;  %v8021_v28 = vld [vmem:[#allocation2 + $0x88] sm:$0xc]  ;;  %v307_v48 = vsub.f32 %v8011_v39, %v271_v59  ;;  %v308_v49 = vsub.f32 %v8013_v40, %v272_v60  ;;  %v8032_v54 = vadd.f32 1.0, %v295_v1  ;;  %v8036_v56 = vadd.f32 1.0, %v297_v3 }
  0x70   : > { %10911 = vst [vmem:[#allocation46_spill] sm:$0xff] %v8021_v28  ;;  %v310_v22 = vsub.f32 %v8021_v28, %v274_v0  ;;  %10912 = vst [vmem:[#allocation47_spill] sm:$0xff] %v8028_v38  ;;  %v8038_v34 = vadd.f32 1.0, %v298_v15  ;;  %v8040_v58 = vadd.f32 1.0, %v299_v16  ;;  %v8042_v59 = vadd.f32 1.0, %v300_v8  ;;  %s10338_s17 = scalar_lea.vmem [#allocation7], %s7427_s15 }
  0x71   : > { %10913 = vst [vmem:[#allocation48_spill] sm:$0xff] %v8030_v53  ;;  %10914 = vst [vmem:[#allocation49_spill] sm:$0xff] %v8032_v54  ;;  %v8044_v60 = vadd.f32 1.0, %v301_v4  ;;  %v8048_v36 = vadd.f32 1.0, %v303_v35  ;;  %v8050_v37 = vadd.f32 1.0, %v304_v27  ;;  %v8052_v0 = vadd.f32 1.0, %v305_v46 }
  0x72   : > { %10916 = vst [vmem:[#allocation51_spill] sm:$0xff] %v8036_v56  ;;  %10917 = vst [vmem:[#allocation52_spill] sm:$0xff] %v8038_v34  ;;  %v8054_v1 = vadd.f32 1.0, %v306_v47  ;;  %v8058_v3 = vadd.f32 1.0, %v308_v49  ;;  %v8062_v8 = vadd.f32 1.0, %v310_v22  ;;  %v437_v4 = vrot.slane %v8028_v38, 1 }
  0x73   : > { %10918 = vst [vmem:[#allocation53_spill] sm:$0xff] %v8040_v58  ;;  %10919 = vst [vmem:[#allocation54_spill] sm:$0xff] %v8042_v59  ;;  %v438_v16 = vrot.slane %v8030_v53, 1  ;;  %v439_v35 = vrot.slane %v8032_v54, 1  ;;  %v442_v46 = vrot.slane %v8038_v34, 1  ;;  %v443_v47 = vrot.slane %v8040_v58, 1 }
  0x74   : > { %10920 = vst [vmem:[#allocation55_spill] sm:$0xff] %v8044_v60  ;;  %10922 = vst [vmem:[#allocation57_spill] sm:$0xff] %v8048_v36  ;;  %v447_v49 = vrot.slane %v8048_v36, 1  ;;  %v448_v33 = vrot.slane %v8050_v37, 1  ;;  %v449_v32 = vrot.slane %v8052_v0, 1  ;;  %v450_v29 = vrot.slane %v8054_v1, 1 }
  0x75   : > { %10923 = vst [vmem:[#allocation58_spill] sm:$0xff] %v8050_v37  ;;  %10924 = vst [vmem:[#allocation59_spill] sm:$0xff] %v8052_v0  ;;  %v452_v25 = vrot.slane %v8058_v3, 1  ;;  %v454_v23 = vrot.slane %v8062_v8, 1  ;;  %v8083_v20 = vmul.f32 %v437_v4, %v8028_v38  ;;  %v8086_v19 = vmul.f32 %v438_v16, %v8030_v53  ;;  %v10969_v38 = vld [vmem:[#allocation22_spill] sm:$0xff]  ;;  %s7428_s19 = smul.u32 2304, %s7771_s13 }
  0x76   : > { %10925 = vst [vmem:[#allocation60_spill] sm:$0xff] %v8054_v1  ;;  %10927 = vst [vmem:[#allocation62_spill] sm:$0xff] %v8058_v3  ;;  %v8089_v18 = vmul.f32 %v439_v35, %v8032_v54  ;;  %v8098_v13 = vmul.f32 %v442_v46, %v8038_v34  ;;  %v8101_v12 = vsub.s32 2, %v7910_v11  ;;  %v8104_v4 = vmul.f32 %v443_v47, %v8040_v58  ;;  %v10965_v58 = vld [vmem:[#allocation31_spill] sm:$0xff]  ;;  %s7127_s24 = sshll.u32 %s10338_s17, 4  ;;  %s7113_s13 = scalar_lea.sflag [#allocation4], %s7895_s22  ;;  %s10609_s24 = int_to_ptr.vmem [resolvable:$true] %s7127_s24 }
  0x77   : > { %10929 = vst [vmem:[#allocation64_spill] sm:$0xff] %v8062_v8  ;;  %10930 = vst [vmem:[#allocation65_spill] sm:$0xff] %v8083_v20  ;;  %v8119_v46 = vmul.f32 %v448_v33, %v8050_v37  ;;  %v8125_v47 = vmul.f32 %v450_v29, %v8054_v1  ;;  %v8144_v29 = vsub.s32 0, %v7910_v11  ;;  %v8170_v33 = vsub.s32 1, %v7910_v11  ;;  %v10960_v37 = vld [vmem:[#allocation24_spill] sm:$0xff]  ;;  %v10962_v1 = vld [vmem:[#allocation26_spill] sm:$0xff]  ;;  %s10607_s29 = scalar_lea.hbm %s10655_s2, %s7428_s19 }
  0x78   : > { %10931 = vst [vmem:[#allocation66_spill] sm:$0xff] %v8086_v19  ;;  %10932 = vst [vmem:[#allocation67_spill] sm:$0xff] %v8089_v18  ;;  %v10976_v34 = vld [vmem:[#allocation27_spill] sm:$0xff]  ;;  %v8344_v53 = vsub.s32 5, %v7910_v11  ;;  %v10996_v54 = vrot.slane %v7967_v43, %v8101_v12  ;;  %v11008_v18 = vrot.slane %v8005_v7, %v8101_v12  ;;  %v11009_v19 = vrot.slane %v8011_v39, %v8101_v12  ;;  %s7650_s30 = scalar_lea.vmem %s10609_s24, 2304  ;;  %s7734_s3 = smov [#allocation7]  }
  0x79   : > { %10935 = vst [vmem:[#allocation70_spill] sm:$0xff] %v8098_v13  ;;  %10936 = vst [vmem:[#allocation71_spill] sm:$0xff] %v8101_v12  ;;  %v11010_v20 = vrot.slane %v8013_v40, %v8101_v12  ;;  %vm2382_vm4 = vcmask 64512   ;;  %p7651_p11 = scmp.ne.s32.totalorder %s10609_s24, %s7650_s30  ;;  %s7654_s4 = sshll.u32 %s7734_s3, 4  ;;  %s7655_s4 = int_to_ptr.vmem [resolvable:$false] %s7654_s4 }
  0x7a   : > { %10937 = vst [vmem:[#allocation72_spill] sm:$0xff] %v8104_v4  ;;  %10942 = vst [vmem:[#allocation77_spill] sm:$0xff] %v8119_v46  ;;  %s7656_s5 = scalar_lea.vmem %s7655_s4, 4608  ;;  %p7657_p13 = scmp.lt.s32.totalorder %s10609_s24, %s7655_s4 }
  0x7b   : > { %10944 = vst [vmem:[#allocation79_spill] sm:$0xff] %v8125_v47  ;;  %10949 = vst [vmem:[#allocation84_spill] sm:$0xff] %v8144_v29  ;;  %v10972_v47 = vmov 0  ;;  %p7652_p9 = pnand %p7651_p11, %p7842_p8  ;;  %p7658_p0 = scmp.lt.s32.totalorder %s7656_s5, %s7650_s30 }
  0x7c   : > { %10951 = vst [vmem:[#allocation86_spill] sm:$0xff] %v8170_v33  ;;  %10984 = vst [vmem:[#allocation87_spill] sm:$0xff] %v8344_v53 }
  0x7d   : > { %p7653_p12 = pneg %p7652_p9  ;;  %p7659_p5 = por %p7658_p0, %p7657_p13 }
  0x7f   : > { %p7660_p10 = pnand %p7659_p5, %p7653_p12 }
  0x8c   : > { %2350 = vxpose.xlu1.b32.start.end [1/1] (short) (narrow) %v491_v2, 8  ;;  %v296_v2 = vsub.f32 %v7969_v44, %v260_v41  ;;  %v8015_v41 = vld [vmem:[#allocation2 + $0x80] sm:$0xc] }
  0x8d   : > { %10910 = vst [vmem:[#allocation45_spill] sm:$0xff] %v8015_v41  ;;  %v309_v21 = vsub.f32 %v8015_v41, %v273_v61  ;;  %v8046_v61 = vadd.f32 1.0, %v302_v42  ;;  %v441_v42 = vrot.slane %v8036_v56, 1  ;;  %v11011_v33 = vrot.slane %v8015_v41, %v8101_v12 }
  0x8e   : > { %v8034_v55 = vadd.f32 1.0, %v296_v2  ;;  %v8056_v2 = vadd.f32 1.0, %v307_v48  ;;  %v444_v48 = vrot.slane %v8042_v59, 1 }
  0x8f   : > { %10921 = vst [vmem:[#allocation56_spill] sm:$0xff] %v8046_v61  ;;  %v8060_v15 = vadd.f32 1.0, %v309_v21  ;;  %v445_v21 = vrot.slane %v8044_v60, 1  ;;  %v446_v22 = vrot.slane %v8046_v61, 1  ;;  %v8095_v14 = vmul.f32 %v441_v42, %v8036_v56 }
  0x90   : > { %10915 = vst [vmem:[#allocation50_spill] sm:$0xff] %v8034_v55  ;;  %10926 = vst [vmem:[#allocation61_spill] sm:$0xff] %v8056_v2  ;;  %v440_v27 = vrot.slane %v8034_v55, 1  ;;  %v451_v26 = vrot.slane %v8056_v2, 1  ;;  %v8107_v16 = vmul.f32 %v444_v48, %v8042_v59  ;;  %v8116_v42 = vmul.f32 %v447_v49, %v8048_v36  ;;  %v10961_v36 = vld [vmem:[#allocation25_spill] sm:$0xff]  ;;  %v10964_v59 = vld [vmem:[#allocation30_spill] sm:$0xff] }
  0x91   : > { %10928 = vst [vmem:[#allocation63_spill] sm:$0xff] %v8060_v15  ;;  %v453_v24 = vrot.slane %v8060_v15, 1  ;;  %10934 = vst [vmem:[#allocation69_spill] sm:$0xff] %v8095_v14  ;;  %v8110_v35 = vmul.f32 %v445_v21, %v8044_v60  ;;  %v8131_v21 = vmul.f32 %v452_v25, %v8058_v3  ;;  %v8137_v49 = vmul.f32 %v454_v23, %v8062_v8  ;;  %v10952_v25 = vld [vmem:[#allocation14_spill] sm:$0xff]  ;;  %v10954_v23 = vld [vmem:[#allocation16_spill] sm:$0xff] }
  0x92   : > { %v8092_v17 = vmul.f32 %v440_v27, %v8034_v55  ;;  %10938 = vst [vmem:[#allocation73_spill] sm:$0xff] %v8107_v16  ;;  %v8113_v27 = vmul.f32 %v446_v22, %v8046_v61  ;;  %10941 = vst [vmem:[#allocation76_spill] sm:$0xff] %v8116_v42  ;;  %v8122_v55 = vmul.f32 %v449_v32, %v8052_v0  ;;  %v10702_v8 = vmov 0.0   ;;  %v10955_v3 = vld [vmem:[#allocation17_spill] sm:$0xff]  ;;  %v10956_v32 = vld [vmem:[#allocation18_spill] sm:$0xff] }
  0x93   : > { %10939 = vst [vmem:[#allocation74_spill] sm:$0xff] %v8110_v35  ;;  %v8128_v48 = vmul.f32 %v451_v26, %v8056_v2  ;;  %10946 = vst [vmem:[#allocation81_spill] sm:$0xff] %v8131_v21  ;;  %v8134_v22 = vmul.f32 %v453_v24, %v8060_v15  ;;  %v8147_v26 = vsub.s32 3, %v7910_v11  ;;  %2689 = vmatprep.mubr.f32.mxu0 %v10702_v8  ;;  %2452 = vmatprep.mubr.f32.mxu1 %v10702_v8  ;;  %v10953_v24 = vld [vmem:[#allocation15_spill] sm:$0xff]  ;;  %v10958_v2 = vld [vmem:[#allocation20_spill] sm:$0xff]  ;;  %v10978_v56 = vmov 0 }
  0x94   : > { %10933 = vst [vmem:[#allocation68_spill] sm:$0xff] %v8092_v17  ;;  %10940 = vst [vmem:[#allocation75_spill] sm:$0xff] %v8113_v27  ;;  %v10957_v8 = vld [vmem:[#allocation19_spill] sm:$0xff]  ;;  %v10963_v0 = vld [vmem:[#allocation29_spill] sm:$0xff]  ;;  %v8356_v42 = vsub.s32 7, %v7910_v11  ;;  %v10997_v35 = vrot.slane %v7969_v44, %v8101_v12 }
  0x95   : > { %10943 = vst [vmem:[#allocation78_spill] sm:$0xff] %v8122_v55  ;;  %10945 = vst [vmem:[#allocation80_spill] sm:$0xff] %v8128_v48  ;;  %v10959_v15 = vld [vmem:[#allocation23_spill] sm:$0xff]  ;;  %v10966_v61 = vld [vmem:[#allocation32_spill] sm:$0xff] }
  0x96   : > { %10947 = vst [vmem:[#allocation82_spill] sm:$0xff] %v8134_v22  ;;  %10948 = vst [vmem:[#allocation83_spill] sm:$0xff] %v8137_v49  ;;  %v10967_v60 = vld [vmem:[#allocation33_spill] sm:$0xff]  ;;  %v8230_v21 = vld [vmem:[#allocation2 + $0x86] ss:$8 sm:$0x3] }
  0x97   : > { %10950 = vst [vmem:[#allocation85_spill] sm:$0xff] %v8147_v26  ;;  %10968 = vst [vmem:[#allocation33_spill] sm:$0xff] %v8230_v21  ;;  %v10970_v48 = vld [vmem:[#allocation21_spill] sm:$0xff]  ;;  %v10975_v22 = vld [vmem:[#allocation28_spill] sm:$0xff]  ;;  %vm10808_vm3 = vcmp.gt.f32.partialorder %v8230_v21, 0.5  ;;  %v10995_v21 = vrot.slane %v7948_v31, %v8101_v12 }
  0x98   : > { %v10971_v49 = vor.u32 %v10969_v38, %v10970_v48  ;;  %v10977_v50 = vor.u32 %v10975_v22, %v10976_v34  ;;  %v8341_v48 = vsub.s32 4, %v7910_v11  ;;  %v8347_v34 = vsub.s32 6, %v7910_v11  ;;  %10988 = vst [vmem:[#allocation89_spill] sm:$0xff] %v8356_v42  ;;  %v10999_v42 = vld [vmem:[#allocation34_spill] sm:$0xff] }
  0x99   : > { %v10994_v11 = vrot.slane %v7946_v30, %v8101_v12 }
  0x9a   : > { %vm8235_vm1 = vcmp.gt.f32.partialorder %v10971_v49, 0.5  ;;  %vm8258_vm2 = vcmp.gt.f32.partialorder %v10977_v50, 0.5  ;;  %v10981_v49 = vmov 0   ;;  %10983 = vst [vmem:[#allocation27_spill] sm:$0xff] %v8341_v48  ;;  %10985 = vst [vmem:[#allocation88_spill] sm:$0xff] %v8347_v34 }
  0x9b   : > { %v10973_v47 = vsel %vm8235_vm1, 4294967295, %v10972_v47  ;;  %v10979_v56 = vsel %vm8258_vm2, 4294967295, %v10978_v56  ;;  %v8338_v38 = vsel %vm8235_vm1, 1, %v10981_v49  ;;  %v8367_v22 = vsel %vm8258_vm2, 1, %v10981_v49 }
  0x9c   : > { %10974 = vst [vmem:[#allocation22_spill] sm:$0xff] %v10973_v47  ;;  %10980 = vst [vmem:[#allocation21_spill] sm:$0xff] %v10979_v56  ;;  %v8372_v47 = vsel %vm10808_vm3, 1, %v10981_v49  ;;  %v10998_v56 = vrot.slane %v7971_v45, %v8101_v12 }
  0x9d   : > { %10982 = vst [vmem:[#allocation28_spill] sm:$0xff] %v8338_v38  ;;  %10992 = vst [vmem:[#allocation90_spill] sm:$0xff] %v8367_v22 }
  0x9e   : > { %10993 = vst [vmem:[#allocation91_spill] sm:$0xff] %v8372_v47 }
  0xd8   : > { %v568_v14 = vpop.permute.xlu0 %567  ;;  %v8422_v4 = vpop.permute.xlu1 %809 }
  0xd9   : > { %v570_v38 = vmin.f32 %v10994_v11, %v568_v14  ;;  %v571_v49 = vmin.f32 %v10995_v21, %v568_v14  ;;  %v572_v34 = vmin.f32 %v10996_v54, %v568_v14  ;;  %v573_v22 = vmin.f32 %v10997_v35, %v568_v14 }
  0xda   : > { %v574_v47 = vmin.f32 %v10998_v56, %v568_v14  ;;  %v11000_v11 = vrot.slane %v10999_v42, %v8101_v12  ;;  %v11001_v21 = vrot.slane %v7979_v51, %v8101_v12  ;;  %v11002_v54 = vrot.slane %v7981_v52, %v8101_v12 }
  0xdb   : > { %v11003_v35 = vrot.slane %v7987_v57, %v8101_v12  ;;  %v11004_v56 = vrot.slane %v7993_v62, %v8101_v12 }
  0xdc   : > { %v575_v53 = vmin.f32 %v11000_v11, %v568_v14  ;;  %v576_v48 = vmin.f32 %v11001_v21, %v568_v14  ;;  %v577_v13 = vmin.f32 %v11002_v54, %v568_v14  ;;  %v11005_v11 = vrot.slane %v7995_v63, %v8101_v12 }
  0xdd   : > { %v662_v16 = vpop.permute.xlu0 %661  ;;  %v578_v27 = vmin.f32 %v11003_v35, %v568_v14  ;;  %v579_v46 = vmin.f32 %v11004_v56, %v568_v14  ;;  %v11006_v21 = vrot.slane %v8001_v5, %v8101_v12  ;;  %v11007_v54 = vrot.slane %v8003_v6, %v8101_v12 }
  0xde   : > { %v580_v50 = vmin.f32 %v11005_v11, %v568_v14  ;;  %v583_v35 = vmin.f32 %v11008_v18, %v568_v14  ;;  %v584_v56 = vmin.f32 %v11009_v19, %v568_v14  ;;  %v585_v11 = vmin.f32 %v11010_v20, %v568_v14 }
  0xdf   : > { %v581_v55 = vmin.f32 %v11006_v21, %v568_v14  ;;  %v582_v17 = vmin.f32 %v11007_v54, %v568_v14  ;;  %v586_v21 = vmin.f32 %v11011_v33, %v568_v14  ;;  %v11012_v6 = vrot.slane %v8021_v28, %v8101_v12 }
  0xe0   : > { %v11013_v18 = vrot.slane %v7946_v30, %v8147_v26  ;;  %v11015_v19 = vrot.slane %v7948_v31, %v8147_v26  ;;  %v11017_v20 = vrot.slane %v7905_v9, %v8144_v29  ;;  %v11018_v12 = vrot.slane %v7907_v10, %v8144_v29 }
  0xe1   : > { %v587_v54 = vmin.f32 %v11012_v6, %v568_v14  ;;  %v11019_v6 = vrot.slane %v10952_v25, %v8144_v29  ;;  %v11021_v31 = vrot.slane %v10954_v23, %v8144_v29  ;;  %v11023_v10 = vrot.slane %v10956_v32, %v8144_v29 }
  0xe2   : > { %v8470_v7 = vmin.f32 %v11013_v18, %v8422_v4  ;;  %v8476_v40 = vmin.f32 %v11015_v19, %v8422_v4  ;;  %v664_v33 = vmax.f32 %v11017_v20, %v662_v16  ;;  %v665_v14 = vmax.f32 %v11018_v12, %v662_v16 }
  0xe3   : > { %v666_v30 = vmax.f32 %v11019_v6, %v662_v16  ;;  %v11020_v18 = vrot.slane %v10953_v24, %v8144_v29  ;;  %v668_v19 = vmax.f32 %v11021_v31, %v662_v16  ;;  %v670_v12 = vmax.f32 %v11023_v10, %v662_v16 }
  0xe4   : > { %11014 = vst [vmem:[#allocation34_spill] sm:$0xff] %v8470_v7  ;;  %11016 = vst [vmem:[#allocation92_spill] sm:$0xff] %v8476_v40  ;;  %v11022_v40 = vrot.slane %v10955_v3, %v8144_v29  ;;  %v11024_v25 = vrot.slane %v10957_v8, %v8144_v29  ;;  %v11025_v24 = vrot.slane %v10958_v2, %v8144_v29 }
  0xe5   : > { %v667_v7 = vmax.f32 %v11020_v18, %v662_v16  ;;  %v11026_v23 = vrot.slane %v10959_v15, %v8144_v29  ;;  %v11027_v3 = vrot.slane %v10960_v37, %v8144_v29  ;;  %v11028_v32 = vrot.slane %v10961_v36, %v8144_v29 }
  0xe6   : > { %v669_v20 = vmax.f32 %v11022_v40, %v662_v16  ;;  %v671_v6 = vmax.f32 %v11024_v25, %v662_v16  ;;  %v672_v18 = vmax.f32 %v11025_v24, %v662_v16  ;;  %v11029_v8 = vrot.slane %v10962_v1, %v8144_v29 }
  0xe7   : > { %v673_v31 = vmax.f32 %v11026_v23, %v662_v16  ;;  %v674_v40 = vmax.f32 %v11027_v3, %v662_v16  ;;  %v675_v10 = vmax.f32 %v11028_v32, %v662_v16  ;;  %v11030_v2 = vrot.slane %v10963_v0, %v8144_v29 }
  0xe8   : > { %v676_v25 = vmax.f32 %v11029_v8, %v662_v16  ;;  %v11031_v15 = vrot.slane %v10964_v59, %v8144_v29  ;;  %v11032_v37 = vrot.slane %v10965_v58, %v8144_v29  ;;  %v11033_v36 = vrot.slane %v10966_v61, %v8144_v29 }
  0xe9   : > { %v677_v24 = vmax.f32 %v11030_v2, %v662_v16  ;;  %v11034_v1 = vrot.slane %v10967_v60, %v8144_v29  ;;  %v682_v28 = vsub.f32 %v570_v38, %v664_v33  ;;  %v683_v9 = vsub.f32 %v571_v49, %v665_v14  ;;  %v904_v33 = vpop.permute.xlu1 %903  ;;  %v11090_v49 = vld [vmem:[#allocation20_spill] sm:$0xff] }
  0xea   : > { %v678_v23 = vmax.f32 %v11031_v15, %v662_v16  ;;  %v679_v3 = vmax.f32 %v11032_v37, %v662_v16  ;;  %v680_v32 = vmax.f32 %v11033_v36, %v662_v16  ;;  %v684_v0 = vsub.f32 %v572_v34, %v666_v30  ;;  %v11082_v34 = vld [vmem:[#allocation16_spill] sm:$0xff] }
  0xeb   : > { %v681_v8 = vmax.f32 %v11034_v1, %v662_v16  ;;  %v685_v2 = vsub.f32 %v573_v22, %v667_v7  ;;  %v686_v41 = vsub.f32 %v574_v47, %v668_v19  ;;  %v687_v39 = vsub.f32 %v575_v53, %v669_v20 }
  0xec   : > { %v688_v59 = vsub.f32 %v576_v48, %v670_v12  ;;  %v689_v15 = vsub.f32 %v577_v13, %v671_v6  ;;  %v690_v5 = vsub.f32 %v578_v27, %v672_v18  ;;  %v691_v63 = vsub.f32 %v579_v46, %v673_v31  ;;  %v11098_v48 = vld [vmem:[#allocation26_spill] sm:$0xff] }
  0xed   : > { %v692_v58 = vsub.f32 %v580_v50, %v674_v40  ;;  %v693_v37 = vsub.f32 %v581_v55, %v675_v10  ;;  %v694_v62 = vsub.f32 %v582_v17, %v676_v25  ;;  %v695_v57 = vsub.f32 %v583_v35, %v677_v24  ;;  %v11049_v40 = vld [vmem:[#allocation35_spill] sm:$0xff]  ;;  %v11051_v25 = vld [vmem:[#allocation36_spill] sm:$0xff] }
  0xee   : > { %v696_v61 = vsub.f32 %v584_v56, %v678_v23  ;;  %v697_v36 = vsub.f32 %v585_v11, %v679_v3  ;;  %v698_v52 = vsub.f32 %v586_v21, %v680_v32  ;;  %v699_v51 = vsub.f32 %v587_v54, %v681_v8  ;;  %v11053_v23 = vld [vmem:[#allocation37_spill] sm:$0xff]  ;;  %v11055_v32 = vld [vmem:[#allocation38_spill] sm:$0xff]  ;;  %v11080_v50 = vld [vmem:[#allocation15_spill] sm:$0xff] }
  0xef   : > { %v8532_v29 = vadd.f32 1.0, %v682_v28  ;;  %v8534_v1 = vadd.f32 1.0, %v683_v9  ;;  %v8536_v16 = vadd.f32 1.0, %v684_v0  ;;  %v8538_v7 = vadd.f32 1.0, %v685_v2  ;;  %v11057_v2 = vld [vmem:[#allocation39_spill] sm:$0xff]  ;;  %v11072_v54 = vld [vmem:[#allocation86_spill] sm:$0xff] }
  0xf0   : > { %v8540_v53 = vadd.f32 1.0, %v686_v41  ;;  %v8542_v13 = vadd.f32 1.0, %v687_v39  ;;  %v8544_v27 = vadd.f32 1.0, %v688_v59  ;;  %v8546_v17 = vadd.f32 1.0, %v689_v15 }
  0xf1   : > { %v8548_v55 = vadd.f32 1.0, %v690_v5  ;;  %v8550_v46 = vadd.f32 1.0, %v691_v63  ;;  %v8552_v28 = vadd.f32 1.0, %v692_v58  ;;  %v8554_v9 = vadd.f32 1.0, %v693_v37  ;;  %v11100_v58 = vld [vmem:[#allocation29_spill] sm:$0xff]  ;;  %v11102_v63 = vld [vmem:[#allocation30_spill] sm:$0xff] }
  0xf2   : > { %v8556_v0 = vadd.f32 1.0, %v694_v62  ;;  %v8558_v47 = vadd.f32 1.0, %v695_v57  ;;  %v8560_v41 = vadd.f32 1.0, %v696_v61  ;;  %v8562_v39 = vadd.f32 1.0, %v697_v36  ;;  %v11059_v36 = vld [vmem:[#allocation40_spill] sm:$0xff]  ;;  %v11092_v61 = vld [vmem:[#allocation23_spill] sm:$0xff] }
  0xf3   : > { %11035 = vst [vmem:[#allocation93_spill] sm:$0xff] %v8548_v55  ;;  %11036 = vst [vmem:[#allocation94_spill] sm:$0xff] %v8550_v46  ;;  %v8564_v59 = vadd.f32 1.0, %v698_v52  ;;  %v8566_v38 = vadd.f32 1.0, %v699_v51  ;;  %v11045_v14 = vrot.slane %v7967_v43, %v8147_v26  ;;  %v11046_v19 = vrot.slane %v7969_v44, %v8147_v26  ;;  %v11084_v51 = vld [vmem:[#allocation17_spill] sm:$0xff]  ;;  %v11088_v52 = vld [vmem:[#allocation19_spill] sm:$0xff] }
  0xf4   : > { %11037 = vst [vmem:[#allocation95_spill] sm:$0xff] %v8552_v28  ;;  %11038 = vst [vmem:[#allocation96_spill] sm:$0xff] %v8554_v9  ;;  %v11047_v12 = vrot.slane %v7971_v45, %v8147_v26  ;;  %v11048_v18 = vrot.slane %v10999_v42, %v8147_v26  ;;  %v11050_v43 = vrot.slane %v11049_v40, %v8147_v26  ;;  %v11094_v57 = vld [vmem:[#allocation24_spill] sm:$0xff]  ;;  %v11096_v62 = vld [vmem:[#allocation25_spill] sm:$0xff] }
  0xf5   : > { %11039 = vst [vmem:[#allocation97_spill] sm:$0xff] %v8556_v0  ;;  %11040 = vst [vmem:[#allocation98_spill] sm:$0xff] %v8558_v47  ;;  %v814_v30 = vmin.f32 %v11045_v14, %v8422_v4  ;;  %v815_v20 = vmin.f32 %v11046_v19, %v8422_v4  ;;  %v11052_v44 = vrot.slane %v11051_v25, %v8147_v26  ;;  %v11104_v5 = vld [vmem:[#allocation34_spill] sm:$0xff] }
  0xf6   : > { %11041 = vst [vmem:[#allocation99_spill] sm:$0xff] %v8560_v41  ;;  %11042 = vst [vmem:[#allocation100_spill] sm:$0xff] %v8562_v39  ;;  %v816_v6 = vmin.f32 %v11047_v12, %v8422_v4  ;;  %v817_v31 = vmin.f32 %v11048_v18, %v8422_v4  ;;  %v818_v10 = vmin.f32 %v11050_v43, %v8422_v4  ;;  %v11061_v12 = vld [vmem:[#allocation41_spill] sm:$0xff]  ;;  %v11063_v43 = vld [vmem:[#allocation42_spill] sm:$0xff] }
  0xf7   : > { %11043 = vst [vmem:[#allocation101_spill] sm:$0xff] %v8564_v59  ;;  %11044 = vst [vmem:[#allocation102_spill] sm:$0xff] %v8566_v38  ;;  %v819_v24 = vmin.f32 %v11052_v44, %v8422_v4  ;;  %v11054_v45 = vrot.slane %v11053_v23, %v8147_v26  ;;  %v11056_v42 = vrot.slane %v11055_v32, %v8147_v26  ;;  %v11065_v23 = vld [vmem:[#allocation43_spill] sm:$0xff] }
  0xf8   : > { %v11058_v15 = vrot.slane %v11057_v2, %v8147_v26  ;;  %v11060_v14 = vrot.slane %v11059_v36, %v8147_v26  ;;  %v11062_v18 = vrot.slane %v11061_v12, %v8147_v26  ;;  %v11064_v25 = vrot.slane %v11063_v43, %v8147_v26  ;;  %v11069_v36 = vld [vmem:[#allocation45_spill] sm:$0xff] }
  0xf9   : > { %v820_v3 = vmin.f32 %v11054_v45, %v8422_v4  ;;  %v821_v8 = vmin.f32 %v11056_v42, %v8422_v4  ;;  %v11066_v45 = vrot.slane %v11065_v23, %v8147_v26  ;;  %v11067_v42 = vld [vmem:[#allocation44_spill] sm:$0xff] }
  0xfa   : > { %v822_v37 = vmin.f32 %v11058_v15, %v8422_v4  ;;  %v823_v19 = vmin.f32 %v11060_v14, %v8422_v4  ;;  %v824_v40 = vmin.f32 %v11062_v18, %v8422_v4  ;;  %v825_v44 = vmin.f32 %v11064_v25, %v8422_v4  ;;  %v11071_v18 = vld [vmem:[#allocation11_spill] sm:$0xff]  ;;  %v11074_v25 = vld [vmem:[#allocation46_spill] sm:$0xff] }
  0xfb   : > { %v826_v32 = vmin.f32 %v11066_v45, %v8422_v4  ;;  %v11068_v2 = vrot.slane %v11067_v42, %v8147_v26  ;;  %v11070_v14 = vrot.slane %v11069_v36, %v8147_v26  ;;  %v11073_v21 = vrot.slane %v11071_v18, %v11072_v54  ;;  %v11076_v45 = vld [vmem:[#allocation12_spill] sm:$0xff]  ;;  %v11078_v42 = vld [vmem:[#allocation14_spill] sm:$0xff] }
  0xfc   : > { %v11075_v11 = vrot.slane %v11074_v25, %v8147_v26  ;;  %v11077_v56 = vrot.slane %v11076_v45, %v11072_v54  ;;  %v11081_v36 = vrot.slane %v11080_v50, %v11072_v54  ;;  %v11085_v25 = vrot.slane %v11084_v51, %v11072_v54 }
  0xfd   : > { %v827_v15 = vmin.f32 %v11068_v2, %v8422_v4  ;;  %v828_v12 = vmin.f32 %v11070_v14, %v8422_v4  ;;  %v906_v43 = vmax.f32 %v11073_v21, %v904_v33  ;;  %v11079_v2 = vrot.slane %v11078_v42, %v11072_v54 }
  0xfe   : > { %v829_v23 = vmin.f32 %v11075_v11, %v8422_v4  ;;  %v907_v35 = vmax.f32 %v11077_v56, %v904_v33  ;;  %v909_v14 = vmax.f32 %v11081_v36, %v904_v33  ;;  %v11083_v21 = vrot.slane %v11082_v34, %v11072_v54  ;;  %v11086_v11 = vld [vmem:[#allocation18_spill] sm:$0xff] }
  0xff   : > { %v908_v22 = vmax.f32 %v11079_v2, %v904_v33  ;;  %v911_v4 = vmax.f32 %v11085_v25, %v904_v33  ;;  %v11087_v45 = vrot.slane %v11086_v11, %v11072_v54  ;;  %v11089_v42 = vrot.slane %v11088_v52, %v11072_v54 }
 0x100   : > { %v910_v18 = vmax.f32 %v11083_v21, %v904_v33  ;;  %v11091_v50 = vrot.slane %v11090_v49, %v11072_v54  ;;  %v11093_v34 = vrot.slane %v11092_v61, %v11072_v54  ;;  %v11095_v51 = vrot.slane %v11094_v57, %v11072_v54  ;;  %v11105_v57 = vld [vmem:[#allocation31_spill] sm:$0xff] }
 0x101   : > { %v912_v56 = vmax.f32 %v11087_v45, %v904_v33  ;;  %v913_v2 = vmax.f32 %v11089_v42, %v904_v33  ;;  %v11097_v11 = vrot.slane %v11096_v62, %v11072_v54  ;;  %v11099_v52 = vrot.slane %v11098_v48, %v11072_v54  ;;  %v11107_v62 = vld [vmem:[#allocation32_spill] sm:$0xff] }
 0x102   : > { %v914_v36 = vmax.f32 %v11091_v50, %v904_v33  ;;  %v915_v21 = vmax.f32 %v11093_v34, %v904_v33  ;;  %v916_v25 = vmax.f32 %v11095_v51, %v904_v33  ;;  %v11101_v49 = vrot.slane %v11100_v58, %v11072_v54  ;;  %v11110_v58 = vld [vmem:[#allocation92_spill] sm:$0xff] }
 0x103   : > { %v917_v45 = vmax.f32 %v11097_v11, %v904_v33  ;;  %v918_v42 = vmax.f32 %v11099_v52, %v904_v33  ;;  %v11103_v61 = vrot.slane %v11102_v63, %v11072_v54  ;;  %v924_v26 = vsub.f32 %v11104_v5, %v906_v43 }
 0x104   : > { %v919_v50 = vmax.f32 %v11101_v49, %v904_v33  ;;  %v11106_v51 = vrot.slane %v11105_v57, %v11072_v54  ;;  %v11108_v11 = vrot.slane %v11107_v62, %v11072_v54  ;;  %v11109_v48 = vrot.slane %v10967_v60, %v11072_v54 }
 0x105   : > { %v920_v34 = vmax.f32 %v11103_v61, %v904_v33  ;;  %v925_v49 = vsub.f32 %v11110_v58, %v907_v35  ;;  %v926_v39 = vsub.f32 %v814_v30, %v908_v22  ;;  %v927_v41 = vsub.f32 %v815_v20, %v909_v14  ;;  %v11118_v58 = vld [vmem:[#allocation66_spill] sm:$0xff] }
 0x106   : > { %v921_v38 = vmax.f32 %v11106_v51, %v904_v33  ;;  %v922_v59 = vmax.f32 %v11108_v11, %v904_v33  ;;  %v923_v52 = vmax.f32 %v11109_v48, %v904_v33  ;;  %v928_v63 = vsub.f32 %v816_v6, %v910_v18 }
 0x107   : > { %v929_v61 = vsub.f32 %v817_v31, %v911_v4  ;;  %v930_v47 = vsub.f32 %v818_v10, %v912_v56  ;;  %v931_v5 = vsub.f32 %v819_v24, %v913_v2  ;;  %v932_v43 = vsub.f32 %v820_v3, %v914_v36 }
 0x108   : > { %v933_v0 = vsub.f32 %v821_v8, %v915_v21  ;;  %v934_v57 = vsub.f32 %v822_v37, %v916_v25  ;;  %v935_v51 = vsub.f32 %v823_v19, %v917_v45  ;;  %v936_v9 = vsub.f32 %v824_v40, %v918_v42  ;;  %v11114_v25 = vld [vmem:[#allocation65_spill] sm:$0xff]  ;;  %v11115_v45 = vld [vmem:[#allocation71_spill] sm:$0xff] }
 0x109   : > { %v942_v28 = vadd.f32 1.0, %v924_v26  ;;  %v937_v62 = vsub.f32 %v825_v44, %v919_v50  ;;  %v938_v11 = vsub.f32 %v826_v32, %v920_v34  ;;  %v939_v46 = vsub.f32 %v827_v15, %v921_v38 }
 0x10a   : > { %v943_v55 = vadd.f32 1.0, %v925_v49  ;;  %v940_v60 = vsub.f32 %v828_v12, %v922_v59  ;;  %v941_v33 = vsub.f32 %v829_v23, %v923_v52  ;;  %v944_v48 = vadd.f32 1.0, %v926_v39 }
 0x10b   : > { %v945_v35 = vadd.f32 1.0, %v927_v41  ;;  %v946_v22 = vadd.f32 1.0, %v928_v63  ;;  %v947_v30 = vadd.f32 1.0, %v929_v61  ;;  %v948_v20 = vadd.f32 1.0, %v930_v47  ;;  %v8712_v41 = vpop.permute.xlu1 %1069 }
 0x10c   : > { %v949_v6 = vadd.f32 1.0, %v931_v5  ;;  %v950_v31 = vadd.f32 1.0, %v932_v43  ;;  %v951_v10 = vadd.f32 1.0, %v933_v0  ;;  %v952_v24 = vadd.f32 1.0, %v934_v57  ;;  %v11121_v43 = vld [vmem:[#allocation67_spill] sm:$0xff] }
 0x10d   : > { %v960_v3 = vmax.f32 %v942_v28, 0.0  ;;  %v953_v8 = vadd.f32 1.0, %v935_v51  ;;  %v954_v37 = vadd.f32 1.0, %v936_v9  ;;  %v955_v19 = vadd.f32 1.0, %v937_v62 }
 0x10e   : > { %v961_v26 = vmax.f32 %v943_v55, 0.0  ;;  %v8706_v40 = vadd.f32 1.0, %v938_v11  ;;  %v8708_v38 = vadd.f32 1.0, %v939_v46  ;;  %v8710_v59 = vadd.f32 1.0, %v940_v60 }
 0x10f   : > { %v962_v39 = vmax.f32 %v944_v48, 0.0  ;;  %v8714_v44 = vadd.f32 1.0, %v941_v33  ;;  %v963_v47 = vmax.f32 %v945_v35, 0.0  ;;  %v964_v32 = vmax.f32 %v946_v22, 0.0  ;;  %v11124_v33 = vld [vmem:[#allocation68_spill] sm:$0xff] }
 0x110   : > { %v965_v0 = vmax.f32 %v947_v30, 0.0  ;;  %v966_v15 = vmax.f32 %v948_v20, 0.0  ;;  %v967_v28 = vmax.f32 %v949_v6, 0.0  ;;  %v968_v12 = vmax.f32 %v950_v31, 0.0  ;;  %v11128_v31 = vld [vmem:[#allocation69_spill] sm:$0xff] }
 0x111   : > { %v11111_v9 = vmax.f32 %v8532_v29, 0.0  ;;  %v969_v23 = vmax.f32 %v951_v10, 0.0  ;;  %v970_v46 = vmax.f32 %v952_v24, 0.0  ;;  %v971_v14 = vmax.f32 %v953_v8, 0.0 }
 0x112   : > { %v11112_v18 = vmax.f32 %v8534_v1, 0.0  ;;  %v972_v56 = vmax.f32 %v954_v37, 0.0  ;;  %v973_v2 = vmax.f32 %v955_v19, 0.0  ;;  %v11113_v36 = vmax.f32 %v8536_v16, 0.0  ;;  %v11132_v19 = vld [vmem:[#allocation94_spill] sm:$0xff] }
 0x113   : > { %v8718_v55 = vmul.f32 %v960_v3, %v11111_v9  ;;  %v11116_v42 = vrot.slane %v11114_v25, %v11115_v45  ;;  %v974_v50 = vmax.f32 %v8706_v40, 0.0  ;;  %v975_v34 = vmax.f32 %v8708_v38, 0.0  ;;  %v11130_v3 = vld [vmem:[#allocation93_spill] sm:$0xff]  ;;  %v11134_v40 = vld [vmem:[#allocation70_spill] sm:$0xff] }
 0x114   : > { %v8722_v4 = vmul.f32 %v961_v26, %v11112_v18  ;;  %v8726_v21 = vmul.f32 %v962_v39, %v11113_v36  ;;  %v11117_v1 = vmax.f32 %v8538_v7, 0.0  ;;  %v11119_v49 = vrot.slane %v11118_v58, %v11115_v45  ;;  %v11136_v39 = vld [vmem:[#allocation95_spill] sm:$0xff]  ;;  %v11142_v18 = vld [vmem:[#allocation73_spill] sm:$0xff] }
 0x115   : > { %v1072_v29 = vadd.f32 %v8712_v41, %v11116_v42  ;;  %v976_v63 = vmax.f32 %v8710_v59, 0.0  ;;  %v11120_v61 = vmax.f32 %v8540_v53, 0.0  ;;  %v11122_v57 = vrot.slane %v11121_v43, %v11115_v45  ;;  %v2366_v42 = vpop.trf.xlu1  ;;  %v11148_v43 = vld [vmem:[#allocation98_spill] sm:$0xff] }
 0x116   : > { %v8736_v52 = vmul.f32 %v963_v47, %v11117_v1  ;;  %v1073_v16 = vadd.f32 %v8712_v41, %v11119_v49  ;;  %v977_v62 = vmax.f32 %v8714_v44, 0.0  ;;  %v11123_v11 = vmax.f32 %v8542_v13, 0.0  ;;  %v11146_v49 = vld [vmem:[#allocation74_spill] sm:$0xff] }
 0x117   : > { %v8745_v5 = vmul.f32 %v964_v32, %v11120_v61  ;;  %v1074_v51 = vadd.f32 %v8712_v41, %v11122_v57  ;;  %v1090_v7 = vsub.f32 %v1072_v29, %v8718_v55  ;;  %v11125_v48 = vrot.slane %v11124_v33, %v11115_v45  ;;  %v11138_v32 = vld [vmem:[#allocation72_spill] sm:$0xff]  ;;  %v11144_v29 = vld [vmem:[#allocation97_spill] sm:$0xff] }
 0x118   : > { %v8755_v60 = vmul.f32 %v965_v0, %v11123_v11  ;;  %v1091_v35 = vsub.f32 %v1073_v16, %v8722_v4  ;;  %v11126_v22 = vmax.f32 %v8544_v27, 0.0  ;;  %v11127_v20 = vmax.f32 %v8546_v17, 0.0 }
 0x119   : > { %v1075_v53 = vadd.f32 %v8712_v41, %v11125_v48  ;;  %v11129_v13 = vrot.slane %v11128_v31, %v11115_v45  ;;  %v1092_v24 = vsub.f32 %v1074_v51, %v8726_v21  ;;  %v11131_v8 = vmax.f32 %v11130_v3, 0.0  ;;  %v11152_v48 = vld [vmem:[#allocation76_spill] sm:$0xff] }
 0x11a   : > { %v8764_v30 = vmul.f32 %v966_v15, %v11126_v22  ;;  %v8768_v6 = vmul.f32 %v967_v28, %v11127_v20  ;;  %v11133_v26 = vmax.f32 %v11132_v19, 0.0  ;;  %v11135_v17 = vrot.slane %v11134_v40, %v11115_v45  ;;  %v11158_v19 = vld [vmem:[#allocation100_spill] sm:$0xff] }
 0x11b   : > { %v1076_v10 = vadd.f32 %v8712_v41, %v11129_v13  ;;  %v8777_v37 = vmul.f32 %v968_v12, %v11131_v8  ;;  %v1093_v59 = vsub.f32 %v1075_v53, %v8736_v52  ;;  %v11137_v44 = vmax.f32 %v11136_v39, 0.0  ;;  %v11140_v12 = vld [vmem:[#allocation96_spill] sm:$0xff]  ;;  %v11162_v39 = vld [vmem:[#allocation79_spill] sm:$0xff] }
 0x11c   : > { %v8781_v27 = vmul.f32 %v969_v23, %v11133_v26  ;;  %v1077_v38 = vadd.f32 %v8712_v41, %v11135_v17  ;;  %v11139_v0 = vrot.slane %v11138_v32, %v11115_v45  ;;  %7502 = vrcp.f32 %v1090_v7  ;;  %v11150_v7 = vld [vmem:[#allocation75_spill] sm:$0xff]  ;;  %v11160_v17 = vld [vmem:[#allocation78_spill] sm:$0xff] }
 0x11d   : > { %v8790_v47 = vmul.f32 %v970_v46, %v11137_v44  ;;  %v1094_v28 = vsub.f32 %v1076_v10, %v8745_v5  ;;  %v11141_v9 = vmax.f32 %v11140_v12, 0.0  ;;  %v11143_v36 = vrot.slane %v11142_v18, %v11115_v45  ;;  %v11156_v10 = vld [vmem:[#allocation77_spill] sm:$0xff] }
 0x11e   : > { %v1078_v15 = vadd.f32 %v8712_v41, %v11139_v0  ;;  %v1095_v46 = vsub.f32 %v1077_v38, %v8755_v60  ;;  %7504 = vrcp.f32 %v1091_v35  ;;  %v11145_v1 = vmax.f32 %v11144_v29, 0.0 }
 0x11f   : > { %v8799_v23 = vmul.f32 %v971_v14, %v11141_v9  ;;  %v1079_v25 = vadd.f32 %v8712_v41, %v11143_v36  ;;  %v11147_v16 = vrot.slane %v11146_v49, %v11115_v45  ;;  %7506 = vrcp.f32 %v1092_v24  ;;  %v11166_v9 = vld [vmem:[#allocation80_spill] sm:$0xff] }
 0x120   : > { %v8808_v58 = vmul.f32 %v972_v56, %v11145_v1  ;;  %v1096_v14 = vsub.f32 %v1078_v15, %v8764_v30  ;;  %v11149_v57 = vmax.f32 %v11148_v43, 0.0  ;;  %v11151_v11 = vrot.slane %v11150_v7, %v11115_v45  ;;  %v11170_v1 = vld [vmem:[#allocation81_spill] sm:$0xff] }
 0x121   : > { %v1080_v61 = vadd.f32 %v8712_v41, %v11147_v16  ;;  %v1097_v56 = vsub.f32 %v1079_v25, %v8768_v6  ;;  %7508 = vrcp.f32 %v1093_v59  ;;  %v11153_v53 = vrot.slane %v11152_v48, %v11115_v45 }
 0x122   : > { %v8817_v51 = vmul.f32 %v973_v2, %v11149_v57  ;;  %v1081_v33 = vadd.f32 %v8712_v41, %v11151_v11  ;;  %7510 = vrcp.f32 %v1094_v28  ;;  %v2384_v20 = vsel %vm2382_vm4, %v2366_v42, 0  ;;  %v11154_v2 = vld [vmem:[#allocation99_spill] sm:$0xff] }
 0x123   : > { %v1082_v35 = vadd.f32 %v8712_v41, %v11153_v53  ;;  %v1098_v22 = vsub.f32 %v1080_v61, %v8777_v37  ;;  %v11155_v31 = vmax.f32 %v11154_v2, 0.0  ;;  %v11157_v24 = vrot.slane %v11156_v10, %v11115_v45 }
 0x124   : > { %v1099_v8 = vsub.f32 %v1081_v33, %v8781_v27  ;;  %7512 = vrcp.f32 %v1095_v46  ;;  %v11159_v26 = vmax.f32 %v11158_v19, 0.0  ;;  %v11161_v38 = vrot.slane %v11160_v17, %v11115_v45  ;;  %v11168_v46 = vld [vmem:[#allocation102_spill] sm:$0xff] }
 0x125   : > { %v8832_v13 = vmul.f32 %v974_v50, %v11155_v31  ;;  %v1083_v3 = vadd.f32 %v8712_v41, %v11157_v24  ;;  %v1100_v50 = vsub.f32 %v1082_v35, %v8790_v47  ;;  %7514 = vrcp.f32 %v1096_v14  ;;  %v11172_v14 = vld [vmem:[#allocation82_spill] sm:$0xff]  ;;  %v11177_v24 = vld [vmem:[#allocation28_spill] sm:$0xff] }
 0x126   : > { %v8841_v40 = vmul.f32 %v975_v34, %v11159_v26  ;;  %v1084_v59 = vadd.f32 %v8712_v41, %v11161_v38  ;;  %v11163_v44 = vrot.slane %v11162_v39, %v11115_v45  ;;  %7516 = vrcp.f32 %v1097_v56  ;;  %v11164_v34 = vld [vmem:[#allocation101_spill] sm:$0xff]  ;;  %v7503_v61 = vpop.eup %7502  ;;  %v11174_v56 = vld [vmem:[#allocation83_spill] sm:$0xff] }
 0x127   : > { %v1101_v0 = vsub.f32 %v1083_v3, %v8799_v23  ;;  %v8853_v15 = vand.u32 4294901760, %v2384_v20  ;;  %v11165_v28 = vmax.f32 %v11164_v34, 0.0  ;;  %v11167_v18 = vrot.slane %v11166_v9, %v11115_v45  ;;  %v11178_v3 = vld [vmem:[#allocation84_spill] sm:$0xff] }
 0x128   : > { %v1085_v32 = vadd.f32 %v8712_v41, %v11163_v44  ;;  %v1102_v25 = vsub.f32 %v1084_v59, %v8808_v58  ;;  %7518 = vrcp.f32 %v1098_v22  ;;  %v11169_v42 = vmax.f32 %v11168_v46, 0.0  ;;  %v7505_v33 = vpop.eup %7504 }
 0x129   : > { %v8857_v12 = vmul.f32 %v976_v63, %v11165_v28  ;;  %v1086_v36 = vadd.f32 %v8712_v41, %v11167_v18  ;;  %v11171_v49 = vrot.slane %v11170_v1, %v11115_v45  ;;  %7520 = vrcp.f32 %v1099_v8  ;;  %v7507_v2 = vpop.eup %7506  ;;  %v11196_v18 = vld [vmem:[#allocation87_spill] sm:$0xff] }
 0x12a   : > { %v8866_v29 = vmul.f32 %v977_v62, %v11169_v42  ;;  %v1103_v63 = vsub.f32 %v1085_v32, %v8817_v51  ;;  %v11173_v43 = vrot.slane %v11172_v14, %v11115_v45  ;;  %7522 = vrcp.f32 %v1100_v50  ;;  %v11188_v50 = vld [vmem:[#allocation85_spill] sm:$0xff]  ;;  %v11192_v32 = vld [vmem:[#allocation27_spill] sm:$0xff] }
 0x12b   : > { %v1087_v16 = vadd.f32 %v8712_v41, %v11171_v49  ;;  %v1104_v7 = vsub.f32 %v1086_v36, %v8832_v13  ;;  %v7731_v11 = vmov 1966171168   ;;  %v11175_v48 = vrot.slane %v11174_v56, %v11115_v45  ;;  %v11208_v56 = vld [vmem:[#allocation90_spill] sm:$0xff] }
 0x12c   : > { %v1088_v57 = vadd.f32 %v8712_v41, %v11173_v43  ;;  %v1935_v62 = vunpack.c.l.s4 %v7731_v11  ;;  %7524 = vrcp.f32 %v1101_v0  ;;  %v8884_v22 = vsub.f32 %v2384_v20, %v8853_v15 }
 0x12d   : > { %v1089_v53 = vadd.f32 %v8712_v41, %v11175_v48  ;;  %v1105_v35 = vsub.f32 %v1087_v16, %v8841_v40  ;;  %v8888_v10 = vmul.f32 %v7505_v33, %v8722_v4  ;;  %7526 = vrcp.f32 %v1102_v25  ;;  %v7509_v41 = vpop.eup %7508 }
 0x12e   : > { %11176 = vst [vmem:[#allocation35_spill] sm:$0xff] %v8884_v22  ;;  %v1106_v31 = vsub.f32 %v1088_v57, %v8857_v12  ;;  %v11179_v8 = vrot.slane %v11177_v24, %v11178_v3  ;;  %7528 = vrcp.f32 %v1103_v63  ;;  %v11182_v20 = vrot.slane %v11177_v24, %v11072_v54  ;;  %v7511_v59 = vpop.eup %7510  ;;  %v11200_v63 = vld [vmem:[#allocation88_spill] sm:$0xff] }
 0x12f   : > { %v1107_v26 = vsub.f32 %v1089_v53, %v8866_v29  ;;  %v11185_v4 = vrot.slane %v11177_v24, %v11115_v45  ;;  %7530 = vrcp.f32 %v1104_v7  ;;  %v11189_v39 = vrot.slane %v11177_v24, %v11188_v50  ;;  %v7513_v9 = vpop.eup %7512 }
 0x130   : > { %vm8893_vm5 = vcmp.eq.s32.totalorder %v11179_v8, 1  ;;  %vm8901_vm6 = vcmp.eq.s32.totalorder %v11182_v20, 1  ;;  %v11193_v0 = vrot.slane %v11177_v24, %v11192_v32  ;;  %v1147_v28 = vadd.f32 1.0, %v8888_v10  ;;  %v7515_v1 = vpop.eup %7514 }
 0x131   : > { %vm8908_vm7 = vcmp.eq.s32.totalorder %v11185_v4, 1  ;;  %vm8915_vm8 = vcmp.eq.s32.totalorder %v11189_v39, 1  ;;  %7532 = vrcp.f32 %v1105_v35  ;;  %v11197_v36 = vrot.slane %v11177_v24, %v11196_v18  ;;  %v7517_v57 = vpop.eup %7516 }
 0x132   : > { %vm8922_vm9 = vcmp.eq.s32.totalorder %v11193_v0, 1  ;;  %v1936_v46 = vunpack.c.0.s8 %v1935_v62  ;;  %v8935_v42 = vand.u32 4294901760, %v8884_v22  ;;  %v8938_v49 = vmul.f32 %v7503_v61, %v8718_v55  ;;  %v11204_v55 = vld [vmem:[#allocation89_spill] sm:$0xff]  ;;  %v7519_v62 = vpop.eup %7518 }
 0x133   : > { %vm8930_vm10 = vcmp.eq.s32.totalorder %v11197_v36, 1  ;;  %v8941_v16 = vmul.f32 %v7507_v2, %v8726_v21  ;;  %7534 = vrcp.f32 %v1106_v31  ;;  %v11201_v14 = vrot.slane %v11177_v24, %v11200_v63  ;;  %v7521_v2 = vpop.eup %7520  ;;  %v8980_v31 = vpop.permute.xlu0 %1239 }
 0x134   : > { %v8951_v7 = vmul.f32 %v7511_v59, %v8745_v5  ;;  %v8954_v11 = vmul.f32 %v7513_v9, %v8755_v60  ;;  %7536 = vrcp.f32 %v1107_v26  ;;  %v11205_v21 = vrot.slane %v11177_v24, %v11204_v55  ;;  %v7523_v0 = vpop.eup %7522 }
 0x135   : > { %vm8946_vm11 = vcmp.eq.s32.totalorder %v11201_v14, 1  ;;  %v8964_v33 = vmul.f32 %v7515_v1, %v8764_v30  ;;  %v11209_v48 = vrot.slane %v11208_v56, %v11178_v3  ;;  %v11212_v60 = vrot.slane %v11208_v56, %v11072_v54 }
 0x136   : > { %vm8959_vm12 = vcmp.eq.s32.totalorder %v11205_v21, 1  ;;  %v7219_v35 = vadd.s32 3229614080, %v1147_v28  ;;  %v8983_v30 = vmul.f32 %v7509_v41, %v8736_v52  ;;  %v11215_v24 = vrot.slane %v11208_v56, %v11115_v45  ;;  %v11224_v41 = vld [vmem:[#allocation13_spill] sm:$0xff] }
 0x137   : > { %vm8969_vm13 = vcmp.eq.s32.totalorder %v11209_v48, 1  ;;  %vm8976_vm14 = vcmp.eq.s32.totalorder %v11212_v60, 1  ;;  %v11218_v26 = vrot.slane %v11208_v56, %v11188_v50  ;;  %v11221_v4 = vrot.slane %v11208_v56, %v11192_v32 }
 0x138   : > { %vm8988_vm15 = vcmp.eq.s32.totalorder %v11215_v24, 1  ;;  %v9007_v59 = vsub.s32 %v1936_v46, %v11224_v41  ;;  %v2456_v39 = vsub.f32 %v8884_v22, %v8935_v42  ;;  %v9012_v28 = vmul.f32 %v7517_v57, %v8768_v6  ;;  %v7525_v57 = vpop.eup %7524  ;;  %v11235_v24 = vld [vmem:[#allocation91_spill] sm:$0xff] }
 0x139   : > { %vm8995_vm0 = vcmp.eq.s32.totalorder %v11218_v26, 1  ;;  %vm9002_vm4 = vcmp.eq.s32.totalorder %v11221_v4, 1  ;;  %v1148_v9 = vadd.f32 1.0, %v8941_v16  ;;  %v11225_v36 = vrot.slane %v11208_v56, %v11196_v18 }
 0x13a   : > { %v11226_v1 = vmov 0  ;;  %v11228_v46 = vrot.slane %v11208_v56, %v11200_v63  ;;  %v1677_v6 = vsel %vm8893_vm5, %v8938_v49, -1.0  ;;  %v9033_v21 = vmul.f32 %v7519_v62, %v8777_v37 }
 0x13b   : > { %vm9018_vm3 = vcmp.eq.s32.totalorder %v11225_v36, 1  ;;  %v11232_v48 = vrot.slane %v11208_v56, %v11204_v55  ;;  %v11233_v60 = vmov 0  ;;  %v11236_v26 = vrot.slane %v11235_v24, %v11178_v3  ;;  %v7527_v56 = vpop.eup %7526 }
 0x13c   : > { %v11227_v1 = vsel %vm9018_vm3, 4294967295, %v11226_v1  ;;  %vm9025_vm2 = vcmp.eq.s32.totalorder %v11228_v46, 1  ;;  %11231 = vst [vmem:[#allocation36_spill] sm:$0xff] %v9033_v21  ;;  %v1678_v19 = vsel %vm8901_vm6, %v8888_v10, -1.0  ;;  %v1681_v37 = vsel %vm8922_vm9, %v8951_v7, -1.0 }
 0x13d   : > { %vm9038_vm1 = vcmp.eq.s32.totalorder %v11232_v48, 1  ;;  %vm9045_vm3 = vcmp.eq.s32.totalorder %v11236_v26, 1  ;;  %v1682_v62 = vsel %vm8930_vm10, %v8954_v11, -1.0  ;;  %vm1241_vm5 = vcmp.eq.s32.totalorder %v8980_v31, 1  ;;  %v7529_v48 = vpop.eup %7528 }
 0x13e   : > { %v11234_v60 = vsel %vm9038_vm1, 4294967295, %v11233_v60  ;;  %v11239_v36 = vrot.slane %v11235_v24, %v11072_v54  ;;  %v1679_v17 = vsel %vm8908_vm7, %v8941_v16, -1.0  ;;  %v1683_v34 = vsel %vm8946_vm11, %v8964_v33, -1.0  ;;  %v7531_v50 = vpop.eup %7530 }
 0x13f   : > { %v1201_v25 = vshll.u32 %v7219_v35, 3  ;;  %v9073_v26 = vmul.f32 %v7521_v2, %v8781_v27  ;;  %v1680_v24 = vsel %vm8915_vm8, %v8983_v30, -1.0  ;;  %v9079_v63 = vand.u32 4294901760, %v2456_v39  ;;  %v7533_v18 = vpop.eup %7532 }
 0x140   : > { %vm9062_vm1 = vcmp.eq.s32.totalorder %v11239_v36, 1  ;;  %v1146_v36 = vadd.f32 1.0, %v8938_v49  ;;  %v9081_v38 = vadd.s32 3229614080, %v1148_v9  ;;  %v1684_v43 = vsel %vm8959_vm12, %v9012_v28, -1.0  ;;  %v7535_v39 = vpop.eup %7534 }
 0x141   : > { %11242 = vst [vmem:[#allocation37_spill] sm:$0xff] %v9073_v26  ;;  %v1695_v35 = vmax.f32 %v1677_v6, %v1681_v37  ;;  %v1696_v45 = vmax.f32 %v1678_v19, %v1682_v62  ;;  %v9087_v27 = vmul.f32 %v7523_v0, %v8790_v47  ;;  %v1152_v44 = vadd.f32 1.0, %v8964_v33  ;;  %v7537_v47 = vpop.eup %7536 }
 0x142   : > { %v1154_v2 = vadd.f32 1.0, %v9033_v21  ;;  %v1697_v32 = vmax.f32 %v1679_v17, %v1683_v34  ;;  %v9092_v54 = vmul.f32 %v7525_v57, %v8799_v23  ;;  %v9095_v9 = vmul.f32 %v7527_v56, %v8808_v58 }
 0x143   : > { %11243 = vst [vmem:[#allocation38_spill] sm:$0xff] %v9087_v27  ;;  %v1685_v61 = vsel %vm8969_vm13, %v9033_v21, -1.0  ;;  %v1220_v6 = vor.u32 %v11204_v55, %v1201_v25  ;;  %v9102_v0 = vmul.f32 %v7529_v48, %v8817_v51  ;;  %v9105_v19 = vmul.f32 %v7531_v50, %v8832_v13 }
 0x144   : > { %11244 = vst [vmem:[#allocation39_spill] sm:$0xff] %v9092_v54  ;;  %11245 = vst [vmem:[#allocation40_spill] sm:$0xff] %v9095_v9  ;;  %v1686_v23 = vsel %vm8976_vm14, %v9073_v26, -1.0  ;;  %v1698_v57 = vmax.f32 %v1680_v24, %v1684_v43  ;;  %v9111_v58 = vmul.f32 %v7533_v18, %v8841_v40  ;;  %v9114_v5 = vmul.f32 %v7535_v39, %v8857_v12 }
 0x145   : > { %11246 = vst [vmem:[#allocation41_spill] sm:$0xff] %v9102_v0  ;;  %v1699_v37 = vmax.f32 %v1695_v35, %v1685_v61  ;;  %v1700_v62 = vmax.f32 %v1696_v45, %v1686_v23  ;;  %v9117_v56 = vmul.f32 %v7537_v47, %v8866_v29  ;;  %v9120_v51 = vadd.f32 1.0, %v9087_v27 }
 0x146   : > { %11247 = vst [vmem:[#allocation42_spill] sm:$0xff] %v9111_v58  ;;  %v9122_v13 = vadd.s32 3229614080, %v1152_v44  ;;  %v9124_v50 = vadd.s32 3229614080, %v1154_v2  ;;  %v1157_v53 = vadd.f32 1.0, %v9092_v54  ;;  %v1687_v40 = vsel %vm8988_vm15, %v9087_v27, -1.0 }
 0x147   : > { %v1688_v45 = vsel %vm8995_vm0, %v9092_v54, -1.0  ;;  %v1689_v12 = vsel %vm9002_vm4, %v9095_v9, -1.0  ;;  %vm11248_vm6 = vnez %v11227_v1  ;;  %v1691_v18 = vsel %vm9025_vm2, %v9105_v19, -1.0 }
 0x148   : > { %v1690_v29 = vsel %vm11248_vm6, %v9102_v0, -1.0  ;;  %v1701_v17 = vmax.f32 %v1697_v32, %v1687_v40  ;;  %v1702_v34 = vmax.f32 %v1698_v57, %v1688_v45  ;;  %vm11249_vm7 = vnez %v11234_v60 }
 0x149   : > { %v1692_v8 = vsel %vm11249_vm7, %v9111_v58, -1.0  ;;  %v1693_v20 = vsel %vm9045_vm3, %v9114_v5, -1.0  ;;  %v1703_v52 = vmax.f32 %v1699_v37, %v1689_v12  ;;  %v1704_v25 = vmax.f32 %v1700_v62, %v1690_v29 }
 0x14a   : > { %v1694_v1 = vsel %vm9062_vm1, %v9117_v56, -1.0  ;;  %v1705_v48 = vmax.f32 %v1701_v17, %v1691_v18  ;;  %v1706_v24 = vmax.f32 %v1702_v34, %v1692_v8  ;;  %v1243_v32 = vsel %vm1241_vm5, %v1220_v6, 2147483648 }
 0x14b   : > { %v1159_v14 = vadd.f32 1.0, %v9102_v0  ;;  %v1707_v43 = vmax.f32 %v1703_v52, %v1693_v20  ;;  %v1708_v60 = vmax.f32 %v1704_v25, %v1694_v1  ;;  %v1269_v35 = vrot.slane %v1243_v32, 4 }
 0x14c   : > { %v1710_v44 = vmax.f32 %v1705_v48, %v1706_v24  ;;  %v7218_v2 = vadd.s32 3229614080, %v1146_v36  ;;  %v1151_v4 = vadd.f32 1.0, %v8954_v11  ;;  %v1149_v39 = vadd.f32 1.0, %v8983_v30 }
 0x14d   : > { %v1709_v61 = vmax.f32 %v1707_v43, %v1708_v60  ;;  %vm1270_vm2 = vcmp.gt.s32.totalorder %v1243_v32, %v1269_v35  ;;  %v1150_v46 = vadd.f32 1.0, %v8951_v7  ;;  %v1202_v47 = vshll.u32 %v9081_v38, 3 }
 0x14e   : > { %v1271_v23 = vsel %vm1270_vm2, %v1243_v32, %v1269_v35  ;;  %v1200_v57 = vshll.u32 %v7218_v2, 3  ;;  %v7223_v6 = vadd.s32 3229614080, %v1151_v4  ;;  %v7221_v37 = vadd.s32 3229614080, %v1149_v39 }
 0x14f   : > { %v1711_v62 = vmax.f32 %v1709_v61, %v1710_v44  ;;  %v1272_v40 = vrot.slane %v1271_v23, 2  ;;  %v7222_v45 = vadd.s32 3229614080, %v1150_v46  ;;  %v1221_v12 = vor.u32 %v11204_v55, %v1202_v47 }
 0x150   : > { %v9159_v36 = vadd.s32 3229614080, %v1157_v53  ;;  %v1219_v29 = vor.u32 %v11204_v55, %v1200_v57  ;;  %v1205_v18 = vshll.u32 %v7223_v6, 3  ;;  %v1203_v17 = vshll.u32 %v7221_v37, 3 }
 0x151   : > { %v9162_v34 = vadd.s32 3229614080, %v1159_v14  ;;  %1712 = vmax.xlane.f32.xlu0 %v1711_v62  ;;  %vm1273_vm1 = vcmp.gt.s32.totalorder %v1271_v23, %v1272_v40  ;;  %v1204_v38 = vshll.u32 %v7222_v45, 3  ;;  %v1244_v8 = vsel %vm1241_vm5, %v1221_v12, 2147483648 }
 0x152   : > { %v1274_v20 = vsel %vm1273_vm1, %v1271_v23, %v1272_v40  ;;  %v1242_v52 = vsel %vm1241_vm5, %v1219_v29, 2147483648  ;;  %v1224_v25 = vor.u32 %v11204_v55, %v1205_v18  ;;  %v1222_v53 = vor.u32 %v11204_v55, %v1203_v17 }
 0x153   : > { %v1275_v1 = vrot.slane %v1274_v20, 1  ;;  %v1260_v48 = vrot.slane %v1242_v52, 4  ;;  %v1223_v24 = vor.u32 %v11204_v55, %v1204_v38  ;;  %v1278_v32 = vrot.slane %v1244_v8, 4 }
 0x154   : > { %v1247_v14 = vsel %vm1241_vm5, %v1224_v25, 2147483648  ;;  %v1245_v43 = vsel %vm1241_vm5, %v1222_v53, 2147483648  ;;  %v1155_v60 = vadd.f32 1.0, %v9073_v26  ;;  %v9177_v35 = vadd.f32 1.0, %v9012_v28 }
 0x155   : > { %vm1276_vm3 = vcmp.gt.s32.totalorder %v1274_v20, %v1275_v1  ;;  %vm1261_vm8 = vcmp.gt.s32.totalorder %v1242_v52, %v1260_v48  ;;  %v1305_v44 = vrot.slane %v1247_v14, 4  ;;  %v1287_v2 = vrot.slane %v1245_v43, 4 }
 0x156   : > { %v1277_v4 = vsel %vm1276_vm3, %v1274_v20, %v1275_v1  ;;  %v1262_v39 = vsel %vm1261_vm8, %v1242_v52, %v1260_v48  ;;  %v1246_v61 = vsel %vm1241_vm5, %v1223_v24, 2147483648  ;;  %vm9181_vm9 = vcmp.gt.s32.totalorder %v1244_v8, %v1278_v32 }
 0x157   : > { %v1423_v47 = vand.u32 7, %v1277_v4  ;;  %v1459_v23 = vshra.s32 %v1277_v4, 3  ;;  %v1263_v57 = vrot.slane %v1262_v39, 2  ;;  %vm1306_vm10 = vcmp.gt.s32.totalorder %v1247_v14, %v1305_v44 }
 0x158   : > { %v1307_v6 = vsel %vm1306_vm10, %v1247_v14, %v1305_v44  ;;  %vm1288_vm11 = vcmp.gt.s32.totalorder %v1245_v43, %v1287_v2  ;;  %v1296_v37 = vrot.slane %v1246_v61, 4  ;;  %v9185_v62 = vadd.s32 3229614080, %v1155_v60 }
 0x159   : > { %v9187_v40 = vsub.s32 7, %v1423_v47  ;;  %v1477_v45 = vadd.s32 1065353216, %v1459_v23  ;;  %vm1264_vm12 = vcmp.gt.s32.totalorder %v1262_v39, %v1263_v57  ;;  %v1308_v12 = vrot.slane %v1307_v6, 2 }
 0x15a   : > { %v1265_v29 = vsel %vm1264_vm12, %v1262_v39, %v1263_v57  ;;  %v1289_v18 = vsel %vm1288_vm11, %v1245_v43, %v1287_v2  ;;  %vm1297_vm13 = vcmp.gt.s32.totalorder %v1246_v61, %v1296_v37  ;;  %v9191_v17 = vsel %vm9181_vm9, %v1244_v8, %v1278_v32 }
 0x15b   : > { %v7237_v38 = vadd.f32 -1.0, %v1477_v45  ;;  %vm1531_vm14 = vcmp.eq.s32.totalorder %v11224_v41, %v9187_v40  ;;  %v1266_v20 = vrot.slane %v1265_v29, 1  ;;  %vm1309_vm15 = vcmp.gt.s32.totalorder %v1307_v6, %v1308_v12 }
 0x15c   : > { %v11252_v52 = vmov 0.0   ;;  %v10821_v53 = vmov 1.0   ;;  %v1310_v8 = vsel %vm1309_vm15, %v1307_v6, %v1308_v12  ;;  %v1290_v1 = vrot.slane %v1289_v18, 2 }
 0x15d   : > { %v7255_v25 = vsel %vm1531_vm14, 1.0, %v11252_v52  ;;  %7272 = vmatprep.subr.msk.mxu1 %vm1531_vm14, %v10821_v53  ;;  %7274 = vmatprep.subr.msk.mxu0 %vm1531_vm14, %v10821_v53  ;;  %v1298_v48 = vsel %vm1297_vm13, %v1246_v61, %v1296_v37  ;;  %vm1895_vm0 = vcmp.lt.f32.partialorder %v7237_v38, 0.3  ;;  %vm2193_vm4 = vcmp.ge.f32.partialorder %v7237_v38, 0.7 }
 0x15e   : > { %v9207_v24 = vsub.f32 %v7255_v25, %v7255_v25  ;;  %vm1267_vm6 = vcmp.gt.s32.totalorder %v1265_v29, %v1266_v20  ;;  %v11253_v32 = vmov 0   ;;  %v1311_v60 = vrot.slane %v1310_v8, 1 }
 0x15f   : > { %v1913_v14 = vsel %vm1895_vm0, 1, %v11253_v32  ;;  %v1268_v43 = vsel %vm1267_vm6, %v1265_v29, %v1266_v20  ;;  %v1281_v44 = vrot.slane %v9191_v17, 2  ;;  %vm1291_vm7 = vcmp.gt.s32.totalorder %v1289_v18, %v1290_v1 }
 0x160   : > { %v1422_v2 = vand.u32 7, %v1268_v43  ;;  %v1458_v4 = vshra.s32 %v1268_v43, 3  ;;  %v2466_v39 = vand.u32 4294901760, %v9207_v24  ;;  %v2211_v46 = vsel %vm2193_vm4, 1, %v11253_v32 }
 0x161   : > { %vm1312_vm2 = vcmp.gt.s32.totalorder %v1310_v8, %v1311_v60  ;;  %v1292_v61 = vsel %vm1291_vm7, %v1289_v18, %v1290_v1  ;;  %v1299_v47 = vrot.slane %v1298_v48, 2  ;;  %vm1282_vm12 = vcmp.gt.s32.totalorder %v9191_v17, %v1281_v44 }
 0x162   : > { %v9213_v23 = vsub.s32 7, %v1422_v2  ;;  %v1476_v57 = vadd.s32 1065353216, %v1458_v4  ;;  %v2467_v6 = vsub.f32 %v9207_v24, %v2466_v39  ;;  %v1313_v37 = vsel %vm1312_vm2, %v1310_v8, %v1311_v60 }
 0x163   : > { %v1427_v45 = vand.u32 7, %v1313_v37  ;;  %v1463_v12 = vshra.s32 %v1313_v37, 3  ;;  %v1293_v29 = vrot.slane %v1292_v61, 1  ;;  %vm1300_vm1 = vcmp.gt.s32.totalorder %v1298_v48, %v1299_v47 }
 0x164   : > { %v7236_v38 = vadd.f32 -1.0, %v1476_v57  ;;  %vm1530_vm3 = vcmp.eq.s32.totalorder %v11224_v41, %v9213_v23  ;;  %v2468_v20 = vand.u32 4294901760, %v2467_v6  ;;  %v1301_v25 = vsel %vm1300_vm1, %v1298_v48, %v1299_v47 }
 0x165   : > { %v7254_v18 = vsel %vm1530_vm3, 1.0, %v11252_v52  ;;  %7273 = vmatpush1.msk.msra.mxu1 %vm1530_vm3, %v10821_v53  ;;  %7275 = vmatpush1.msk.msra.mxu0 %vm1530_vm3, %v10821_v53  ;;  %v9230_v8 = vsub.s32 7, %v1427_v45  ;;  %v1481_v1 = vadd.s32 1065353216, %v1463_v12  ;;  %vm1294_vm8 = vcmp.gt.s32.totalorder %v1292_v61, %v1293_v29 }
 0x166   : > { %vm1894_vm9 = vcmp.lt.f32.partialorder %v7236_v38, 0.3  ;;  %vm2192_vm10 = vcmp.ge.f32.partialorder %v7236_v38, 0.7  ;;  %v2471_v48 = vsub.f32 %v7254_v18, %v7254_v18  ;;  %2693 = vmatmul.mubr.f32.vlgmr.msra.gmra.mrb[0].mxu0 %v8935_v42  ;;  %2702 = vmatprep.subr.mxu0 %v2466_v39  ;;  %v1295_v43 = vsel %vm1294_vm8, %v1292_v61, %v1293_v29 }
 0x167   : > { %v1912_v60 = vsel %vm1894_vm9, 1, %v11253_v32  ;;  %v2210_v2 = vsel %vm2192_vm10, 1, %v11253_v32  ;;  %2458 = vmatmul.mubr.f32.vlgmr.msra.gmra.mrb[0].mxu1 %v9079_v63  ;;  %2469 = vmatprep.subr.mxu1 %v2468_v20  ;;  %v7241_v4 = vadd.f32 -1.0, %v1481_v1  ;;  %vm1535_vm11 = vcmp.eq.s32.totalorder %v11224_v41, %v9230_v8 }
 0x168   : > { %v1930_v47 = vcombine.low %v1912_v60, %v1913_v14  ;;  %v2228_v57 = vcombine.low %v2210_v2, %v2211_v46  ;;  %v2472_v6 = vand.u32 4294901760, %v2471_v48  ;;  %2769 = vmatprep.mubr.f32.mxu0 %v11252_v52  ;;  %v7259_v39 = vsel %vm1535_vm11, 1.0, %v11252_v52  ;;  %2538 = vmatprep.mubr.f32.mxu1 %v11252_v52 }
 0x169   : > { %v9244_v61 = vsub.f32 %v7259_v39, %v7259_v39  ;;  %v1425_v37 = vand.u32 7, %v1295_v43  ;;  %v7225_v45 = vadd.s32 3229614080, %v9177_v35  ;;  %vm1899_vm13 = vcmp.lt.f32.partialorder %v7241_v4, 0.3 }
 0x16a   : > { %v9249_v14 = vrot.slane %v1930_v47, %v9007_v59  ;;  %2706 = vmatpush1.msra.mxu0 %v2472_v6  ;;  %v2473_v46 = vsub.f32 %v2471_v48, %v2472_v6  ;;  %vm2197_vm15 = vcmp.ge.f32.partialorder %v7241_v4, 0.7  ;;  %v9252_v12 = vrot.slane %v2228_v57, %v9007_v59 }
 0x16b   : > { %7276 = vmatprep.subr.msk.mxu0 %vm1531_vm14, %v10821_v53  ;;  %v9258_v29 = vsub.s32 7, %v1425_v37  ;;  %v1461_v38 = vshra.s32 %v1295_v43, 3  ;;  %v1302_v20 = vrot.slane %v1301_v25, 1  ;;  %v10820_v18 = vand.u32 4294901760, %v9244_v61 }
 0x16c   : > { %v2474_v35 = vand.u32 4294901760, %v2473_v46  ;;  %v1283_v1 = vsel %vm1282_vm12, %v9191_v17, %v1281_v44  ;;  %v1209_v60 = vshll.u32 %v9185_v62, 3  ;;  %v9287_v37 = vsel %vm2197_vm15, 1, %v11253_v32 }
 0x16d   : > { %v1479_v2 = vadd.s32 1065353216, %v1461_v38  ;;  %vm1533_vm0 = vcmp.eq.s32.totalorder %v11224_v41, %v9258_v29  ;;  %vm1303_vm4 = vcmp.gt.s32.totalorder %v1301_v25, %v1302_v20  ;;  %v1284_v47 = vrot.slane %v1283_v1, 1 }
 0x16e   : > { %2475 = vmatpush1.msra.mxu1 %v2474_v35  ;;  %2771 = vmatmul.mubr.f32.vlgmr.msra.gmra.mrb[0].mxu0 %v8853_v15  ;;  %v7257_v40 = vsel %vm1533_vm0, 1.0, %v11252_v52  ;;  %v1304_v43 = vsel %vm1303_vm4, %v1301_v25, %v1302_v20  ;;  %v3397_v17 = vsub.f32 %v9244_v61, %v10820_v18  ;;  %v1228_v62 = vor.u32 %v11204_v55, %v1209_v60 }
 0x16f   : > { %2548 = vmatprep.subr.mxu1 %v9207_v24  ;;  %7277 = vmatpush1.msk.msra.mxu0 %vm1530_vm3, %v10821_v53  ;;  %v7239_v44 = vadd.f32 -1.0, %v1479_v2  ;;  %v9279_v57 = vsub.f32 %v7257_v40, %v7257_v40  ;;  %v1426_v6 = vand.u32 7, %v1304_v43  ;;  %v1462_v39 = vshra.s32 %v1304_v43, 3 }
 0x170   : > { %v9283_v25 = vsel %vm1899_vm13, 1, %v11253_v32  ;;  %7284 = vmatprep.subr.msk.mxu0 %vm1535_vm11, %v10821_v53  ;;  %2540 = vmatmul.mubr.f32.vlgmr.msra.gmra.mrb[0].mxu1 %v8853_v15  ;;  %vm1285_vm14 = vcmp.gt.s32.totalorder %v1283_v1, %v1284_v47  ;;  %v1207_v24 = vshll.u32 %v7225_v45, 3  ;;  %v3398_v38 = vand.u32 4294901760, %v3397_v17 }
 0x171   : > { %2551 = vmatpush1.msra.mxu1 %v2471_v48  ;;  %2843 = vmatprep.mubr.f32.mxu0 %v11252_v52  ;;  %v9295_v23 = vsub.s32 7, %v1426_v6  ;;  %v1480_v46 = vadd.s32 1065353216, %v1462_v39  ;;  %v1251_v4 = vsel %vm1241_vm5, %v1228_v62, 2147483648  ;;  %vm1897_vm6 = vcmp.lt.f32.partialorder %v7239_v44, 0.3 }
 0x172   : > { %vm2195_vm7 = vcmp.ge.f32.partialorder %v7239_v44, 0.7  ;;  %7278 = vmatprep.subr.msk.mxu1 %vm1533_vm0, %v10821_v53  ;;  %2614 = vmatprep.mubr.f32.mxu1 %v11252_v52  ;;  %v1286_v45 = vsel %vm1285_vm14, %v1283_v1, %v1284_v47  ;;  %v10819_v48 = vand.u32 4294901760, %v9279_v57  ;;  %v1341_v43 = vrot.slane %v1251_v4, 4 }
 0x173   : > { %v7240_v20 = vadd.f32 -1.0, %v1480_v46  ;;  %vm1534_vm2 = vcmp.eq.s32.totalorder %v11224_v41, %v9295_v23  ;;  %v1424_v35 = vand.u32 7, %v1286_v45  ;;  %v1460_v60 = vshra.s32 %v1286_v45, 3 }
 0x174   : > { %v7258_v2 = vsel %vm1534_vm2, 1.0, %v11252_v52  ;;  %v2932_v40 = vsub.f32 %v9279_v57, %v10819_v48  ;;  %v1226_v1 = vor.u32 %v11204_v55, %v1207_v24  ;;  %vm1342_vm9 = vcmp.gt.s32.totalorder %v1251_v4, %v1341_v43 }
 0x175   : > { %vm1898_vm1 = vcmp.lt.f32.partialorder %v7240_v20, 0.3  ;;  %vm2196_vm3 = vcmp.ge.f32.partialorder %v7240_v20, 0.7  ;;  %v9315_v47 = vsub.f32 %v7258_v2, %v7258_v2  ;;  %v9317_v17 = vsub.s32 7, %v1424_v35 }
 0x176   : > { %2845 = vmatmul.mubr.f32.vlgmr.msra.gmra.mrb[0].mxu0 %v8853_v15  ;;  %v9321_v62 = vsel %vm1898_vm1, 1, %v11253_v32  ;;  %v9324_v6 = vsel %vm2196_vm3, 1, %v11253_v32  ;;  %v1478_v39 = vadd.s32 1065353216, %v1460_v60  ;;  %v2933_v46 = vand.u32 4294901760, %v2932_v40 }
 0x177   : > { %7285 = vmatpush1.msk.msra.mxu0 %vm1534_vm2, %v10821_v53  ;;  %3382 = vmatprep.mubr.f32.mxu0 %v11252_v52  ;;  %vm1532_vm8 = vcmp.eq.s32.totalorder %v11224_v41, %v9317_v17  ;;  %v10823_v20 = vand.u32 4294901760, %v9315_v47  ;;  %v1249_v2 = vsel %vm1241_vm5, %v1226_v1, 2147483648  ;;  %v1915_v40 = vsel %vm1897_vm6, 1, %v11253_v32 }
 0x178   : > { %3399 = vmatprep.subr.mxu0 %v3398_v38  ;;  %2617 = vmatmul.mubr.f32.vlgmr.msra.gmra.mrb[0].mxu1 %v8884_v22  ;;  %v7238_v35 = vadd.f32 -1.0, %v1478_v39  ;;  %v7256_v60 = vsel %vm1532_vm8, 1.0, %v11252_v52  ;;  %v2213_v24 = vsel %vm2195_vm7, 1, %v11253_v32  ;;  %v1343_v1 = vsel %vm1342_vm9, %v1251_v4, %v1341_v43 }
 0x179   : > { %7279 = vmatpush1.msk.msra.mxu1 %vm1532_vm8, %v10821_v53  ;;  %v9353_v38 = vsub.f32 %v7256_v60, %v7256_v60  ;;  %v3403_v39 = vsub.f32 %v9315_v47, %v10823_v20  ;;  %v1323_v45 = vrot.slane %v1249_v2, 4  ;;  %2917 = vmatprep.mubr.f32.mxu1 %v11252_v52 }
 0x17a   : > { %vm1896_vm10 = vcmp.lt.f32.partialorder %v7238_v35, 0.3  ;;  %vm2194_vm12 = vcmp.ge.f32.partialorder %v7238_v35, 0.7  ;;  %3388 = vmatmul.mubr.f32.vlgmr.msra.gmra.mrb[2].mxu0 %v9079_v63  ;;  %2934 = vmatprep.subr.mxu1 %v2933_v46  ;;  %v1344_v35 = vrot.slane %v1343_v1, 2  ;;  %v1208_v46 = vshll.u32 %v9124_v50, 3 }
 0x17b   : > { %v1914_v44 = vsel %vm1896_vm10, 1, %v11253_v32  ;;  %v2212_v48 = vsel %vm2194_vm12, 1, %v11253_v32  ;;  %v3404_v18 = vand.u32 4294901760, %v3403_v39  ;;  %v10825_v60 = vand.u32 4294901760, %v9353_v38  ;;  %3468 = vmatprep.mubr.f32.mxu0 %v11252_v52 }
 0x17c   : > { %v1931_v53 = vcombine.low %v1914_v44, %v1915_v40  ;;  %v2229_v20 = vcombine.low %v2212_v48, %v2213_v24  ;;  %2923 = vmatmul.mubr.f32.vlgmr.msra.gmra.mrb[2].mxu1 %v9079_v63  ;;  %vm1324_vm13 = vcmp.gt.s32.totalorder %v1249_v2, %v1323_v45  ;;  %v1206_v39 = vshll.u32 %v9122_v13, 3 }
 0x17d   : > { %3405 = vmatpush1.msra.mxu0 %v3404_v18  ;;  %v2938_v4 = vsub.f32 %v9353_v38, %v10825_v60  ;;  %3003 = vmatprep.mubr.f32.mxu1 %v11252_v52  ;;  %v1325_v43 = vsel %vm1324_vm13, %v1249_v2, %v1323_v45  ;;  %vm1345_vm15 = vcmp.gt.s32.totalorder %v1343_v1, %v1344_v35  ;;  %v1211_v13 = vshll.u32 %v9159_v36, 3 }
 0x17e   : > { %v9372_v3 = vrot.slane %v1931_v53, %v9007_v59  ;;  %v9375_v48 = vrot.slane %v2229_v20, %v9007_v59  ;;  %3478 = vmatprep.subr.mxu0 %v9244_v61  ;;  %v1326_v18 = vrot.slane %v1325_v43, 2  ;;  %v1346_v40 = vsel %vm1345_vm15, %v1343_v1, %v1344_v35 }
 0x17f   : > { %v2939_v24 = vand.u32 4294901760, %v2938_v4  ;;  %v1227_v44 = vor.u32 %v11204_v55, %v1208_v46  ;;  %v1225_v45 = vor.u32 %v11204_v55, %v1206_v39  ;;  %v1347_v53 = vrot.slane %v1346_v40, 1 }
 0x180   : > { %vm1327_vm4 = vcmp.gt.s32.totalorder %v1325_v43, %v1326_v18  ;;  %v1213_v35 = vshll.u32 %v9162_v34, 3  ;;  %v1158_v4 = vadd.f32 1.0, %v9095_v9  ;;  %v9391_v46 = vadd.s32 3229614080, %v9120_v51 }
 0x181   : > { %2940 = vmatpush1.msra.mxu1 %v2939_v24  ;;  %v1328_v20 = vsel %vm1327_vm4, %v1325_v43, %v1326_v18  ;;  %v1250_v2 = vsel %vm1241_vm5, %v1227_v44, 2147483648  ;;  %v1248_v1 = vsel %vm1241_vm5, %v1225_v45, 2147483648  ;;  %vm1348_vm14 = vcmp.gt.s32.totalorder %v1346_v40, %v1347_v53 }
 0x182   : > { %3013 = vmatprep.subr.mxu1 %v9279_v57  ;;  %3470 = vmatmul.mubr.f32.vlgmr.msra.gmra.mrb[2].mxu0 %v8853_v15  ;;  %v1329_v39 = vrot.slane %v1328_v20, 1  ;;  %v1349_v43 = vsel %vm1348_vm14, %v1346_v40, %v1347_v53  ;;  %v1332_v18 = vrot.slane %v1250_v2, 4  ;;  %v1314_v24 = vrot.slane %v1248_v1, 4 }
 0x183   : > { %3481 = vmatpush1.msra.mxu0 %v9315_v47  ;;  %3544 = vmatprep.mubr.f32.mxu0 %v11252_v52  ;;  %v1232_v34 = vor.u32 %v11204_v55, %v1213_v35  ;;  %v11254_v44 = vmov 1.0   ;;  %v1431_v51 = vand.u32 7, %v1349_v43  ;;  %v1467_v45 = vshra.s32 %v1349_v43, 3 }
 0x184   : > { %7286 = vmatprep.subr.msk.mxu0 %vm1535_vm11, %v11254_v44  ;;  %3005 = vmatmul.mubr.f32.vlgmr.msra.gmra.mrb[2].mxu1 %v8853_v15  ;;  %vm1330_vm6 = vcmp.gt.s32.totalorder %v1328_v20, %v1329_v39  ;;  %vm1333_vm7 = vcmp.gt.s32.totalorder %v1250_v2, %v1332_v18  ;;  %vm1315_vm1 = vcmp.gt.s32.totalorder %v1248_v1, %v1314_v24  ;;  %v9414_v60 = vadd.s32 3229614080, %v1158_v4 }
 0x185   : > { %3016 = vmatpush1.msra.mxu1 %v9353_v38  ;;  %3079 = vmatprep.mubr.f32.mxu1 %v11252_v52  ;;  %v1331_v40 = vsel %vm1330_vm6, %v1328_v20, %v1329_v39  ;;  %v1255_v53 = vsel %vm1241_vm5, %v1232_v34, 2147483648  ;;  %v9412_v35 = vsub.s32 7, %v1431_v51  ;;  %v1485_v43 = vadd.s32 1065353216, %v1467_v45 }
 0x186   : > { %7280 = vmatprep.subr.msk.mxu1 %vm1533_vm0, %v11254_v44  ;;  %v1429_v50 = vand.u32 7, %v1331_v40  ;;  %v1465_v36 = vshra.s32 %v1331_v40, 3  ;;  %v1334_v0 = vsel %vm1333_vm7, %v1250_v2, %v1332_v18  ;;  %v1316_v9 = vsel %vm1315_vm1, %v1248_v1, %v1314_v24 }
 0x187   : > { %v1377_v20 = vrot.slane %v1255_v53, 4  ;;  %v1161_v39 = vadd.f32 1.0, %v9111_v58  ;;  %v7245_v54 = vadd.f32 -1.0, %v1485_v43  ;;  %vm1539_vm3 = vcmp.eq.s32.totalorder %v11224_v41, %v9412_v35 }
 0x188   : > { %v1483_v34 = vadd.s32 1065353216, %v1465_v36  ;;  %v1335_v27 = vrot.slane %v1334_v0, 2  ;;  %v1230_v26 = vor.u32 %v11204_v55, %v1211_v13  ;;  %v7263_v4 = vsel %vm1539_vm3, 1.0, %v11252_v52 }
 0x189   : > { %vm1903_vm9 = vcmp.lt.f32.partialorder %v7245_v54, 0.3  ;;  %v9425_v2 = vsub.s32 7, %v1429_v50  ;;  %v1317_v1 = vrot.slane %v1316_v9, 2  ;;  %vm9433_vm12 = vcmp.gt.s32.totalorder %v1255_v53, %v1377_v20 }
 0x18a   : > { %3547 = vmatmul.mubr.f32.vlgmr.msra.gmra.mrb[2].mxu0 %v8884_v22  ;;  %v7243_v13 = vadd.f32 -1.0, %v1483_v34  ;;  %vm1336_vm10 = vcmp.gt.s32.totalorder %v1334_v0, %v1335_v27  ;;  %v9438_v51 = vadd.f32 1.0, %v9117_v56  ;;  %v9440_v50 = vadd.s32 3229614080, %v1161_v39 }
 0x18b   : > { %7287 = vmatpush1.msk.msra.mxu0 %vm1534_vm2, %v11254_v44  ;;  %3619 = vmatprep.mubr.f32.mxu0 %v11252_v52  ;;  %v11257_v40 = vand.u32 4294901760, %v9244_v61  ;;  %v1337_v43 = vsel %vm1336_vm10, %v1334_v0, %v1335_v27  ;;  %v9453_v36 = vsel %vm1903_vm9, 1, %v11253_v32  ;;  %vm2201_vm13 = vcmp.ge.f32.partialorder %v7245_v54, 0.7 }
 0x18c   : > { %3082 = vmatmul.mubr.f32.vlgmr.msra.gmra.mrb[2].mxu1 %v8884_v22  ;;  %v9455_v39 = vsub.f32 %v7263_v4, %v7263_v4  ;;  %v1338_v34 = vrot.slane %v1337_v43, 1  ;;  %v11258_v61 = vand.u32 4294901760, %v9279_v57  ;;  %vm1537_vm15 = vcmp.eq.s32.totalorder %v11224_v41, %v9425_v2 }
 0x18d   : > { %3632 = vmatprep.subr.mxu0 %v11257_v40  ;;  %7281 = vmatpush1.msk.msra.mxu1 %vm1532_vm8, %v11254_v44  ;;  %vm1318_vm4 = vcmp.gt.s32.totalorder %v1316_v9, %v1317_v1  ;;  %v1379_v27 = vsel %vm9433_vm12, %v1255_v53, %v1377_v20  ;;  %v1253_v0 = vsel %vm1241_vm5, %v1230_v26, 2147483648  ;;  %vm1901_vm14 = vcmp.lt.f32.partialorder %v7243_v13, 0.3 }
 0x18e   : > { %3154 = vmatprep.mubr.f32.mxu1 %v11252_v52  ;;  %3167 = vmatprep.subr.mxu1 %v11258_v61  ;;  %vm1339_vm6 = vcmp.gt.s32.totalorder %v1337_v43, %v1338_v34  ;;  %v1319_v40 = vsel %vm1318_vm4, %v1316_v9, %v1317_v1  ;;  %v1380_v54 = vrot.slane %v1379_v27, 2  ;;  %v9466_v4 = vsel %vm2201_vm13, 1, %v11253_v32 }
 0x18f   : > { %v1340_v18 = vsel %vm1339_vm6, %v1337_v43, %v1338_v34  ;;  %v1320_v57 = vrot.slane %v1319_v40, 1  ;;  %v1359_v61 = vrot.slane %v1253_v0, 4  ;;  %vm2199_vm7 = vcmp.ge.f32.partialorder %v7243_v13, 0.7 }
 0x190   : > { %v1430_v45 = vand.u32 7, %v1340_v18  ;;  %v1466_v58 = vshra.s32 %v1340_v18, 3  ;;  %vm1381_vm1 = vcmp.gt.s32.totalorder %v1379_v27, %v1380_v54  ;;  %v7261_v26 = vsel %vm1537_vm15, 1.0, %v11252_v52 }
 0x191   : > { %v9474_v9 = vsel %vm1901_vm14, 1, %v11253_v32  ;;  %vm1321_vm9 = vcmp.gt.s32.totalorder %v1319_v40, %v1320_v57  ;;  %vm1360_vm10 = vcmp.gt.s32.totalorder %v1253_v0, %v1359_v61  ;;  %v11259_v53 = vand.u32 4294901760, %v9315_v47 }
 0x192   : > { %3623 = vmatmul.mubr.f32.vlgmr.msra.gmra.mrb[2].mxu0 %v8935_v42  ;;  %v9479_v20 = vsub.s32 7, %v1430_v45  ;;  %v1484_v1 = vadd.s32 1065353216, %v1466_v58  ;;  %v1322_v18 = vsel %vm1321_vm9, %v1319_v40, %v1320_v57  ;;  %v1382_v24 = vsel %vm1381_vm1, %v1379_v27, %v1380_v54 }
 0x193   : > { %3636 = vmatpush1.msra.mxu0 %v11259_v53  ;;  %3699 = vmatprep.mubr.f32.mxu0 %v11252_v52  ;;  %v2217_v43 = vsel %vm2199_vm7, 1, %v11253_v32  ;;  %v1428_v34 = vand.u32 7, %v1322_v18  ;;  %v1464_v47 = vshra.s32 %v1322_v18, 3  ;;  %v1361_v53 = vsel %vm1360_vm10, %v1253_v0, %v1359_v61 }
 0x194   : > { %7288 = vmatprep.subr.msk.mxu0 %vm1535_vm11, %v11254_v44  ;;  %3158 = vmatmul.mubr.f32.vlgmr.msra.gmra.mrb[2].mxu1 %v8935_v42  ;;  %v11260_v21 = vand.u32 4294901760, %v9353_v38  ;;  %v9491_v58 = vsub.f32 %v7261_v26, %v7261_v26  ;;  %v7244_v45 = vadd.f32 -1.0, %v1484_v1  ;;  %vm1538_vm12 = vcmp.eq.s32.totalorder %v11224_v41, %v9479_v20 }
 0x195   : > { %3234 = vmatprep.mubr.f32.mxu1 %v11252_v52  ;;  %v10839_v8 = vand.u32 4294901760, %v9455_v39  ;;  %v9504_v38 = vsub.s32 7, %v1428_v34  ;;  %v1482_v13 = vadd.s32 1065353216, %v1464_v47  ;;  %v1383_v27 = vrot.slane %v1382_v24, 1 }
 0x196   : > { %3171 = vmatpush1.msra.mxu1 %v11260_v21  ;;  %v7262_v21 = vsel %vm1538_vm12, 1.0, %v11252_v52  ;;  %vm1902_vm11 = vcmp.lt.f32.partialorder %v7244_v45, 0.3  ;;  %vm2200_vm13 = vcmp.ge.f32.partialorder %v7244_v45, 0.7  ;;  %v1362_v40 = vrot.slane %v1361_v53, 2 }
 0x197   : > { %7282 = vmatprep.subr.msk.mxu1 %vm1533_vm0, %v11254_v44  ;;  %v9506_v0 = vsub.f32 %v7262_v21, %v7262_v21  ;;  %v9509_v54 = vsel %vm1902_vm11, 1, %v11253_v32  ;;  %v9512_v29 = vsel %vm2200_vm13, 1, %v11253_v32  ;;  %v7242_v57 = vadd.f32 -1.0, %v1482_v13 }
 0x198   : > { %vm1536_vm0 = vcmp.eq.s32.totalorder %v11224_v41, %v9504_v38  ;;  %v1979_v61 = vcombine.low %v9509_v54, %v9453_v36  ;;  %v11261_v18 = vshll.u32 %v9414_v60, 3  ;;  %v11262_v47 = vcombine.low %v9321_v62, %v9283_v25 }
 0x199   : > { %v7260_v1 = vsel %vm1536_vm0, 1.0, %v11252_v52  ;;  %v11263_v21 = vcombine.low %v9324_v6, %v9287_v37  ;;  %vm1900_vm4 = vcmp.lt.f32.partialorder %v7242_v57, 0.3  ;;  %vm2198_vm14 = vcmp.ge.f32.partialorder %v7242_v57, 0.7 }
 0x19a   : > { %v1231_v34 = vor.u32 %v11204_v55, %v11261_v18  ;;  %v1954_v45 = vrot.slane %v11262_v47, %v9007_v59  ;;  %3701 = vmatmul.mubr.f32.vlgmr.msra.gmra.mrb[2].mxu0 %v8853_v15  ;;  %v1918_v60 = vsel %vm1900_vm4, 1, %v11253_v32  ;;  %v2216_v25 = vsel %vm2198_vm14, 1, %v11253_v32 }
 0x19b   : > { %v2252_v13 = vrot.slane %v11263_v21, %v9007_v59  ;;  %7289 = vmatpush1.msk.msra.mxu0 %vm1534_vm2, %v11254_v44  ;;  %3773 = vmatprep.mubr.f32.mxu0 %v11252_v52  ;;  %v9543_v62 = vsub.f32 %v7260_v1, %v7260_v1  ;;  %vm9545_vm6 = vcmp.gt.s32.totalorder %v1382_v24, %v1383_v27  ;;  %v10841_v57 = vand.u32 4294901760, %v9506_v0 }
 0x19c   : > { %7296 = vmatprep.subr.msk.mxu0 %vm1539_vm3, %v11254_v44  ;;  %3236 = vmatmul.mubr.f32.vlgmr.msra.gmra.mrb[2].mxu1 %v8853_v15  ;;  %v1933_v23 = vcombine.low %v1918_v60, %v9474_v9  ;;  %v2231_v6 = vcombine.low %v2216_v25, %v2217_v43  ;;  %v3861_v18 = vand.u32 4294901760, %v9491_v58  ;;  %v7235_v1 = vadd.s32 3229614080, %v9438_v51 }
 0x19d   : > { %7283 = vmatpush1.msk.msra.mxu1 %vm1532_vm8, %v11254_v44  ;;  %v4327_v47 = vsub.f32 %v9455_v39, %v10839_v8  ;;  %3308 = vmatprep.mubr.f32.mxu1 %v11252_v52  ;;  %vm1363_vm2 = vcmp.gt.s32.totalorder %v1361_v53, %v1362_v40  ;;  %v1254_v9 = vsel %vm1241_vm5, %v1231_v34, 2147483648  ;;  %v11266_v43 = vcombine.low %v9249_v14, %v9372_v3 }
 0x19e   : > { %7290 = vmatprep.subr.msk.mxu1 %vm1537_vm15, %v11254_v44  ;;  %v1961_v17 = vrot.slane %v1933_v23, %v9007_v59  ;;  %v2259_v21 = vrot.slane %v2231_v6, %v9007_v59  ;;  %v9582_v60 = vsel %vm9545_vm6, %v1382_v24, %v1383_v27  ;;  %v11267_v34 = vcombine.low %v9252_v12, %v9375_v48 }
 0x19f   : > { %v9572_v51 = vrot.slane %v11266_v43, %v9007_v59  ;;  %v10840_v14 = vand.u32 4294901760, %v9543_v62  ;;  %v1364_v25 = vsel %vm1363_vm2, %v1361_v53, %v1362_v40  ;;  %v1368_v43 = vrot.slane %v1254_v9, 4 }
 0x1a0   : > { %v9588_v3 = vrot.slane %v11267_v34, %v9007_v59  ;;  %v1963_v26 = vcombine.low %v1954_v45, %v1961_v17  ;;  %v2261_v8 = vcombine.low %v2252_v13, %v2259_v21  ;;  %v4333_v23 = vsub.f32 %v9506_v0, %v10841_v57 }
 0x1a1   : > { %v3862_v24 = vsub.f32 %v9491_v58, %v3861_v18  ;;  %v4328_v27 = vand.u32 4294901760, %v4327_v47  ;;  %v1471_v37 = vshra.s32 %v9582_v60, 3  ;;  %v1365_v12 = vrot.slane %v1364_v25, 1 }
 0x1a2   : > { %vm1369_vm8 = vcmp.gt.s32.totalorder %v1254_v9, %v1368_v43  ;;  %3775 = vmatmul.mubr.f32.vlgmr.msra.gmra.mrb[2].mxu0 %v8853_v15  ;;  %v9600_v48 = vrot.slane %v1963_v26, %v9007_v59  ;;  %v9603_v53 = vrot.slane %v2261_v8, %v9007_v59  ;;  %v11268_v45 = vshll.u32 %v9391_v46, 3 }
 0x1a3   : > { %v1370_v40 = vsel %vm1369_vm8, %v1254_v9, %v1368_v43  ;;  %v1217_v6 = vshll.u32 %v7235_v1, 3  ;;  %7297 = vmatpush1.msk.msra.mxu0 %vm1538_vm12, %v11254_v44  ;;  %4312 = vmatprep.mubr.f32.mxu0 %v11252_v52  ;;  %v3868_v26 = vsub.f32 %v9543_v62, %v10840_v14  ;;  %vm1366_vm7 = vcmp.gt.s32.totalorder %v1364_v25, %v1365_v12 }
 0x1a4   : > { %v1229_v13 = vor.u32 %v11204_v55, %v11268_v45  ;;  %v1371_v8 = vrot.slane %v1370_v40, 2  ;;  %4329 = vmatprep.subr.mxu0 %v4328_v27  ;;  %3310 = vmatmul.mubr.f32.vlgmr.msra.gmra.mrb[2].mxu1 %v8853_v15  ;;  %v4334_v47 = vand.u32 4294901760, %v4333_v23  ;;  %v3863_v9 = vand.u32 4294901760, %v3862_v24 }
 0x1a5   : > { %7291 = vmatpush1.msk.msra.mxu1 %vm1536_vm0, %v11254_v44  ;;  %3847 = vmatprep.mubr.f32.mxu1 %v11252_v52  ;;  %v1489_v17 = vadd.s32 1065353216, %v1471_v37  ;;  %v9626_v21 = vsel %vm1366_vm7, %v1364_v25, %v1365_v12  ;;  %v1215_v43 = vshll.u32 %v9440_v50, 3  ;;  %v3869_v24 = vand.u32 4294901760, %v3868_v26 }
 0x1a6   : > { %vm1372_vm1 = vcmp.gt.s32.totalorder %v1370_v40, %v1371_v8  ;;  %v1252_v34 = vsel %vm1241_vm5, %v1229_v13, 2147483648  ;;  %4318 = vmatmul.mubr.f32.vlgmr.msra.gmra.mrb[4].mxu0 %v9079_v63  ;;  %3864 = vmatprep.subr.mxu1 %v3863_v9  ;;  %v1469_v23 = vshra.s32 %v9626_v21, 3  ;;  %v1236_v25 = vor.u32 %v11204_v55, %v1217_v6 }
 0x1a7   : > { %4335 = vmatpush1.msra.mxu0 %v4334_v47  ;;  %4398 = vmatprep.mubr.f32.mxu0 %v11252_v52  ;;  %v1373_v27 = vsel %vm1372_vm1, %v1370_v40, %v1371_v8  ;;  %v1350_v45 = vrot.slane %v1252_v34, 4  ;;  %v1162_v37 = vadd.f32 1.0, %v9114_v5  ;;  %v7249_v12 = vadd.f32 -1.0, %v1489_v17 }
 0x1a8   : > { %4408 = vmatprep.subr.mxu0 %v9455_v39  ;;  %3853 = vmatmul.mubr.f32.vlgmr.msra.gmra.mrb[4].mxu1 %v9079_v63  ;;  %v1374_v50 = vrot.slane %v1373_v27, 1  ;;  %v1259_v13 = vsel %vm1241_vm5, %v1236_v25, 2147483648  ;;  %v1487_v40 = vadd.s32 1065353216, %v1469_v23  ;;  %v1234_v9 = vor.u32 %v11204_v55, %v1215_v43 }
 0x1a9   : > { %3870 = vmatpush1.msra.mxu1 %v3869_v24  ;;  %3933 = vmatprep.mubr.f32.mxu1 %v11252_v52  ;;  %vm1351_vm9 = vcmp.gt.s32.totalorder %v1252_v34, %v1350_v45  ;;  %v1413_v47 = vrot.slane %v1259_v13, 4  ;;  %v7234_v1 = vadd.s32 3229614080, %v1162_v37  ;;  %vm1907_vm11 = vcmp.lt.f32.partialorder %v7249_v12, 0.3 }
 0x1aa   : > { %3943 = vmatprep.subr.mxu1 %v9491_v58  ;;  %vm1375_vm10 = vcmp.gt.s32.totalorder %v1373_v27, %v1374_v50  ;;  %v1352_v6 = vsel %vm1351_vm9, %v1252_v34, %v1350_v45  ;;  %vm2205_vm4 = vcmp.ge.f32.partialorder %v7249_v12, 0.7  ;;  %v7247_v17 = vadd.f32 -1.0, %v1487_v40 }
 0x1ab   : > { %v9642_v26 = vsel %vm1375_vm10, %v1373_v27, %v1374_v50  ;;  %v1353_v8 = vrot.slane %v1352_v6, 2  ;;  %vm1414_vm14 = vcmp.gt.s32.totalorder %v1259_v13, %v1413_v47  ;;  %v1257_v43 = vsel %vm1241_vm5, %v1234_v9, 2147483648 }
 0x1ac   : > { %v1470_v24 = vshra.s32 %v9642_v26, 3  ;;  %v1415_v27 = vsel %vm1414_vm14, %v1259_v13, %v1413_v47  ;;  %v1160_v45 = vadd.f32 1.0, %v9105_v19  ;;  %v1216_v37 = vshll.u32 %v7234_v1, 3 }
 0x1ad   : > { %vm1354_vm13 = vcmp.gt.s32.totalorder %v1352_v6, %v1353_v8  ;;  %v1435_v50 = vand.u32 7, %v9582_v60  ;;  %v1416_v40 = vrot.slane %v1415_v27, 2  ;;  %v9662_v13 = vsel %vm1907_vm11, 1, %v11253_v32 }
 0x1ae   : > { %4400 = vmatmul.mubr.f32.vlgmr.msra.gmra.mrb[4].mxu0 %v8853_v15  ;;  %v1355_v25 = vsel %vm1354_vm13, %v1352_v6, %v1353_v8  ;;  %v1488_v34 = vadd.s32 1065353216, %v1470_v24  ;;  %v9666_v1 = vsel %vm2205_vm4, 1, %v11253_v32  ;;  %vm1905_vm2 = vcmp.lt.f32.partialorder %v7247_v17, 0.3 }
 0x1af   : > { %4411 = vmatpush1.msra.mxu0 %v9506_v0  ;;  %4474 = vmatprep.mubr.f32.mxu0 %v11252_v52  ;;  %v1356_v23 = vrot.slane %v1355_v25, 1  ;;  %vm1417_vm8 = vcmp.gt.s32.totalorder %v1415_v27, %v1416_v40  ;;  %v1395_v8 = vrot.slane %v1257_v43, 4  ;;  %v1433_v47 = vand.u32 7, %v9626_v21 }
 0x1b0   : > { %7298 = vmatprep.subr.msk.mxu0 %vm1539_vm3, %v11254_v44  ;;  %3935 = vmatmul.mubr.f32.vlgmr.msra.gmra.mrb[4].mxu1 %v8853_v15  ;;  %v7248_v6 = vadd.f32 -1.0, %v1488_v34  ;;  %vm2203_vm9 = vcmp.ge.f32.partialorder %v7247_v17, 0.7  ;;  %v1418_v34 = vsel %vm1417_vm8, %v1415_v27, %v1416_v40  ;;  %v1235_v21 = vor.u32 %v11204_v55, %v1216_v37 }
 0x1b1   : > { %3946 = vmatpush1.msra.mxu1 %v9543_v62  ;;  %4009 = vmatprep.mubr.f32.mxu1 %v11252_v52  ;;  %vm1357_vm6 = vcmp.gt.s32.totalorder %v1355_v25, %v1356_v23  ;;  %v9684_v14 = vadd.s32 3229614080, %v1160_v45  ;;  %v1434_v57 = vand.u32 7, %v9642_v26  ;;  %vm1396_vm10 = vcmp.gt.s32.totalorder %v1257_v43, %v1395_v8 }
 0x1b2   : > { %7292 = vmatprep.subr.msk.mxu1 %vm1537_vm15, %v11254_v44  ;;  %v1358_v60 = vsel %vm1357_vm6, %v1355_v25, %v1356_v23  ;;  %vm1906_vm7 = vcmp.lt.f32.partialorder %v7248_v6, 0.3  ;;  %vm2204_vm1 = vcmp.ge.f32.partialorder %v7248_v6, 0.7  ;;  %v9687_v6 = vsub.s32 7, %v1435_v50 }
 0x1b3   : > { %v1468_v9 = vshra.s32 %v1358_v60, 3  ;;  %v9674_v12 = vsel %vm1906_vm7, 1, %v11253_v32  ;;  %v9677_v24 = vsel %vm2204_vm1, 1, %v11253_v32  ;;  %v9694_v27 = vrot.slane %v1979_v61, %v9007_v59 }
 0x1b4   : > { %v9701_v45 = vsub.s32 7, %v1433_v47  ;;  %v1419_v50 = vrot.slane %v1418_v34, 1  ;;  %v11269_v26 = vand.u32 4294901760, %v9455_v39  ;;  %v1923_v36 = vsel %vm1905_vm2, 1, %v11253_v32 }
 0x1b5   : > { %v1486_v23 = vadd.s32 1065353216, %v1468_v9  ;;  %v2221_v54 = vsel %vm2203_vm9, 1, %v11253_v32  ;;  %v1432_v61 = vand.u32 7, %v1358_v60  ;;  %v1397_v40 = vsel %vm1396_vm10, %v1257_v43, %v1395_v8 }
 0x1b6   : > { %4477 = vmatmul.mubr.f32.vlgmr.msra.gmra.mrb[4].mxu0 %v8884_v22  ;;  %v11270_v47 = vcombine.low %v9512_v29, %v9466_v4  ;;  %v1258_v39 = vsel %vm1241_vm5, %v1235_v21, 2147483648  ;;  %vm1543_vm4 = vcmp.eq.s32.totalorder %v11224_v41, %v9687_v6  ;;  %v9727_v4 = vsub.s32 7, %v1434_v57 }
 0x1b7   : > { %7299 = vmatpush1.msk.msra.mxu0 %vm1538_vm12, %v11254_v44  ;;  %4549 = vmatprep.mubr.f32.mxu0 %v11252_v52  ;;  %v7246_v37 = vadd.f32 -1.0, %v1486_v23  ;;  %vm1420_vm14 = vcmp.gt.s32.totalorder %v1418_v34, %v1419_v50  ;;  %v1398_v8 = vrot.slane %v1397_v40, 2  ;;  %vm1541_vm6 = vcmp.eq.s32.totalorder %v11224_v41, %v9701_v45 }
 0x1b8   : > { %4562 = vmatprep.subr.mxu0 %v11269_v26  ;;  %4012 = vmatmul.mubr.f32.vlgmr.msra.gmra.mrb[4].mxu1 %v8884_v22  ;;  %v9714_v9 = vrot.slane %v11270_v47, %v9007_v59  ;;  %v9733_v23 = vsub.s32 7, %v1432_v61  ;;  %v1404_v58 = vrot.slane %v1258_v39, 4  ;;  %v7267_v57 = vsel %vm1543_vm4, 1.0, %v11252_v52 }
 0x1b9   : > { %7293 = vmatpush1.msk.msra.mxu1 %vm1536_vm0, %v11254_v44  ;;  %4084 = vmatprep.mubr.f32.mxu1 %v11252_v52  ;;  %vm1904_vm11 = vcmp.lt.f32.partialorder %v7246_v37, 0.3  ;;  %vm2202_vm13 = vcmp.ge.f32.partialorder %v7246_v37, 0.7  ;;  %vm1399_vm2 = vcmp.gt.s32.totalorder %v1397_v40, %v1398_v8  ;;  %v1214_v37 = vshll.u32 %v9684_v14, 3 }
 0x1ba   : > { %4097 = vmatprep.subr.mxu1 %v3861_v18  ;;  %v1922_v29 = vsel %vm1904_vm11, 1, %v11253_v32  ;;  %v2220_v17 = vsel %vm2202_vm13, 1, %v11253_v32  ;;  %vm1542_vm8 = vcmp.eq.s32.totalorder %v11224_v41, %v9727_v4  ;;  %v1421_v26 = vsel %vm1420_vm14, %v1418_v34, %v1419_v50 }
 0x1bb   : > { %v1980_v43 = vcombine.low %v1922_v29, %v1923_v36  ;;  %v2278_v60 = vcombine.low %v2220_v17, %v2221_v54  ;;  %v1400_v36 = vsel %vm1399_vm2, %v1397_v40, %v1398_v8  ;;  %v11271_v54 = vand.u32 4294901760, %v9506_v0 }
 0x1bc   : > { %v7265_v61 = vsel %vm1541_vm6, 1.0, %v11252_v52  ;;  %vm1405_vm7 = vcmp.gt.s32.totalorder %v1258_v39, %v1404_v58  ;;  %v9765_v0 = vsub.f32 %v7267_v57, %v7267_v57  ;;  %vm1540_vm1 = vcmp.eq.s32.totalorder %v11224_v41, %v9733_v23 }
 0x1bd   : > { %v9740_v18 = vrot.slane %v1980_v43, %v9007_v59  ;;  %v9743_v21 = vrot.slane %v2278_v60, %v9007_v59  ;;  %v1401_v34 = vrot.slane %v1400_v36, 1  ;;  %v11272_v50 = vand.u32 4294901760, %v9543_v62 }
 0x1be   : > { %4553 = vmatmul.mubr.f32.vlgmr.msra.gmra.mrb[4].mxu0 %v8935_v42  ;;  %v7266_v40 = vsel %vm1542_vm8, 1.0, %v11252_v52  ;;  %v1475_v35 = vshra.s32 %v1421_v26, 3  ;;  %v9780_v29 = vsub.f32 %v7265_v61, %v7265_v61  ;;  %v1406_v17 = vsel %vm1405_vm7, %v1258_v39, %v1404_v58 }
 0x1bf   : > { %4566 = vmatpush1.msra.mxu0 %v11271_v54  ;;  %4629 = vmatprep.mubr.f32.mxu0 %v11252_v52  ;;  %v1233_v62 = vor.u32 %v11204_v55, %v1214_v37  ;;  %v7264_v43 = vsel %vm1540_vm1, 1.0, %v11252_v52  ;;  %v1439_v60 = vand.u32 7, %v1421_v26  ;;  %v1407_v57 = vrot.slane %v1406_v17, 2  ;;  %v11296_v55 = vld [vmem:[#allocation37_spill] sm:$0xff] }
 0x1c0   : > { %7300 = vmatprep.subr.msk.mxu0 %vm1539_vm3, %v11254_v44  ;;  %4088 = vmatmul.mubr.f32.vlgmr.msra.gmra.mrb[4].mxu1 %v8935_v42  ;;  %vm1402_vm3 = vcmp.gt.s32.totalorder %v1400_v36, %v1401_v34  ;;  %v9787_v54 = vsub.f32 %v7266_v40, %v7266_v40  ;;  %v1493_v61 = vadd.s32 1065353216, %v1475_v35  ;;  %v9793_v58 = vsub.f32 %v7264_v43, %v7264_v43 }
 0x1c1   : > { %4101 = vmatpush1.msra.mxu1 %v11272_v50  ;;  %4164 = vmatprep.mubr.f32.mxu1 %v11252_v52  ;;  %v1403_v8 = vsel %vm1402_vm3, %v1400_v36, %v1401_v34  ;;  %v10842_v50 = vand.u32 4294901760, %v9765_v0  ;;  %v1256_v2 = vsel %vm1241_vm5, %v1233_v62, 2147483648  ;;  %v10843_v37 = vand.u32 4294901760, %v9780_v29 }
 0x1c2   : > { %7294 = vmatprep.subr.msk.mxu1 %vm1537_vm15, %v11254_v44  ;;  %vm1408_vm15 = vcmp.gt.s32.totalorder %v1406_v17, %v1407_v57  ;;  %v1386_v39 = vrot.slane %v1256_v2, 4  ;;  %v1437_v47 = vand.u32 7, %v1403_v8  ;;  %v9801_v36 = vsub.s32 7, %v1439_v60 }
 0x1c3   : > { %v1409_v26 = vsel %vm1408_vm15, %v1406_v17, %v1407_v57  ;;  %v1473_v34 = vshra.s32 %v1403_v8, 3  ;;  %v5257_v35 = vsub.f32 %v9765_v0, %v10842_v50  ;;  %v10845_v20 = vand.u32 4294901760, %v9787_v54 }
 0x1c4   : > { %v1410_v40 = vrot.slane %v1409_v26, 1  ;;  %vm1387_vm9 = vcmp.gt.s32.totalorder %v1256_v2, %v1386_v39  ;;  %v9817_v62 = vadd.f32 -1.0, %v1493_v61  ;;  %v4792_v60 = vsub.f32 %v9780_v29, %v10843_v37 }
 0x1c5   : > { %v1388_v17 = vsel %vm1387_vm9, %v1256_v2, %v1386_v39  ;;  %v10844_v8 = vand.u32 4294901760, %v9793_v58  ;;  %v9827_v57 = vsub.s32 7, %v1437_v47  ;;  %v1491_v2 = vadd.s32 1065353216, %v1473_v34 }
 0x1c6   : > { %4631 = vmatmul.mubr.f32.vlgmr.msra.gmra.mrb[4].mxu0 %v8853_v15  ;;  %v1389_v43 = vrot.slane %v1388_v17, 2  ;;  %v5258_v50 = vand.u32 4294901760, %v5257_v35  ;;  %v5263_v14 = vsub.f32 %v9787_v54, %v10845_v20  ;;  %vm1911_vm11 = vcmp.lt.f32.partialorder %v9817_v62, 0.3 }
 0x1c7   : > { %7301 = vmatpush1.msk.msra.mxu0 %vm1538_vm12, %v11254_v44  ;;  %4703 = vmatprep.mubr.f32.mxu0 %v11252_v52  ;;  %vm1411_vm12 = vcmp.gt.s32.totalorder %v1409_v26, %v1410_v40  ;;  %vm10854_vm13 = vcmp.eq.s32.totalorder %v11224_v41, %v9827_v57  ;;  %v4798_v35 = vsub.f32 %v9793_v58, %v10844_v8  ;;  %vm2209_vm2 = vcmp.ge.f32.partialorder %v9817_v62, 0.7 }
 0x1c8   : > { %7308 = vmatprep.subr.msk.mxu0 %vm1543_vm4, %v11254_v44  ;;  %4166 = vmatmul.mubr.f32.vlgmr.msra.gmra.mrb[4].mxu1 %v8853_v15  ;;  %v1412_v38 = vsel %vm1411_vm12, %v1409_v26, %v1410_v40  ;;  %vm1390_vm10 = vcmp.gt.s32.totalorder %v1388_v17, %v1389_v43  ;;  %v4793_v26 = vand.u32 4294901760, %v4792_v60  ;;  %v5264_v60 = vand.u32 4294901760, %v5263_v14 }
 0x1c9   : > { %7295 = vmatpush1.msk.msra.mxu1 %vm1536_vm0, %v11254_v44  ;;  %4238 = vmatprep.mubr.f32.mxu1 %v11252_v52  ;;  %vm1547_vm0 = vcmp.eq.s32.totalorder %v11224_v41, %v9801_v36  ;;  %v1438_v61 = vand.u32 7, %v1412_v38  ;;  %v1474_v39 = vshra.s32 %v1412_v38, 3  ;;  %v1391_v47 = vsel %vm1390_vm10, %v1388_v17, %v1389_v43 }
 0x1ca   : > { %7302 = vmatprep.subr.msk.mxu1 %vm1541_vm6, %v11254_v44  ;;  %v7271_v34 = vsel %vm1547_vm0, 1.0, %v11252_v52  ;;  %v1392_v40 = vrot.slane %v1391_v47, 1  ;;  %v7251_v17 = vadd.f32 -1.0, %v1491_v2  ;;  %v1929_v38 = vsel %vm1911_vm11, 1, %v11253_v32 }
 0x1cb   : > { %v9835_v37 = vsub.s32 7, %v1438_v61  ;;  %v1492_v25 = vadd.s32 1065353216, %v1474_v39  ;;  %v7269_v14 = vsel %vm10854_vm13, 1.0, %v11252_v52  ;;  %v4799_v8 = vand.u32 4294901760, %v4798_v35 }
 0x1cc   : > { %vm1393_vm7 = vcmp.gt.s32.totalorder %v1391_v47, %v1392_v40  ;;  %vm1909_vm15 = vcmp.lt.f32.partialorder %v7251_v17, 0.3  ;;  %vm2207_vm12 = vcmp.ge.f32.partialorder %v7251_v17, 0.7 }
 0x1cd   : > { %v7252_v43 = vadd.f32 -1.0, %v1492_v25  ;;  %vm10851_vm14 = vcmp.eq.s32.totalorder %v11224_v41, %v9835_v37  ;;  %v9864_v25 = vsub.f32 %v7271_v34, %v7271_v34  ;;  %v2225_v62 = vsel %vm2207_vm12, 1, %v11253_v32 }
 0x1ce   : > { %4705 = vmatmul.mubr.f32.vlgmr.msra.gmra.mrb[4].mxu0 %v8853_v15  ;;  %v7270_v2 = vsel %vm10851_vm14, 1.0, %v11252_v52 }
 0x1cf   : > { %7309 = vmatpush1.msk.msra.mxu0 %vm1542_vm8, %v11254_v44  ;;  %5242 = vmatprep.mubr.f32.mxu0 %v11252_v52  ;;  %vm1910_vm3 = vcmp.lt.f32.partialorder %v7252_v43, 0.3  ;;  %vm2208_vm9 = vcmp.ge.f32.partialorder %v7252_v43, 0.7  ;;  %v2227_v43 = vsel %vm2209_vm2, 1, %v11253_v32 }
 0x1d0   : > { %5259 = vmatprep.subr.mxu0 %v5258_v50  ;;  %4240 = vmatmul.mubr.f32.vlgmr.msra.gmra.mrb[4].mxu1 %v8853_v15  ;;  %v1394_v50 = vsel %vm1393_vm7, %v1391_v47, %v1392_v40  ;;  %v1928_v61 = vsel %vm1910_vm3, 1, %v11253_v32  ;;  %v9879_v47 = vsub.f32 %v7269_v14, %v7269_v14  ;;  %v2226_v14 = vsel %vm2208_vm9, 1, %v11253_v32 }
 0x1d1   : > { %7303 = vmatpush1.msk.msra.mxu1 %vm1540_vm1, %v11254_v44  ;;  %4777 = vmatprep.mubr.f32.mxu1 %v11252_v52  ;;  %v1436_v39 = vand.u32 7, %v1394_v50  ;;  %v1472_v34 = vshra.s32 %v1394_v50, 3  ;;  %v2028_v20 = vcombine.low %v1928_v61, %v1929_v38  ;;  %v11273_v50 = vcombine.low %v9572_v51, %v9600_v48 }
 0x1d2   : > { %5248 = vmatmul.mubr.f32.vlgmr.msra.gmra.mrb[6].mxu0 %v9079_v63  ;;  %4794 = vmatprep.subr.mxu1 %v4793_v26  ;;  %v9895_v38 = vsub.f32 %v7270_v2, %v7270_v2  ;;  %v10847_v51 = vand.u32 4294901760, %v9864_v25 }
 0x1d3   : > { %5265 = vmatpush1.msra.mxu0 %v5264_v60  ;;  %5328 = vmatprep.mubr.f32.mxu0 %v11252_v52  ;;  %v9881_v26 = vsub.s32 7, %v1436_v39  ;;  %v1490_v40 = vadd.s32 1065353216, %v1472_v34  ;;  %vm9886_vm10 = vcmp.ne.s32.totalorder %v11273_v50, 0  ;;  %v2035_v60 = vrot.slane %v2028_v20, %v9007_v59 }
 0x1d4   : > { %5338 = vmatprep.subr.mxu0 %v9765_v0  ;;  %4783 = vmatmul.mubr.f32.vlgmr.msra.gmra.mrb[6].mxu1 %v9079_v63  ;;  %v10846_v39 = vand.u32 4294901760, %v9879_v47  ;;  %v2326_v34 = vcombine.low %v2226_v14, %v2227_v43  ;;  %v10853_v17 = vand.u32 4294901760, %v9895_v38  ;;  %v9931_v14 = vsub.f32 %v9864_v25, %v10847_v51 }
 0x1d5   : > { %4800 = vmatpush1.msra.mxu1 %v4799_v8  ;;  %4863 = vmatprep.mubr.f32.mxu1 %v11252_v52  ;;  %v7250_v48 = vadd.f32 -1.0, %v1490_v40  ;;  %vm10850_vm11 = vcmp.eq.s32.totalorder %v11224_v41, %v9881_v26  ;;  %v1927_v8 = vsel %vm1909_vm15, 1, %v11253_v32  ;;  %v2042_v20 = vrot.slane %v2035_v60, %v9007_v59  ;;  %v11276_v60 = vld [vmem:[#allocation22_spill] sm:$0xff] }
 0x1d6   : > { %4873 = vmatprep.subr.mxu1 %v9780_v29  ;;  %v7268_v2 = vsel %vm10850_vm11, 1.0, %v11252_v52  ;;  %vm11277_vm3 = vnez %v11276_v60  ;;  %v11281_v51 = vcombine.low %v9677_v24, %v9666_v1  ;;  %v11287_v1 = vcombine.low %v9694_v27, %v9740_v18  ;;  %v11371_v60 = vld [vmem:[#allocation86_spill] sm:$0xff] }
 0x1d7   : > { %vm1908_vm2 = vcmp.lt.f32.partialorder %v7250_v48, 0.3  ;;  %vm2206_vm7 = vcmp.ge.f32.partialorder %v7250_v48, 0.7  ;;  %v9911_v61 = vsub.f32 %v7268_v2, %v7268_v2  ;;  %vm2046_vm15 = vmand %vm11277_vm3, %vm9886_vm10  ;;  %vm9924_vm9 = vcmp.ne.s32.totalorder %v2042_v20, 0 }
 0x1d8   : > { %v1926_v40 = vsel %vm1908_vm2, 1, %v11253_v32  ;;  %v2224_v50 = vsel %vm2206_vm7, 1, %v11253_v32  ;;  %v9950_v2 = vrot.slane %v2326_v34, %v9007_v59  ;;  %v11283_v34 = vld [vmem:[#allocation33_spill] sm:$0xff]  ;;  %v9987_v24 = vrot.slane %v11287_v1, %v9007_v59 }
 0x1d9   : > { %v1982_v46 = vcombine.low %v1926_v40, %v1927_v8  ;;  %v2280_v48 = vcombine.low %v2224_v50, %v2225_v62  ;;  %v10852_v35 = vand.u32 4294901760, %v9911_v61  ;;  %v9942_v8 = vsub.f32 %v9879_v47, %v10846_v39 }
 0x1da   : > { %5330 = vmatmul.mubr.f32.vlgmr.msra.gmra.mrb[6].mxu0 %v8853_v15  ;;  %v10848_v62 = vmov -1.0   ;;  %v9955_v40 = vsub.f32 %v9895_v38, %v10853_v17  ;;  %v11280_v50 = vcombine.low %v9674_v12, %v9662_v13  ;;  %vm11284_vm12 = vcmp.gt.f32.partialorder %v11283_v34, 0.5  ;;  %11288 = vst [vmem:[#allocation11_spill] sm:$0xff] %v9987_v24 }
 0x1db   : > { %5341 = vmatpush1.msra.mxu0 %v9787_v54  ;;  %5404 = vmatprep.mubr.f32.mxu0 %v11252_v52  ;;  %v9945_v20 = vsel %vm2046_vm15, 0.0, %v10848_v62  ;;  %v9967_v62 = vrot.slane %v11281_v51, %v9007_v59  ;;  %vm2048_vm10 = vmand %vm11284_vm12, %vm9924_vm9  ;;  %v9978_v13 = vrot.slane %v1982_v46, %v9007_v59  ;;  %v9981_v12 = vrot.slane %v2280_v48, %v9007_v59 }
 0x1dc   : > { %7310 = vmatprep.subr.msk.mxu0 %vm1543_vm4, %v11254_v44  ;;  %4865 = vmatmul.mubr.f32.vlgmr.msra.gmra.mrb[6].mxu1 %v8853_v15  ;;  %v9961_v39 = vrot.slane %v11280_v50, %v9007_v59  ;;  %v11289_v51 = vcombine.low %v9714_v9, %v9743_v21  ;;  %v10001_v48 = vsub.f32 %v9911_v61, %v10852_v35  ;;  %v11291_v9 = vmov -1.0  }
 0x1dd   : > { %4876 = vmatpush1.msra.mxu1 %v9793_v58  ;;  %4939 = vmatprep.mubr.f32.mxu1 %v11252_v52  ;;  %11282 = vst [vmem:[#allocation43_spill] sm:$0xff] %v9967_v62  ;;  %11285 = vst [vmem:[#allocation44_spill] sm:$0xff] %v9978_v13  ;;  %v10015_v18 = vsel %vm2048_vm10, 0.0, %v11291_v9 }
 0x1de   : > { %7304 = vmatprep.subr.msk.mxu1 %vm1541_vm6, %v11254_v44  ;;  %11286 = vst [vmem:[#allocation45_spill] sm:$0xff] %v9981_v12  ;;  %v9993_v43 = vrot.slane %v11289_v51, %v9007_v59  ;;  %v9995_v50 = vpop.xlane.xlu0 %1712  ;;  %11292 = vst [vmem:[#allocation12_spill] sm:$0xff] %v10015_v18  ;;  %v11297_v12 = vld [vmem:[#allocation38_spill] sm:$0xff] }
 0x1df   : > { %vm1714_vm2 = vcmp.eq.f32.partialorder %v8938_v49, %v9995_v50  ;;  %vm1715_vm7 = vcmp.eq.f32.partialorder %v8888_v10, %v9995_v50  ;;  %vm1716_vm15 = vcmp.eq.f32.partialorder %v8941_v16, %v9995_v50  ;;  %vm1717_vm9 = vcmp.eq.f32.partialorder %v8983_v30, %v9995_v50 }
 0x1e0   : > { %11290 = vst [vmem:[#allocation46_spill] sm:$0xff] %v9993_v43  ;;  %vm1732_vm12 = vmand %vm1714_vm2, %vm1241_vm5  ;;  %vm1718_vm11 = vcmp.eq.f32.partialorder %v8951_v7, %v9995_v50  ;;  %vm1719_vm10 = vcmp.eq.f32.partialorder %v8954_v11, %v9995_v50  ;;  %v11293_v49 = vand.u32 4294901760, %v9765_v0 }
 0x1e1   : > { %vm1733_vm14 = vmand %vm1715_vm7, %vm1241_vm5  ;;  %v1750_v10 = vsel %vm1732_vm12, 1.0, %v11252_v52  ;;  %vm1720_vm7 = vcmp.eq.f32.partialorder %v8964_v33, %v9995_v50  ;;  %vm1721_vm12 = vcmp.eq.f32.partialorder %v9012_v28, %v9995_v50 }
 0x1e2   : > { %5407 = vmatmul.mubr.f32.vlgmr.msra.gmra.mrb[6].mxu0 %v8884_v22  ;;  %vm1734_vm2 = vmand %vm1716_vm15, %vm1241_vm5  ;;  %v1751_v35 = vsel %vm1733_vm14, 1.0, %v11252_v52  ;;  %v1768_v17 = vrot.slane %v1750_v10, 4  ;;  %vm1730_vm15 = vcmp.eq.f32.partialorder %v9114_v5, %v9995_v50 }
 0x1e3   : > { %7311 = vmatpush1.msk.msra.mxu0 %vm1542_vm8, %v11254_v44  ;;  %5479 = vmatprep.mubr.f32.mxu0 %v11252_v52  ;;  %vm1735_vm13 = vmand %vm1717_vm9, %vm1241_vm5  ;;  %v1752_v16 = vsel %vm1734_vm2, 1.0, %v11252_v52  ;;  %v1774_v1 = vrot.slane %v1751_v35, 4 }
 0x1e4   : > { %5492 = vmatprep.subr.mxu0 %v11293_v49  ;;  %4942 = vmatmul.mubr.f32.vlgmr.msra.gmra.mrb[6].mxu1 %v8884_v22  ;;  %vm1736_vm14 = vmand %vm1718_vm11, %vm1241_vm5  ;;  %v1753_v51 = vsel %vm1735_vm13, 1.0, %v11252_v52  ;;  %v1769_v21 = vmax.f32 %v1750_v10, %v1768_v17  ;;  %v1780_v27 = vrot.slane %v1752_v16, 4  ;;  %v11294_v17 = vand.u32 4294901760, %v9780_v29 }
 0x1e5   : > { %7305 = vmatpush1.msk.msra.mxu1 %vm1540_vm1, %v11254_v44  ;;  %5014 = vmatprep.mubr.f32.mxu1 %v11252_v52  ;;  %vm1737_vm11 = vmand %vm1719_vm10, %vm1241_vm5  ;;  %v1754_v7 = vsel %vm1736_vm14, 1.0, %v11252_v52  ;;  %v1775_v30 = vmax.f32 %v1751_v35, %v1774_v1  ;;  %v1786_v0 = vrot.slane %v1753_v51, 4  ;;  %vm1731_vm13 = vcmp.eq.f32.partialorder %v9117_v56, %v9995_v50  ;;  %v11295_v35 = vld [vmem:[#allocation36_spill] sm:$0xff] }
 0x1e6   : > { %5027 = vmatprep.subr.mxu1 %v11294_v17  ;;  %vm1738_vm9 = vmand %vm1720_vm7, %vm1241_vm5  ;;  %v1755_v49 = vsel %vm1737_vm11, 1.0, %v11252_v52  ;;  %v1770_v11 = vrot.slane %v1769_v21, 2  ;;  %v1781_v10 = vmax.f32 %v1752_v16, %v1780_v27  ;;  %v1792_v46 = vrot.slane %v1754_v7, 4 }
 0x1e7   : > { %vm1722_vm10 = vcmp.eq.f32.partialorder %v11295_v35, %v9995_v50  ;;  %vm1739_vm2 = vmand %vm1721_vm12, %vm1241_vm5  ;;  %v1756_v29 = vsel %vm1738_vm9, 1.0, %v11252_v52  ;;  %v1776_v1 = vrot.slane %v1775_v30, 2  ;;  %v1787_v17 = vmax.f32 %v1753_v51, %v1786_v0  ;;  %v11298_v51 = vld [vmem:[#allocation39_spill] sm:$0xff] }
 0x1e8   : > { %v1798_v33 = vrot.slane %v1755_v49, 4  ;;  %vm1723_vm7 = vcmp.eq.f32.partialorder %v11296_v55, %v9995_v50  ;;  %v1757_v27 = vsel %vm1739_vm2, 1.0, %v11252_v52  ;;  %v1771_v16 = vmax.f32 %v1769_v21, %v1770_v11  ;;  %vm10128_vm2 = vmand %vm1730_vm15, %vm1241_vm5 }
 0x1e9   : > { %v1782_v9 = vrot.slane %v1781_v10, 2  ;;  %v1793_v43 = vmax.f32 %v1754_v7, %v1792_v46  ;;  %vm1724_vm14 = vcmp.eq.f32.partialorder %v11297_v12, %v9995_v50  ;;  %v1777_v62 = vmax.f32 %v1775_v30, %v1776_v1  ;;  %v11300_v46 = vld [vmem:[#allocation40_spill] sm:$0xff]  ;;  %vm10138_vm11 = vmand %vm1731_vm13, %vm1241_vm5 }
 0x1ea   : > { %v1788_v22 = vrot.slane %v1787_v17, 2  ;;  %v1799_v28 = vmax.f32 %v1755_v49, %v1798_v33  ;;  %v1804_v24 = vrot.slane %v1756_v29, 4  ;;  %5483 = vmatmul.mubr.f32.vlgmr.msra.gmra.mrb[6].mxu0 %v8935_v42  ;;  %vm1725_vm12 = vcmp.eq.f32.partialorder %v11298_v51, %v9995_v50 }
 0x1eb   : > { %v1772_v0 = vrot.slane %v1771_v16, 1  ;;  %v1783_v18 = vmax.f32 %v1781_v10, %v1782_v9  ;;  %v1794_v34 = vrot.slane %v1793_v43, 2  ;;  %v1810_v13 = vrot.slane %v1757_v27, 4  ;;  %5559 = vmatprep.mubr.f32.mxu0 %v11252_v52  ;;  %v11301_v9 = vld [vmem:[#allocation41_spill] sm:$0xff] }
 0x1ec   : > { %v11299_v21 = vand.u32 4294901760, %v9787_v54  ;;  %v1778_v7 = vrot.slane %v1777_v62, 1  ;;  %v1789_v30 = vmax.f32 %v1787_v17, %v1788_v22  ;;  %v1800_v49 = vrot.slane %v1799_v28, 2  ;;  %5018 = vmatmul.mubr.f32.vlgmr.msra.gmra.mrb[6].mxu1 %v8935_v42 }
 0x1ed   : > { %v1805_v11 = vmax.f32 %v1756_v29, %v1804_v24  ;;  %v1773_v54 = vmax.f32 %v1771_v16, %v1772_v0  ;;  %v1784_v10 = vrot.slane %v1783_v18, 1  ;;  %v1795_v1 = vmax.f32 %v1793_v43, %v1794_v34  ;;  %5094 = vmatprep.mubr.f32.mxu1 %v11252_v52 }
 0x1ee   : > { %5496 = vmatpush1.msra.mxu0 %v11299_v21  ;;  %v1811_v33 = vmax.f32 %v1757_v27, %v1810_v13  ;;  %v11302_v21 = vand.u32 4294901760, %v9793_v58  ;;  %v1779_v22 = vmax.f32 %v1777_v62, %v1778_v7  ;;  %v1790_v6 = vrot.slane %v1789_v30, 1 }
 0x1ef   : > { %7312 = vmatprep.subr.msk.mxu0 %vm1543_vm4, %v11254_v44  ;;  %v1801_v24 = vmax.f32 %v1799_v28, %v1800_v49  ;;  %v1806_v29 = vrot.slane %v1805_v11, 2  ;;  %v1785_v17 = vmax.f32 %v1783_v18, %v1784_v10  ;;  %v1796_v34 = vrot.slane %v1795_v1, 1 }
 0x1f0   : > { %5031 = vmatpush1.msra.mxu1 %v11302_v21  ;;  %v1812_v13 = vrot.slane %v1811_v33, 2  ;;  %vm1876_vm4 = vcmp.gt.f32.partialorder %v1773_v54, 0.5  ;;  %v1791_v58 = vmax.f32 %v1789_v30, %v1790_v6  ;;  %vm1877_vm9 = vcmp.gt.f32.partialorder %v1779_v22, 0.5 }
 0x1f1   : > { %7306 = vmatprep.subr.msk.mxu1 %vm1541_vm6, %v11254_v44  ;;  %v1802_v43 = vrot.slane %v1801_v24, 1  ;;  %v1807_v27 = vmax.f32 %v1805_v11, %v1806_v29  ;;  %v1797_v16 = vmax.f32 %v1795_v1, %v1796_v34  ;;  %vm1878_vm6 = vcmp.gt.f32.partialorder %v1785_v17, 0.5 }
 0x1f2   : > { %v1813_v45 = vmax.f32 %v1811_v33, %v1812_v13  ;;  %v2052_v18 = vsel %vm1876_vm4, 1, %v11253_v32  ;;  %vm1879_vm15 = vcmp.gt.f32.partialorder %v1791_v58, 0.5  ;;  %v2053_v7 = vsel %vm1877_vm9, 1, %v11253_v32  ;;  %5561 = vmatmul.mubr.f32.vlgmr.msra.gmra.mrb[6].mxu0 %v8853_v15  ;;  %vm10149_vm4 = vmand %vm1722_vm10, %vm1241_vm5 }
 0x1f3   : > { %v1803_v0 = vmax.f32 %v1801_v24, %v1802_v43  ;;  %v1808_v5 = vrot.slane %v1807_v27, 1  ;;  %vm1880_vm13 = vcmp.gt.f32.partialorder %v1797_v16, 0.5  ;;  %v2054_v49 = vsel %vm1878_vm6, 1, %v11253_v32  ;;  %7313 = vmatpush1.msk.msra.mxu0 %vm1542_vm8, %v11254_v44  ;;  %5633 = vmatprep.mubr.f32.mxu0 %v11252_v52  ;;  %vm10165_vm10 = vmand %vm1723_vm7, %vm1241_vm5 }
 0x1f4   : > { %v1814_v56 = vrot.slane %v1813_v45, 1  ;;  %v2055_v11 = vsel %vm1879_vm15, 1, %v11253_v32  ;;  %v2056_v10 = vsel %vm1880_vm13, 1, %v11253_v32  ;;  %v2070_v1 = vcombine.low %v2052_v18, %v2053_v7  ;;  %7320 = vmatprep.subr.msk.mxu0 %vm1547_vm0, %v11254_v44  ;;  %5096 = vmatmul.mubr.f32.vlgmr.msra.gmra.mrb[6].mxu1 %v8853_v15  ;;  %vm10180_vm8 = vmand %vm1724_vm14, %vm1241_vm5 }
 0x1f5   : > { %v1809_v54 = vmax.f32 %v1807_v27, %v1808_v5  ;;  %vm1881_vm9 = vcmp.gt.f32.partialorder %v1803_v0, 0.5  ;;  %v2071_v21 = vcombine.low %v2054_v49, %v2055_v11  ;;  %7307 = vmatpush1.msk.msra.mxu1 %vm1540_vm1, %v11254_v44  ;;  %v1766_v22 = vsel %vm10128_vm2, 1.0, %v11252_v52  ;;  %5168 = vmatprep.mubr.f32.mxu1 %v11252_v52  ;;  %vm10198_vm7 = vmand %vm1725_vm12, %vm1241_vm5  ;;  %v11322_v27 = vld [vmem:[#allocation42_spill] sm:$0xff] }
 0x1f6   : > { %v1815_v4 = vmax.f32 %v1813_v45, %v1814_v56  ;;  %v2057_v33 = vsel %vm1881_vm9, 1, %v11253_v32  ;;  %v2080_v23 = vrot.slane %v2070_v1, %v9007_v59  ;;  %vm11315_vm1 = vcmp.eq.s32.totalorder %v11224_v41, %v9827_v57 }
 0x1f7   : > { %vm1882_vm14 = vcmp.gt.f32.partialorder %v1809_v54, 0.5  ;;  %v2072_v6 = vcombine.low %v2056_v10, %v2057_v33  ;;  %7314 = vmatprep.subr.msk.mxu1 %vm11315_vm1, %v11254_v44  ;;  %v1767_v24 = vsel %vm10138_vm11, 1.0, %v11252_v52  ;;  %vm11316_vm12 = vcmp.eq.f32.partialorder %v11300_v46, %v9995_v50 }
 0x1f8   : > { %vm10215_vm2 = vmand %vm11316_vm12, %vm1241_vm5  ;;  %vm1883_vm6 = vcmp.gt.f32.partialorder %v1815_v4, 0.5  ;;  %v2058_v29 = vsel %vm1882_vm14, 1, %v11253_v32  ;;  %v2087_v17 = vrot.slane %v2071_v21, %v9007_v59  ;;  %v1864_v34 = vrot.slane %v1766_v22, 4 }
 0x1f9   : > { %vm11319_vm11 = vcmp.eq.f32.partialorder %v11301_v9, %v9995_v50  ;;  %v2059_v46 = vsel %vm1883_vm6, 1, %v11253_v32  ;;  %v2094_v58 = vrot.slane %v2072_v6, %v9007_v59  ;;  %v1870_v43 = vrot.slane %v1767_v24, 4 }
 0x1fa   : > { %vm10226_vm15 = vmand %vm11319_vm11, %vm1241_vm5  ;;  %vm1729_vm13 = vcmp.eq.f32.partialorder %v11322_v27, %v9995_v50  ;;  %vm11323_vm9 = vcmp.eq.f32.partialorder %v9105_v19, %v9995_v50  ;;  %v2073_v9 = vcombine.low %v2058_v29, %v2059_v46  ;;  %v2102_v16 = vcombine.low %v2080_v23, %v2087_v17  ;;  %5635 = vmatmul.mubr.f32.vlgmr.msra.gmra.mrb[6].mxu0 %v8853_v15 }
 0x1fb   : > { %vm10239_vm14 = vmand %vm11323_vm9, %vm1241_vm5  ;;  %v1865_v45 = vmax.f32 %v1766_v22, %v1864_v34  ;;  %v1758_v28 = vsel %vm10149_vm4, 1.0, %v11252_v52  ;;  %v11328_v19 = vcombine.low %v9588_v3, %v9603_v53  ;;  %v1871_v0 = vmax.f32 %v1767_v24, %v1870_v43  ;;  %6172 = vmatprep.mubr.f32.mxu0 %v11252_v52 }
 0x1fc   : > { %vm10245_vm1 = vmand %vm1729_vm13, %vm1241_vm5  ;;  %v1759_v31 = vsel %vm10165_vm10, 1.0, %v11252_v52  ;;  %v1760_v5 = vsel %vm10180_vm8, 1.0, %v11252_v52  ;;  %v1761_v7 = vsel %vm10198_vm7, 1.0, %v11252_v52  ;;  %v2101_v3 = vrot.slane %v2073_v9, %v9007_v59  ;;  %5170 = vmatmul.mubr.f32.vlgmr.msra.gmra.mrb[6].mxu1 %v8853_v15 }
 0x1fd   : > { %vm10255_vm12 = vcmp.ne.s32.totalorder %v11328_v19, 0  ;;  %v2110_v53 = vrot.slane %v2102_v16, %v9007_v59  ;;  %v1866_v30 = vrot.slane %v1865_v45, 2  ;;  %vm11331_vm5 = vcmp.eq.s32.totalorder %v11224_v41, %v9835_v37  ;;  %5707 = vmatprep.mubr.f32.mxu1 %v11252_v52 }
 0x1fe   : > { %7321 = vmatpush1.msk.msra.mxu0 %vm11331_vm5, %v11254_v44  ;;  %v1762_v56 = vsel %vm10215_vm2, 1.0, %v11252_v52  ;;  %v1872_v49 = vrot.slane %v1871_v0, 2  ;;  %v11332_v11 = vand.u32 4294901760, %v9931_v14  ;;  %v10285_v35 = vsel %vm10226_vm15, 1.0, %v11252_v52  ;;  %vm2344_vm11 = vmand %vm11277_vm3, %vm10255_vm12 }
 0x1ff   : > { %v10290_v54 = vsel %vm10239_vm14, 1.0, %v11252_v52  ;;  %v10295_v10 = vsel %vm10245_vm1, 1.0, %v11252_v52  ;;  %v2103_v1 = vcombine.low %v2094_v58, %v2101_v3  ;;  %v1867_v14 = vmax.f32 %v1865_v45, %v1866_v30  ;;  %6178 = vmatmul.mubr.f32.vlgmr.msra.gmra.mrb[8].mxu0 %v9079_v63 }
 0x200   : > { %6189 = vmatprep.subr.mxu0 %v11332_v11  ;;  %v1816_v55 = vrot.slane %v1758_v28, 4  ;;  %v1822_v4 = vrot.slane %v1759_v31, 4  ;;  %vm11333_vm4 = vcmp.eq.s32.totalorder %v11224_v41, %v9881_v26  ;;  %v1873_v33 = vmax.f32 %v1871_v0, %v1872_v49  ;;  %6258 = vmatprep.mubr.f32.mxu0 %v11252_v52 }
 0x201   : > { %7315 = vmatpush1.msk.msra.mxu1 %vm11333_vm4, %v11254_v44  ;;  %v1828_v21 = vrot.slane %v1760_v5, 4  ;;  %v1834_v22 = vrot.slane %v1761_v7, 4  ;;  %v1840_v12 = vrot.slane %v1762_v56, 4  ;;  %v11334_v6 = vand.u32 4294901760, %v9942_v8 }
 0x202   : > { %v2117_v23 = vrot.slane %v2103_v1, %v9007_v59  ;;  %v1868_v24 = vrot.slane %v1867_v14, 1  ;;  %v1817_v51 = vmax.f32 %v1758_v28, %v1816_v55  ;;  %v1823_v29 = vmax.f32 %v1759_v31, %v1822_v4  ;;  %5713 = vmatmul.mubr.f32.vlgmr.msra.gmra.mrb[8].mxu1 %v9079_v63 }
 0x203   : > { %5724 = vmatprep.subr.mxu1 %v11334_v6  ;;  %v11335_v17 = vand.u32 4294901760, %v9955_v40  ;;  %v1874_v34 = vrot.slane %v1873_v33, 1  ;;  %v1829_v13 = vmax.f32 %v1760_v5, %v1828_v21  ;;  %v1835_v46 = vmax.f32 %v1761_v7, %v1834_v22  ;;  %5793 = vmatprep.mubr.f32.mxu1 %v11252_v52 }
 0x204   : > { %v1841_v58 = vmax.f32 %v1762_v56, %v1840_v12  ;;  %v2118_v8 = vcombine.low %v2110_v53, %v2117_v23  ;;  %v1869_v43 = vmax.f32 %v1867_v14, %v1868_v24  ;;  %v1818_v27 = vrot.slane %v1817_v51, 2 }
 0x205   : > { %6195 = vmatpush1.msra.mxu0 %v11335_v17  ;;  %v1824_v62 = vrot.slane %v1823_v29, 2  ;;  %v11336_v9 = vand.u32 4294901760, %v10001_v48  ;;  %v1875_v40 = vmax.f32 %v1873_v33, %v1874_v34  ;;  %v1830_v16 = vrot.slane %v1829_v13, 2 }
 0x206   : > { %6268 = vmatprep.subr.mxu0 %v9864_v25  ;;  %v1836_v45 = vrot.slane %v1835_v46, 2  ;;  %v1842_v18 = vrot.slane %v1841_v58, 2  ;;  %vm2183_vm10 = vcmp.ne.s32.totalorder %v2118_v8, 0  ;;  %vm1892_vm8 = vcmp.gt.f32.partialorder %v1869_v43, 0.5  ;;  %v11346_v43 = vld [vmem:[#allocation33_spill] sm:$0xff] }
 0x207   : > { %5730 = vmatpush1.msra.mxu1 %v11336_v9  ;;  %v11337_v63 = vrot.slane %v9950_v2, %v9007_v59  ;;  %v1819_v48 = vmax.f32 %v1817_v51, %v1818_v27  ;;  %v1825_v19 = vmax.f32 %v1823_v29, %v1824_v62  ;;  %vm2186_vm2 = vmand %vm11277_vm3, %vm2183_vm10  ;;  %vm1893_vm6 = vcmp.gt.f32.partialorder %v1875_v40, 0.5  ;;  %6260 = vmatmul.mubr.f32.vlgmr.msra.gmra.mrb[8].mxu0 %v8853_v15 }
 0x208   : > { %5803 = vmatprep.subr.mxu1 %v9879_v47  ;;  %v2068_v0 = vsel %vm1892_vm8, 1, %v11253_v32  ;;  %v1831_v31 = vmax.f32 %v1829_v13, %v1830_v16  ;;  %v1837_v5 = vmax.f32 %v1835_v46, %v1836_v45  ;;  %v2189_v2 = vsel %vm2186_vm2, 1.0, %v9945_v20  ;;  %6271 = vmatpush1.msra.mxu0 %v9895_v38  ;;  %v11344_v46 = vld [vmem:[#allocation44_spill] sm:$0xff]  ;;  %v11350_v16 = vld [vmem:[#allocation11_spill] sm:$0xff] }
 0x209   : > { %vm10319_vm7 = vcmp.ne.s32.totalorder %v11337_v63, 0  ;;  %v2069_v7 = vsel %vm1893_vm6, 1, %v11253_v32  ;;  %v11340_v3 = vlaneseq  ;;  %v1820_v30 = vrot.slane %v1819_v48, 1  ;;  %6334 = vmatprep.mubr.f32.mxu0 %v11252_v52  ;;  %7322 = vmatprep.subr.msk.mxu0 %vm1547_vm0, %v11254_v44  ;;  %v11351_v63 = vld [vmem:[#allocation35_spill] sm:$0xff] }
 0x20a   : > { %v1826_v56 = vrot.slane %v1825_v19, 1  ;;  %v2347_v49 = vsel %vm2344_vm11, 1.0, %v2189_v2  ;;  %v2168_v11 = vcombine.low %v2068_v0, %v2069_v7  ;;  %v1832_v1 = vrot.slane %v1831_v31, 1  ;;  %5795 = vmatmul.mubr.f32.vlgmr.msra.gmra.mrb[8].mxu1 %v8853_v15 }
 0x20b   : > { %vm10333_vm15 = vcmp.lt.s32.totalorder %v11340_v3, 256  ;;  %v1838_v14 = vrot.slane %v1837_v5, 1  ;;  %7329 = vst [vmem:[%s10338_s17 + $0x4] ss:$8 sm:$0xf] %v2347_v49  ;;  %v1821_v20 = vmax.f32 %v1819_v48, %v1820_v30  ;;  %v1843_v55 = vmax.f32 %v1841_v58, %v1842_v18  ;;  %5806 = vmatpush1.msra.mxu1 %v9911_v61  ;;  %5869 = vmatprep.mubr.f32.mxu1 %v11252_v52 }
 0x20c   : > { %7330 = vst [vmem:[%s10338_s17 + $0x4] ss:$8 sm:$0xf0] %v2347_v49  ;;  %v1827_v50 = vmax.f32 %v1825_v19, %v1826_v56  ;;  %v1846_v4 = vrot.slane %v10285_v35, 4  ;;  %v2175_v33 = vrot.slane %v2168_v11, %v9007_v59  ;;  %v1833_v21 = vmax.f32 %v1831_v31, %v1832_v1  ;;  %v11354_v56 = vld [vmem:[#allocation43_spill] sm:$0xff]  ;;  %v11355_v49 = vld [vmem:[#allocation45_spill] sm:$0xff] }
 0x20d   : > { %v1839_v22 = vmax.f32 %v1837_v5, %v1838_v14  ;;  %v1852_v12 = vrot.slane %v10290_v54, 4  ;;  %v1844_v6 = vrot.slane %v1843_v55, 1  ;;  %v1858_v24 = vrot.slane %v10295_v10, 4 }
 0x20e   : > { %v1847_v23 = vmax.f32 %v10285_v35, %v1846_v4  ;;  %vm1884_vm13 = vcmp.gt.f32.partialorder %v1821_v20, 0.5  ;;  %v2182_v51 = vrot.slane %v2175_v33, %v9007_v59  ;;  %vm1885_vm9 = vcmp.gt.f32.partialorder %v1827_v50, 0.5  ;;  %v11359_v4 = vld [vmem:[#allocation46_spill] sm:$0xff] }
 0x20f   : > { %v1853_v29 = vmax.f32 %v10290_v54, %v1852_v12  ;;  %vm1886_vm14 = vcmp.gt.f32.partialorder %v1833_v21, 0.5  ;;  %vm11343_vm1 = vcmp.eq.s32.totalorder %v11224_v41, %v9827_v57  ;;  %v1845_v17 = vmax.f32 %v1843_v55, %v1844_v6  ;;  %6337 = vmatmul.mubr.f32.vlgmr.msra.gmra.mrb[8].mxu0 %v11351_v63 }
 0x210   : > { %7316 = vmatprep.subr.msk.mxu1 %vm11343_vm1, %v11254_v44  ;;  %v1848_v35 = vrot.slane %v1847_v23, 2  ;;  %v1859_v34 = vmax.f32 %v10295_v10, %v1858_v24  ;;  %vm1887_vm12 = vcmp.gt.f32.partialorder %v1839_v22, 0.5  ;;  %vm2185_vm5 = vcmp.ne.s32.totalorder %v2182_v51, 0  ;;  %v11348_v10 = vld [vmem:[#allocation12_spill] sm:$0xff]  ;;  %6409 = vmatprep.mubr.f32.mxu0 %v11252_v52 }
 0x211   : > { %v1854_v13 = vrot.slane %v1853_v29, 2  ;;  %v11345_v58 = vcombine.low %v9961_v39, %v11344_v46  ;;  %v2060_v54 = vsel %vm1884_vm13, 1, %v11253_v32  ;;  %vm11347_vm4 = vcmp.gt.f32.partialorder %v11346_v43, 0.5  ;;  %v208_v46 = vld [vmem:[#allocation2] sm:$0x30] }
 0x212   : > { %vm2188_vm10 = vmand %vm11347_vm4, %vm2185_vm5  ;;  %v1849_v27 = vmax.f32 %v1847_v23, %v1848_v35  ;;  %v1860_v62 = vrot.slane %v1859_v34, 2  ;;  %vm1888_vm8 = vcmp.gt.f32.partialorder %v1845_v17, 0.5  ;;  %v2061_v9 = vsel %vm1885_vm9, 1, %v11253_v32  ;;  %5872 = vmatmul.mubr.f32.vlgmr.msra.gmra.mrb[8].mxu1 %v11351_v63 }
 0x213   : > { %v2026_v8 = vrot.slane %v11345_v58, %v9007_v59  ;;  %v2191_v40 = vsel %vm2188_vm10, 1.0, %v11348_v10  ;;  %vm11349_vm2 = vmmov %vm11347_vm4  ;;  %v1855_v39 = vmax.f32 %v1853_v29, %v1854_v13  ;;  %v2062_v18 = vsel %vm1886_vm14, 1, %v11253_v32  ;;  %5944 = vmatprep.mubr.f32.mxu1 %v11252_v52 }
 0x214   : > { %vm2346_vm6 = vmand %vm11349_vm2, %vm10319_vm7  ;;  %v1850_v19 = vrot.slane %v1849_v27, 1  ;;  %v1861_v0 = vmax.f32 %v1859_v34, %v1860_v62  ;;  %v2063_v31 = vsel %vm1887_vm12, 1, %v11253_v32  ;;  %vm11352_vm11 = vcmp.eq.s32.totalorder %v11224_v41, %v9835_v37  ;;  %v209_v62 = vld [vmem:[#allocation2 + $0x8] sm:$0x30] }
 0x215   : > { %v2027_v45 = vcombine.low %v11350_v16, %v2026_v8  ;;  %v2349_v48 = vsel %vm2346_vm6, 1.0, %v2191_v40  ;;  %7323 = vmatpush1.msk.msra.mxu0 %vm11352_vm11, %v11254_v44  ;;  %v1856_v28 = vrot.slane %v1855_v39, 1  ;;  %v2119_v5 = vcombine.low %v2060_v54, %v2061_v9  ;;  %vm11362_vm14 = vmmov %vm11343_vm1  ;;  %v11368_v8 = vld [vmem:[#allocation47_spill] sm:$0xff]  ;;  %v11369_v9 = vld [vmem:[#allocation48_spill] sm:$0xff] }
 0x216   : > { %7333 = vst.msk [vmem:[%s10338_s17 + $0x84] ss:$8 sm:$0x3] %vm10333_vm15, %v2349_v48  ;;  %v11353_v2 = vand.u32 4294901760, %v9864_v25  ;;  %v1851_v7 = vmax.f32 %v1849_v27, %v1850_v19  ;;  %v1862_v3 = vrot.slane %v1861_v0, 1  ;;  %v2120_v30 = vcombine.low %v2062_v18, %v2063_v31  ;;  %vm11365_vm5 = vmmov %vm11352_vm11 }
 0x217   : > { %v11356_v11 = vcombine.low %v11354_v56, %v11355_v49  ;;  %vm11357_vm7 = vcmp.eq.s32.totalorder %v11224_v41, %v9881_v26  ;;  %v1857_v53 = vmax.f32 %v1855_v39, %v1856_v28  ;;  %v2064_v25 = vsel %vm1888_vm8, 1, %v11253_v32  ;;  %6413 = vmatmul.mubr.f32.vlgmr.msra.gmra.mrb[8].mxu0 %v8935_v42  ;;  %v7575_v56 = vld [vmem:[#allocation2 + $0x8] sm:$0x3] }
 0x218   : > { %6422 = vmatprep.subr.mxu0 %v11353_v2  ;;  %7317 = vmatpush1.msk.msra.mxu1 %vm11357_vm7, %v11254_v44  ;;  %v2129_v14 = vrot.slane %v2119_v5, %v9007_v59  ;;  %v11358_v20 = vand.u32 4294901760, %v9879_v47  ;;  %v1863_v50 = vmax.f32 %v1861_v0, %v1862_v3  ;;  %vm1889_vm15 = vcmp.gt.f32.partialorder %v1851_v7, 0.5  ;;  %vm11366_vm8 = vmmov %vm11357_vm7  ;;  %v7574_v2 = vld [vmem:[#allocation2] sm:$0x3] }
 0x219   : > { %v2324_v1 = vrot.slane %v11356_v11, %v9007_v59  ;;  %v2136_v55 = vrot.slane %v2120_v30, %v9007_v59  ;;  %vm1890_vm13 = vcmp.gt.f32.partialorder %v1857_v53, 0.5  ;;  %v2065_v21 = vsel %vm1889_vm15, 1, %v11253_v32  ;;  %6489 = vmatprep.mubr.f32.mxu0 %v11252_v52 }
 0x21a   : > { %5957 = vmatprep.subr.mxu1 %v11358_v20  ;;  %vm1891_vm9 = vcmp.gt.f32.partialorder %v1863_v50, 0.5  ;;  %v2066_v22 = vsel %vm1890_vm13, 1, %v11253_v32  ;;  %v2121_v12 = vcombine.low %v2064_v25, %v2065_v21  ;;  %v11360_v51 = vand.u32 4294901760, %v9895_v38  ;;  %5948 = vmatmul.mubr.f32.vlgmr.msra.gmra.mrb[8].mxu1 %v8935_v42  ;;  %v11363_v42 = vld [vmem:[#allocation21_spill] sm:$0xff]  ;;  %v11370_v50 = vld [vmem:[#allocation84_spill] sm:$0xff] }
 0x21b   : > { %v2325_v33 = vcombine.low %v11359_v4, %v2324_v1  ;;  %v2067_v6 = vsel %vm1891_vm9, 1, %v11253_v32  ;;  %v2151_v24 = vcombine.low %v2129_v14, %v2136_v55  ;;  %v11361_v29 = vand.u32 4294901760, %v9911_v61  ;;  %6024 = vmatprep.mubr.f32.mxu1 %v11252_v52 }
 0x21c   : > { %v2122_v23 = vcombine.low %v2066_v22, %v2067_v6  ;;  %v2143_v47 = vrot.slane %v2121_v12, %v9007_v59  ;;  %6426 = vmatpush1.msra.mxu0 %v11360_v51  ;;  %vm2044_vm1 = vcmp.ne.s32.totalorder %v2027_v45, 0  ;;  %v329_v54 = vmul.f32 0.5, %v11368_v8 }
 0x21d   : > { %7324 = vmatprep.subr.msk.mxu0 %vm1547_vm0, %v11254_v44  ;;  %5961 = vmatpush1.msra.mxu1 %v11361_v29  ;;  %v2159_v17 = vrot.slane %v2151_v24, %v9007_v59  ;;  %vm11364_vm0 = vnez %v11363_v42  ;;  %vm2342_vm4 = vcmp.ne.s32.totalorder %v2325_v33, 0  ;;  %v330_v10 = vmul.f32 0.5, %v11369_v9 }
 0x21e   : > { %v2150_v32 = vrot.slane %v2122_v23, %v9007_v59  ;;  %7318 = vmatprep.subr.msk.mxu1 %vm11362_vm14, %v11254_v44  ;;  %vm2047_vm12 = vmand %vm11364_vm0, %vm2044_vm1  ;;  %v6973_v16 = vrot.slane %v208_v46, 2  ;;  %v6974_v18 = vrot.slane %v209_v62, 2  ;;  %v365_v63 = vrot.slane %v329_v54, 2 }
 0x21f   : > { %6491 = vmatmul.mubr.f32.vlgmr.msra.gmra.mrb[8].mxu0 %v8853_v15  ;;  %vm2345_vm6 = vmand %vm11364_vm0, %vm2342_vm4  ;;  %v366_v48 = vrot.slane %v330_v10, 2  ;;  %v10460_v30 = vsel %vm11277_vm3, 1.0, %v11252_v52  ;;  %v6790_v53 = vrot.slane %v208_v46, 4  ;;  %v6791_v14 = vrot.slane %v209_v62, 4 }
 0x220   : > { %v2152_v38 = vcombine.low %v2143_v47, %v2150_v32  ;;  %7325 = vmatpush1.msk.msra.mxu0 %vm11365_vm5, %v11254_v44  ;;  %6563 = vmatprep.mubr.f32.mxu0 %v11252_v52  ;;  %v401_v7 = vadd.f32 %v7574_v2, %v365_v63  ;;  %v6850_v55 = vrot.slane %v10460_v30, %v11370_v50  ;;  %vm11392_vm3 = vcmp.gt.f32.partialorder %v11346_v43, 0.5  ;;  %v223_v43 = vld [vmem:[#allocation2 + $0x78] sm:$0x30] }
 0x221   : > { %v402_v49 = vadd.f32 %v7575_v56, %v366_v48  ;;  %v6854_v33 = vrot.slane %v10460_v30, %v11371_v60  ;;  %v7576_v48 = vld [vmem:[#allocation2 + $0x20] sm:$0x3] }
 0x222   : > { %v2166_v36 = vrot.slane %v2152_v38, %v9007_v59  ;;  %6026 = vmatmul.mubr.f32.vlgmr.msra.gmra.mrb[8].mxu1 %v8853_v15  ;;  %v11367_v59 = vmov -1.0   ;;  %v11372_v38 = vld [vmem:[#allocation51_spill] sm:$0xff] }
 0x223   : > { %7319 = vmatpush1.msk.msra.mxu1 %vm11366_vm8, %v11254_v44  ;;  %6098 = vmatprep.mubr.f32.mxu1 %v11252_v52  ;;  %v2050_v57 = vsel %vm2047_vm12, 0.0, %v11367_v59 }
 0x224   : > { %v2167_v61 = vcombine.low %v2159_v17, %v2166_v36  ;;  %v333_v17 = vmul.f32 0.5, %v11372_v38  ;;  %v10471_v36 = vld [vmem:[#allocation2 + $0x20] sm:$0x30] }
 0x226   : > { %vm2184_vm10 = vcmp.ne.s32.totalorder %v2167_v61, 0  ;;  %v11373_v61 = vld [vmem:[#allocation52_spill] sm:$0xff] }
 0x227   : > { %vm2187_vm2 = vmand %vm11364_vm0, %vm2184_vm10  ;;  %6565 = vmatmul.mubr.f32.vlgmr.msra.gmra.mrb[8].mxu0 %v8853_v15  ;;  %v334_v59 = vmul.f32 0.5, %v11373_v61  ;;  %v11376_v61 = vld [vmem:[#allocation27_spill] sm:$0xff] }
 0x228   : > { %v2190_v37 = vsel %vm2187_vm2, 1.0, %v2050_v57 }
 0x229   : > { %v2348_v35 = vsel %vm2345_vm6, 1.0, %v2190_v37  ;;  %v10474_v37 = vld [vmem:[#allocation2 + $0x28] sm:$0x30]  ;;  %v370_v62 = vrot.slane %v334_v59, 2  ;;  %v6866_v59 = vrot.slane %v10460_v30, %v11376_v61 }
 0x22a   : > { %7331 = vst [vmem:[%s10338_s17 + $0x44] ss:$8 sm:$0xf] %v2348_v35  ;;  %7332 = vst [vmem:[%s10338_s17 + $0x44] ss:$8 sm:$0xf0] %v2348_v35  ;;  %6100 = vmatmul.mubr.f32.vlgmr.msra.gmra.mrb[8].mxu1 %v8853_v15 }
 0x22b   : > { %v369_v35 = vrot.slane %v333_v17, 2  ;;  %v6795_v9 = vrot.slane %v10474_v37, 4 }
 0x249   : > { %v2846_v41 = vpop.f32.mrb[0].mxu0 }
 0x24a   : > { %v2848_v44 = vpop.f32.mrb[1].mxu0 }
 0x24b   : > { %v2618_v26 = vpop.f32.mrb[0].mxu1 }
 0x24c   : > { %v7337_v34 = vadd.f32 %v2846_v41, %v2618_v26  ;;  %v2620_v13 = vpop.f32.mrb[1].mxu1  ;;  %v10476_v26 = vld [vmem:[#allocation2 + $0x10] sm:$0x30] }
 0x24d   : > { %v7338_v58 = vadd.f32 %v2848_v44, %v2620_v13  ;;  %v6977_v13 = vrot.slane %v10471_v36, 2 }
 0x24e   : > { %v6589_v27 = vrot.slane %v7337_v34, 6 }
 0x24f   : > { %v6590_v40 = vrot.slane %v7338_v58, 6 }
 0x250   : > { %v6625_v39 = vsub.f32 %v7337_v34, %v6589_v27 }
 0x251   : > { %v6626_v45 = vsub.f32 %v7338_v58, %v6590_v40  ;;  %v211_v40 = vld [vmem:[#allocation2 + $0x18] sm:$0x30] }
 0x252   : > { %v6643_v15 = vadd.f32 1.0, %v6625_v39 }
 0x253   : > { %v6644_v19 = vadd.f32 1.0, %v6626_v45  ;;  %v6978_v45 = vrot.slane %v10474_v37, 2 }
 0x254   : > { %v6661_v0 = vmul.f32 0.5, %v6643_v15  ;;  %v7009_v31 = vmul.f32 %v6973_v16, %v6643_v15 }
 0x255   : > { %v6662_v28 = vmul.f32 0.5, %v6644_v19  ;;  %v7010_v5 = vmul.f32 %v6974_v18, %v6644_v19  ;;  %v11375_v18 = vld [vmem:[#allocation50_spill] sm:$0xff]  ;;  %v405_v19 = vadd.f32 %v7576_v48, %v369_v35  ;;  %v6792_v35 = vrot.slane %v10476_v26, 4 }
 0x256   : > { %v6697_v3 = vrot.slane %v6661_v0, 2  ;;  %7538 = vlog2.f32 %v7009_v31  ;;  %v332_v63 = vmul.f32 0.5, %v11375_v18 }
 0x257   : > { %v6698_v11 = vrot.slane %v6662_v28, 2  ;;  %7540 = vlog2.f32 %v7010_v5  ;;  %v6975_v28 = vrot.slane %v10476_v26, 2 }
 0x258   : > { %v6733_v1 = vadd.f32 %v7337_v34, %v6697_v3  ;;  %v6794_v34 = vrot.slane %v10471_v36, 4  ;;  %v6976_v3 = vrot.slane %v211_v40, 2 }
 0x259   : > { %v6734_v25 = vadd.f32 %v7338_v58, %v6698_v11  ;;  %v11374_v58 = vld [vmem:[#allocation49_spill] sm:$0xff]  ;;  %v7577_v11 = vld [vmem:[#allocation2 + $0x28] sm:$0x3] }
 0x25a   : > { %v6754_v20 = vsub.f32 %v6733_v1, %v401_v7  ;;  %v331_v8 = vmul.f32 0.5, %v11374_v58  ;;  %v406_v1 = vadd.f32 %v7577_v11, %v370_v62  ;;  %v6793_v58 = vrot.slane %v211_v40, 4 }
 0x25b   : > { %v6755_v4 = vsub.f32 %v6734_v25, %v402_v49 }
 0x25c   : > { %v6826_v21 = vmul.f32 %v6790_v53, %v6754_v20  ;;  %v367_v2 = vrot.slane %v331_v8, 2  ;;  %v368_v20 = vrot.slane %v332_v63, 2 }
 0x25d   : > { %v6827_v22 = vmul.f32 %v6791_v14, %v6755_v4 }
 0x25e   : > { %v6937_v12 = vmul.f32 %v6850_v55, %v6826_v21 }
 0x25f   : > { %v6938_v6 = vmul.f32 %v6854_v33, %v6827_v22 }
 0x260   : > { %v7539_v23 = vpop.eup %7538  ;;  %6955 = vst [vmem:[%s10338_s17] sm:$0x3] %v6937_v12 }
 0x261   : > { %v7541_v47 = vpop.eup %7540  ;;  %v7028_v24 = vmul.f32 0.6931472, %v7539_v23  ;;  %6956 = vst [vmem:[%s10338_s17 + $0x8] sm:$0x3] %v6938_v6 }
 0x262   : > { %v7030_v51 = vmul.f32 0.6931472, %v7541_v47  ;;  %v7578_v47 = vld [vmem:[#allocation2 + $0x10] sm:$0x3] }
 0x263   : > { %v7063_v32 = vmul.f32 %v7028_v24, %v6850_v55  ;;  %v403_v24 = vadd.f32 %v7578_v47, %v367_v2  ;;  %v10514_v47 = vld [vmem:[#allocation2 + $0x30] sm:$0x30] }
 0x264   : > { %v7064_v29 = vmul.f32 %v7030_v51, %v6854_v33 }
 0x265   : > { %7081 = vst [vmem:[%s10338_s17] sm:$0xc] %v7063_v32 }
 0x266   : > { %7082 = vst [vmem:[%s10338_s17 + $0x8] sm:$0xc] %v7064_v29  ;;  %v7579_v29 = vld [vmem:[#allocation2 + $0x18] sm:$0x3] }
 0x267   : > { %v404_v38 = vadd.f32 %v7579_v29, %v368_v20 }
 0x275   : > { %v3776_v57 = vpop.f32.mrb[2].mxu0 }
 0x276   : > { %v6593_v41 = vrot.slane %v3776_v57, 6  ;;  %v3778_v44 = vpop.f32.mrb[3].mxu0 }
 0x277   : > { %v6594_v46 = vrot.slane %v3778_v44, 6  ;;  %v3311_v54 = vpop.f32.mrb[2].mxu1 }
 0x278   : > { %v6629_v27 = vsub.f32 %v3776_v57, %v6593_v41  ;;  %v6591_v10 = vrot.slane %v3311_v54, 6  ;;  %v3313_v39 = vpop.f32.mrb[3].mxu1 }
 0x279   : > { %v6630_v16 = vsub.f32 %v3778_v44, %v6594_v46  ;;  %v6592_v15 = vrot.slane %v3313_v39, 6 }
 0x27a   : > { %v6647_v0 = vadd.f32 1.0, %v6629_v27  ;;  %v6627_v31 = vsub.f32 %v3311_v54, %v6591_v10  ;;  %v11378_v27 = vld [vmem:[#allocation71_spill] sm:$0xff] }
 0x27b   : > { %v6648_v5 = vadd.f32 1.0, %v6630_v16  ;;  %v6628_v7 = vsub.f32 %v3313_v39, %v6592_v15  ;;  %v6858_v62 = vrot.slane %v10460_v30, %v11378_v27 }
 0x27c   : > { %v6665_v56 = vmul.f32 0.5, %v6647_v0  ;;  %v7013_v49 = vmul.f32 %v6977_v13, %v6647_v0  ;;  %v6645_v53 = vadd.f32 1.0, %v6627_v31  ;;  %v11377_v13 = vld [vmem:[#allocation87_spill] sm:$0xff] }
 0x27d   : > { %v6666_v25 = vmul.f32 0.5, %v6648_v5  ;;  %v7014_v14 = vmul.f32 %v6978_v45, %v6648_v5  ;;  %v6646_v55 = vadd.f32 1.0, %v6628_v7  ;;  %v11379_v45 = vld [vmem:[#allocation85_spill] sm:$0xff] }
 0x27e   : > { %v6701_v4 = vrot.slane %v6665_v56, 2  ;;  %7542 = vlog2.f32 %v7013_v49  ;;  %v6663_v33 = vmul.f32 0.5, %v6645_v53  ;;  %v7011_v21 = vmul.f32 %v6975_v28, %v6645_v53  ;;  %v11380_v49 = vld [vmem:[#allocation55_spill] sm:$0xff]  ;;  %v11381_v53 = vld [vmem:[#allocation56_spill] sm:$0xff] }
 0x27f   : > { %v6702_v22 = vrot.slane %v6666_v25, 2  ;;  %7544 = vlog2.f32 %v7014_v14  ;;  %v6664_v12 = vmul.f32 0.5, %v6646_v55  ;;  %v7012_v6 = vmul.f32 %v6976_v3, %v6646_v55  ;;  %v10504_v14 = vld [vmem:[#allocation2 + $0x40] sm:$0x30] }
 0x280   : > { %v6737_v23 = vadd.f32 %v6701_v4, %v3776_v57  ;;  %v6699_v51 = vrot.slane %v6663_v33, 2  ;;  %7546 = vlog2.f32 %v7011_v21  ;;  %v6870_v57 = vrot.slane %v10460_v30, %v11377_v13  ;;  %v10511_v33 = vld [vmem:[#allocation2 + $0x48] sm:$0x30] }
 0x281   : > { %v6738_v32 = vadd.f32 %v6702_v22, %v3778_v44  ;;  %v6700_v17 = vrot.slane %v6664_v12, 2  ;;  %7548 = vlog2.f32 %v7012_v6  ;;  %v337_v11 = vmul.f32 0.5, %v11380_v49  ;;  %v7580_v22 = vld [vmem:[#allocation2 + $0x40] sm:$0x3] }
 0x282   : > { %v6758_v36 = vsub.f32 %v6737_v23, %v405_v19  ;;  %v6735_v37 = vadd.f32 %v6699_v51, %v3311_v54  ;;  %v6862_v54 = vrot.slane %v10460_v30, %v11379_v45  ;;  %v338_v25 = vmul.f32 0.5, %v11381_v53  ;;  %v7583_v53 = vld [vmem:[#allocation2 + $0x38] sm:$0x3] }
 0x283   : > { %v6759_v41 = vsub.f32 %v6738_v32, %v406_v1  ;;  %v6736_v46 = vadd.f32 %v6700_v17, %v3313_v39  ;;  %v373_v1 = vrot.slane %v337_v11, 2  ;;  %v10509_v4 = vsel %vm11364_vm0, 1.0, %v11252_v52 }
 0x284   : > { %v6830_v44 = vmul.f32 %v6794_v34, %v6758_v36  ;;  %v6756_v8 = vsub.f32 %v6735_v37, %v403_v24  ;;  %v6798_v6 = vrot.slane %v10504_v14, 4  ;;  %v11382_v24 = vld [vmem:[#allocation53_spill] sm:$0xff]  ;;  %v374_v17 = vrot.slane %v338_v25, 2  ;;  %v215_v36 = vld [vmem:[#allocation2 + $0x38] sm:$0x30] }
 0x285   : > { %v6831_v10 = vmul.f32 %v6795_v9, %v6759_v41  ;;  %v6757_v16 = vsub.f32 %v6736_v46, %v404_v38  ;;  %v409_v12 = vadd.f32 %v7580_v22, %v373_v1  ;;  %v335_v51 = vmul.f32 0.5, %v11382_v24  ;;  %v11383_v41 = vld [vmem:[#allocation54_spill] sm:$0xff] }
 0x286   : > { %v6941_v26 = vmul.f32 %v6866_v59, %v6830_v44  ;;  %v6828_v18 = vmul.f32 %v6792_v35, %v6756_v8  ;;  %v6981_v38 = vrot.slane %v10504_v14, 2  ;;  %v6982_v35 = vrot.slane %v10511_v33, 2 }
 0x287   : > { %v6942_v63 = vmul.f32 %v6870_v57, %v6831_v10  ;;  %v6829_v15 = vmul.f32 %v6793_v58, %v6757_v16  ;;  %v6799_v44 = vrot.slane %v10511_v33, 4  ;;  %v371_v16 = vrot.slane %v335_v51, 2 }
 0x288   : > { %v7543_v48 = vpop.eup %7542  ;;  %6959 = vst [vmem:[%s10338_s17 + $0x20] sm:$0x3] %v6941_v26  ;;  %v6939_v40 = vmul.f32 %v6858_v62, %v6828_v18  ;;  %v6980_v26 = vrot.slane %v215_v36, 2  ;;  %v6882_v33 = vrot.slane %v10509_v4, %v11370_v50 }
 0x289   : > { %v7545_v34 = vpop.eup %7544  ;;  %v7036_v39 = vmul.f32 0.6931472, %v7543_v48  ;;  %6960 = vst [vmem:[%s10338_s17 + $0x28] sm:$0x3] %v6942_v63  ;;  %v6940_v9 = vmul.f32 %v6862_v54, %v6829_v15  ;;  %v7581_v15 = vld [vmem:[#allocation2 + $0x48] sm:$0x3] }
 0x28a   : > { %v7547_v19 = vpop.eup %7546  ;;  %v7038_v0 = vmul.f32 0.6931472, %v7545_v34  ;;  %6957 = vst [vmem:[%s10338_s17 + $0x10] sm:$0x3] %v6939_v40  ;;  %v410_v48 = vadd.f32 %v7581_v15, %v374_v17  ;;  %v11384_v17 = vld [vmem:[#allocation88_spill] sm:$0xff]  ;;  %v11386_v15 = vld [vmem:[#allocation59_spill] sm:$0xff] }
 0x28b   : > { %v7549_v31 = vpop.eup %7548  ;;  %v7067_v28 = vmul.f32 %v7036_v39, %v6866_v59  ;;  %v7032_v5 = vmul.f32 0.6931472, %v7547_v19  ;;  %6958 = vst [vmem:[%s10338_s17 + $0x18] sm:$0x3] %v6940_v9 }
 0x28c   : > { %v7068_v2 = vmul.f32 %v7038_v0, %v6870_v57  ;;  %v7034_v7 = vmul.f32 0.6931472, %v7549_v31  ;;  %v336_v57 = vmul.f32 0.5, %v11383_v41 }
 0x28d   : > { %7085 = vst [vmem:[%s10338_s17 + $0x20] sm:$0xc] %v7067_v28  ;;  %v7065_v3 = vmul.f32 %v7032_v5, %v6858_v62  ;;  %v6979_v62 = vrot.slane %v10514_v47, 2 }
 0x28e   : > { %7086 = vst [vmem:[%s10338_s17 + $0x28] sm:$0xc] %v7068_v2  ;;  %v7066_v56 = vmul.f32 %v7034_v7, %v6862_v54  ;;  %v372_v9 = vrot.slane %v336_v57, 2 }
 0x28f   : > { %7083 = vst [vmem:[%s10338_s17 + $0x10] sm:$0xc] %v7065_v3 }
 0x290   : > { %7084 = vst [vmem:[%s10338_s17 + $0x18] sm:$0xc] %v7066_v56  ;;  %v7582_v56 = vld [vmem:[#allocation2 + $0x30] sm:$0x3]  ;;  %v408_v25 = vadd.f32 %v7583_v53, %v372_v9  ;;  %v10541_v9 = vld [vmem:[#allocation2 + $0x60] sm:$0x30] }
 0x291   : > { %v407_v49 = vadd.f32 %v7582_v56, %v371_v16  ;;  %v10546_v56 = vld [vmem:[#allocation2 + $0x50] sm:$0x30] }
 0x2a1   : > { %v4706_v20 = vpop.f32.mrb[4].mxu0 }
 0x2a2   : > { %v6597_v55 = vrot.slane %v4706_v20, 6  ;;  %v4708_v21 = vpop.f32.mrb[5].mxu0 }
 0x2a3   : > { %v6598_v23 = vrot.slane %v4708_v21, 6  ;;  %v4241_v32 = vpop.f32.mrb[4].mxu1 }
 0x2a4   : > { %v6633_v29 = vsub.f32 %v4706_v20, %v6597_v55  ;;  %v6595_v42 = vrot.slane %v4241_v32, 6  ;;  %v4243_v59 = vpop.f32.mrb[5].mxu1 }
 0x2a5   : > { %v6634_v37 = vsub.f32 %v4708_v21, %v6598_v23  ;;  %v6596_v46 = vrot.slane %v4243_v59, 6  ;;  %v6796_v23 = vrot.slane %v10514_v47, 4 }
 0x2a6   : > { %v6651_v58 = vadd.f32 1.0, %v6633_v29  ;;  %v6631_v8 = vsub.f32 %v4241_v32, %v6595_v42  ;;  %v6797_v29 = vrot.slane %v215_v36, 4  ;;  %v6874_v42 = vrot.slane %v10460_v30, %v11384_v17 }
 0x2a7   : > { %v6652_v10 = vadd.f32 1.0, %v6634_v37  ;;  %v6632_v54 = vsub.f32 %v4243_v59, %v6596_v46 }
 0x2a8   : > { %v6669_v18 = vmul.f32 0.5, %v6651_v58  ;;  %v7017_v63 = vmul.f32 %v6981_v38, %v6651_v58  ;;  %v6649_v40 = vadd.f32 1.0, %v6631_v8 }
 0x2a9   : > { %v6670_v34 = vmul.f32 0.5, %v6652_v10  ;;  %v7018_v39 = vmul.f32 %v6982_v35, %v6652_v10  ;;  %v6650_v19 = vadd.f32 1.0, %v6632_v54  ;;  %v11385_v35 = vld [vmem:[#allocation89_spill] sm:$0xff] }
 0x2aa   : > { %v6705_v0 = vrot.slane %v6669_v18, 2  ;;  %7550 = vlog2.f32 %v7017_v63  ;;  %v6667_v31 = vmul.f32 0.5, %v6649_v40  ;;  %v7015_v28 = vmul.f32 %v6979_v62, %v6649_v40 }
 0x2ab   : > { %v6706_v5 = vrot.slane %v6670_v34, 2  ;;  %7552 = vlog2.f32 %v7018_v39  ;;  %v6668_v2 = vmul.f32 0.5, %v6650_v19  ;;  %v7016_v7 = vmul.f32 %v6980_v26, %v6650_v19  ;;  %v11387_v34 = vld [vmem:[#allocation60_spill] sm:$0xff] }
 0x2ac   : > { %v6741_v3 = vadd.f32 %v6705_v0, %v4706_v20  ;;  %v6703_v11 = vrot.slane %v6667_v31, 2  ;;  %7554 = vlog2.f32 %v7015_v28  ;;  %v6886_v20 = vrot.slane %v10509_v4, %v11371_v60  ;;  %v10543_v31 = vld [vmem:[#allocation2 + $0x68] sm:$0x30] }
 0x2ad   : > { %v6742_v1 = vadd.f32 %v6706_v5, %v4708_v21  ;;  %v6704_v14 = vrot.slane %v6668_v2, 2  ;;  %7556 = vlog2.f32 %v7016_v7  ;;  %v342_v39 = vmul.f32 0.5, %v11387_v34  ;;  %v7584_v5 = vld [vmem:[#allocation2 + $0x60] sm:$0x3] }
 0x2ae   : > { %v6762_v55 = vsub.f32 %v6741_v3, %v409_v12  ;;  %v6739_v22 = vadd.f32 %v6703_v11, %v4241_v32  ;;  %v6878_v32 = vrot.slane %v10460_v30, %v11385_v35  ;;  %v6802_v7 = vrot.slane %v10541_v9, 4 }
 0x2af   : > { %v6763_v24 = vsub.f32 %v6742_v1, %v410_v48  ;;  %v6740_v51 = vadd.f32 %v6704_v14, %v4243_v59  ;;  %v341_v48 = vmul.f32 0.5, %v11386_v15  ;;  %v378_v14 = vrot.slane %v342_v39, 2  ;;  %v7586_v15 = vld [vmem:[#allocation2 + $0x50] sm:$0x3]  ;;  %v7587_v39 = vld [vmem:[#allocation2 + $0x58] sm:$0x3] }
 0x2b0   : > { %v6834_v21 = vmul.f32 %v6798_v6, %v6762_v55  ;;  %v6760_v38 = vsub.f32 %v6739_v22, %v407_v49  ;;  %v11388_v49 = vld [vmem:[#allocation57_spill] sm:$0xff] }
 0x2b1   : > { %v6835_v12 = vmul.f32 %v6799_v44, %v6763_v24  ;;  %v6761_v37 = vsub.f32 %v6740_v51, %v408_v25  ;;  %v377_v40 = vrot.slane %v341_v48, 2  ;;  %v339_v11 = vmul.f32 0.5, %v11388_v49 }
 0x2b2   : > { %v6945_v47 = vmul.f32 %v6882_v33, %v6834_v21  ;;  %v6832_v41 = vmul.f32 %v6796_v23, %v6760_v38  ;;  %v6985_v25 = vrot.slane %v10541_v9, 2  ;;  %v6986_v24 = vrot.slane %v10543_v31, 2 }
 0x2b3   : > { %v6946_v57 = vmul.f32 %v6886_v20, %v6835_v12  ;;  %v6833_v46 = vmul.f32 %v6797_v29, %v6761_v37  ;;  %v413_v2 = vadd.f32 %v7584_v5, %v377_v40  ;;  %v6803_v38 = vrot.slane %v10543_v31, 4 }
 0x2b4   : > { %v7551_v58 = vpop.eup %7550  ;;  %6963 = vst [vmem:[%s10338_s17 + $0x40] sm:$0x3] %v6945_v47  ;;  %v6943_v36 = vmul.f32 %v6874_v42, %v6832_v41  ;;  %v6983_v12 = vrot.slane %v10546_v56, 2  ;;  %v6898_v5 = vrot.slane %v10509_v4, %v11376_v61  ;;  %v6800_v49 = vrot.slane %v10546_v56, 4 }
 0x2b5   : > { %v7553_v6 = vpop.eup %7552  ;;  %v7044_v59 = vmul.f32 0.6931472, %v7551_v58  ;;  %6964 = vst [vmem:[%s10338_s17 + $0x48] sm:$0x3] %v6946_v57  ;;  %v6944_v44 = vmul.f32 %v6878_v32, %v6833_v46  ;;  %v7585_v58 = vld [vmem:[#allocation2 + $0x68] sm:$0x3]  ;;  %v6894_v61 = vrot.slane %v10509_v4, %v11379_v45 }
 0x2b6   : > { %v7555_v8 = vpop.eup %7554  ;;  %v7046_v62 = vmul.f32 0.6931472, %v7553_v6  ;;  %6961 = vst [vmem:[%s10338_s17 + $0x30] sm:$0x3] %v6943_v36  ;;  %v414_v36 = vadd.f32 %v7585_v58, %v378_v14 }
 0x2b7   : > { %v7557_v30 = vpop.eup %7556  ;;  %v7071_v10 = vmul.f32 %v7044_v59, %v6882_v33  ;;  %v7040_v16 = vmul.f32 0.6931472, %v7555_v8  ;;  %6962 = vst [vmem:[%s10338_s17 + $0x38] sm:$0x3] %v6944_v44  ;;  %v219_v33 = vld [vmem:[#allocation2 + $0x58] sm:$0x30] }
 0x2b8   : > { %v7072_v54 = vmul.f32 %v7046_v62, %v6886_v20  ;;  %v7042_v26 = vmul.f32 0.6931472, %v7557_v30  ;;  %v11389_v20 = vld [vmem:[#allocation58_spill] sm:$0xff]  ;;  %v6984_v41 = vrot.slane %v219_v33, 2 }
 0x2b9   : > { %7089 = vst [vmem:[%s10338_s17 + $0x40] sm:$0xc] %v7071_v10  ;;  %v7069_v18 = vmul.f32 %v7040_v16, %v6874_v42  ;;  %v340_v51 = vmul.f32 0.5, %v11389_v20 }
 0x2ba   : > { %7090 = vst [vmem:[%s10338_s17 + $0x48] sm:$0xc] %v7072_v54  ;;  %v7070_v63 = vmul.f32 %v7042_v26, %v6878_v32  ;;  %v375_v32 = vrot.slane %v339_v11, 2 }
 0x2bb   : > { %7087 = vst [vmem:[%s10338_s17 + $0x30] sm:$0xc] %v7069_v18  ;;  %v376_v8 = vrot.slane %v340_v51, 2 }
 0x2bc   : > { %7088 = vst [vmem:[%s10338_s17 + $0x38] sm:$0xc] %v7070_v63  ;;  %v411_v48 = vadd.f32 %v7586_v15, %v375_v32 }
 0x2bd   : > { %v412_v9 = vadd.f32 %v7587_v39, %v376_v8  ;;  %v10578_v8 = vld [vmem:[#allocation2 + $0x88] sm:$0x30] }
 0x2cd   : > { %v5636_v19 = vpop.f32.mrb[6].mxu0 }
 0x2ce   : > { %v6601_v0 = vrot.slane %v5636_v19, 6  ;;  %v5638_v28 = vpop.f32.mrb[7].mxu0 }
 0x2cf   : > { %v6602_v3 = vrot.slane %v5638_v28, 6  ;;  %v5171_v1 = vpop.f32.mrb[6].mxu1 }
 0x2d0   : > { %v6637_v53 = vsub.f32 %v5636_v19, %v6601_v0  ;;  %v6599_v55 = vrot.slane %v5171_v1, 6  ;;  %v5173_v22 = vpop.f32.mrb[7].mxu1 }
 0x2d1   : > { %v6638_v23 = vsub.f32 %v5638_v28, %v6602_v3  ;;  %v6600_v29 = vrot.slane %v5173_v22, 6 }
 0x2d2   : > { %v6655_v21 = vadd.f32 1.0, %v6637_v53  ;;  %v6635_v42 = vsub.f32 %v5171_v1, %v6599_v55  ;;  %v6890_v55 = vrot.slane %v10509_v4, %v11378_v27 }
 0x2d3   : > { %v6656_v37 = vadd.f32 1.0, %v6638_v23  ;;  %v6636_v47 = vsub.f32 %v5173_v22, %v6600_v29 }
 0x2d4   : > { %v6673_v57 = vmul.f32 0.5, %v6655_v21  ;;  %v7021_v46 = vmul.f32 %v6985_v25, %v6655_v21  ;;  %v6653_v6 = vadd.f32 1.0, %v6635_v42  ;;  %v6801_v25 = vrot.slane %v219_v33, 4 }
 0x2d5   : > { %v6674_v59 = vmul.f32 0.5, %v6656_v37  ;;  %v7022_v44 = vmul.f32 %v6986_v24, %v6656_v37  ;;  %v6654_v62 = vadd.f32 1.0, %v6636_v47  ;;  %v11390_v47 = vld [vmem:[#allocation63_spill] sm:$0xff] }
 0x2d6   : > { %v6709_v30 = vrot.slane %v6673_v57, 2  ;;  %7558 = vlog2.f32 %v7021_v46  ;;  %v6671_v10 = vmul.f32 0.5, %v6653_v6  ;;  %v7019_v16 = vmul.f32 %v6983_v12, %v6653_v6  ;;  %v11391_v46 = vld [vmem:[#allocation64_spill] sm:$0xff] }
 0x2d7   : > { %v6710_v54 = vrot.slane %v6674_v59, 2  ;;  %7560 = vlog2.f32 %v7022_v44  ;;  %v6672_v26 = vmul.f32 0.5, %v6654_v62  ;;  %v7020_v18 = vmul.f32 %v6984_v41, %v6654_v62 }
 0x2d8   : > { %v6745_v63 = vadd.f32 %v6709_v30, %v5636_v19  ;;  %v6707_v40 = vrot.slane %v6671_v10, 2  ;;  %7562 = vlog2.f32 %v7019_v16  ;;  %v6902_v19 = vrot.slane %v10509_v4, %v11377_v13  ;;  %v7588_v30 = vld [vmem:[#allocation2 + $0x80] sm:$0x3] }
 0x2d9   : > { %v6746_v34 = vadd.f32 %v6710_v54, %v5638_v28  ;;  %v6708_v0 = vrot.slane %v6672_v26, 2  ;;  %7564 = vlog2.f32 %v7020_v18  ;;  %v345_v41 = vmul.f32 0.5, %v11390_v47  ;;  %v10581_v26 = vld [vmem:[#allocation2 + $0x70] sm:$0x30] }
 0x2da   : > { %v6766_v31 = vsub.f32 %v6745_v63, %v413_v2  ;;  %v6743_v3 = vadd.f32 %v6707_v40, %v5171_v1  ;;  %v346_v58 = vmul.f32 0.5, %v11391_v46  ;;  %v7328_v44 = vsel %vm11392_vm3, 1.0, %v11252_v52  ;;  %v11393_v18 = vld [vmem:[#allocation61_spill] sm:$0xff] }
 0x2db   : > { %v6767_v11 = vsub.f32 %v6746_v34, %v414_v36  ;;  %v6744_v53 = vadd.f32 %v6708_v0, %v5173_v22  ;;  %v381_v57 = vrot.slane %v345_v41, 2  ;;  %v10573_v36 = vld [vmem:[#allocation2 + $0x80] sm:$0x30]  ;;  %v343_v63 = vmul.f32 0.5, %v11393_v18 }
 0x2dc   : > { %v6838_v28 = vmul.f32 %v6802_v7, %v6766_v31  ;;  %v6764_v14 = vsub.f32 %v6743_v3, %v411_v48  ;;  %v6806_v16 = vrot.slane %v10573_v36, 4  ;;  %v6989_v40 = vrot.slane %v10573_v36, 2  ;;  %v11394_v31 = vld [vmem:[#allocation62_spill] sm:$0xff] }
 0x2dd   : > { %v6839_v2 = vmul.f32 %v6803_v38, %v6767_v11  ;;  %v6765_v23 = vsub.f32 %v6744_v53, %v412_v9  ;;  %v417_v10 = vadd.f32 %v7588_v30, %v381_v57  ;;  %v382_v34 = vrot.slane %v346_v58, 2 }
 0x2de   : > { %v6949_v56 = vmul.f32 %v6898_v5, %v6838_v28  ;;  %v6836_v1 = vmul.f32 %v6800_v49, %v6764_v14  ;;  %v6990_v0 = vrot.slane %v10578_v8, 2  ;;  %v6807_v11 = vrot.slane %v10578_v8, 4 }
 0x2df   : > { %v6950_v24 = vmul.f32 %v6902_v19, %v6839_v2  ;;  %v6837_v20 = vmul.f32 %v6801_v25, %v6765_v23  ;;  %v6987_v53 = vrot.slane %v10581_v26, 2  ;;  %v379_v28 = vrot.slane %v343_v63, 2 }
 0x2e0   : > { %v7559_v13 = vpop.eup %7558  ;;  %6967 = vst [vmem:[%s10338_s17 + $0x60] sm:$0x3] %v6949_v56  ;;  %v6947_v33 = vmul.f32 %v6890_v55, %v6836_v1  ;;  %v6914_v46 = vrot.slane %v7328_v44, %v11370_v50  ;;  %v6804_v36 = vrot.slane %v10581_v26, 4  ;;  %v6918_v8 = vrot.slane %v7328_v44, %v11371_v60 }
 0x2e1   : > { %v7561_v7 = vpop.eup %7560  ;;  %v7052_v22 = vmul.f32 0.6931472, %v7559_v13  ;;  %6968 = vst [vmem:[%s10338_s17 + $0x68] sm:$0x3] %v6950_v24  ;;  %v6948_v27 = vmul.f32 %v6894_v61, %v6837_v20  ;;  %v6805_v30 = vrot.slane %v223_v43, 4  ;;  %v6910_v50 = vrot.slane %v10509_v4, %v11385_v35 }
 0x2e2   : > { %v7563_v51 = vpop.eup %7562  ;;  %v7054_v29 = vmul.f32 0.6931472, %v7561_v7  ;;  %6965 = vst [vmem:[%s10338_s17 + $0x50] sm:$0x3] %v6947_v33 }
 0x2e3   : > { %v7565_v45 = vpop.eup %7564  ;;  %v7075_v21 = vmul.f32 %v7052_v22, %v6898_v5  ;;  %v7048_v38 = vmul.f32 0.6931472, %v7563_v51  ;;  %6966 = vst [vmem:[%s10338_s17 + $0x58] sm:$0x3] %v6948_v27  ;;  %v344_v5 = vmul.f32 0.5, %v11394_v31 }
 0x2e4   : > { %v7076_v42 = vmul.f32 %v7054_v29, %v6902_v19  ;;  %v7050_v12 = vmul.f32 0.6931472, %v7565_v45 }
 0x2e5   : > { %7093 = vst [vmem:[%s10338_s17 + $0x60] sm:$0xc] %v7075_v21  ;;  %v7073_v37 = vmul.f32 %v7048_v38, %v6890_v55  ;;  %v6988_v55 = vrot.slane %v223_v43, 2  ;;  %v380_v13 = vrot.slane %v344_v5, 2  ;;  %v7590_v38 = vld [vmem:[#allocation2 + $0x70] sm:$0x3] }
 0x2e6   : > { %7094 = vst [vmem:[%s10338_s17 + $0x68] sm:$0xc] %v7076_v42  ;;  %v7074_v32 = vmul.f32 %v7050_v12, %v6894_v61  ;;  %v7589_v61 = vld [vmem:[#allocation2 + $0x88] sm:$0x3]  ;;  %v415_v42 = vadd.f32 %v7590_v38, %v379_v28 }
 0x2e7   : > { %7091 = vst [vmem:[%s10338_s17 + $0x50] sm:$0xc] %v7073_v37  ;;  %v418_v56 = vadd.f32 %v7589_v61, %v382_v34 }
 0x2e8   : > { %7092 = vst [vmem:[%s10338_s17 + $0x58] sm:$0xc] %v7074_v32  ;;  %v7591_v32 = vld [vmem:[#allocation2 + $0x78] sm:$0x3] }
 0x2e9   : > { %v416_v47 = vadd.f32 %v7591_v32, %v380_v13 }
 0x2fa   : > { %v6566_v6 = vpop.f32.mrb[8].mxu0 }
 0x2fb   : > { %v6605_v59 = vrot.slane %v6566_v6, 6  ;;  %v6568_v62 = vpop.f32.mrb[9].mxu0 }
 0x2fc   : > { %v6606_v54 = vrot.slane %v6568_v62, 6 }
 0x2fd   : > { %v6101_v15 = vpop.f32.mrb[8].mxu1  ;;  %v6641_v48 = vsub.f32 %v6566_v6, %v6605_v59 }
 0x2fe   : > { %v6603_v39 = vrot.slane %v6101_v15, 6  ;;  %v6103_v52 = vpop.f32.mrb[9].mxu1  ;;  %v6642_v9 = vsub.f32 %v6568_v62, %v6606_v54 }
 0x2ff   : > { %v6604_v3 = vrot.slane %v6103_v52, 6  ;;  %v6659_v49 = vadd.f32 1.0, %v6641_v48 }
 0x300   : > { %v6639_v19 = vsub.f32 %v6101_v15, %v6603_v39  ;;  %v6660_v25 = vadd.f32 1.0, %v6642_v9 }
 0x301   : > { %v6640_v14 = vsub.f32 %v6103_v52, %v6604_v3  ;;  %v6677_v2 = vmul.f32 0.5, %v6659_v49  ;;  %v7025_v23 = vmul.f32 %v6989_v40, %v6659_v49 }
 0x302   : > { %v6657_v1 = vadd.f32 1.0, %v6639_v19  ;;  %v6678_v24 = vmul.f32 0.5, %v6660_v25  ;;  %v7026_v20 = vmul.f32 %v6990_v0, %v6660_v25 }
 0x303   : > { %v6658_v33 = vadd.f32 1.0, %v6640_v14  ;;  %v6713_v7 = vrot.slane %v6677_v2, 2  ;;  %7566 = vlog2.f32 %v7025_v23 }
 0x304   : > { %v6675_v22 = vmul.f32 0.5, %v6657_v1  ;;  %v7023_v27 = vmul.f32 %v6987_v53, %v6657_v1  ;;  %v6714_v51 = vrot.slane %v6678_v24, 2  ;;  %7568 = vlog2.f32 %v7026_v20 }
 0x305   : > { %v6676_v29 = vmul.f32 0.5, %v6658_v33  ;;  %v7024_v45 = vmul.f32 %v6988_v55, %v6658_v33  ;;  %v6749_v21 = vadd.f32 %v6713_v7, %v6566_v6 }
 0x306   : > { %v6711_v12 = vrot.slane %v6675_v22, 2  ;;  %7570 = vlog2.f32 %v7023_v27  ;;  %v6750_v37 = vadd.f32 %v6714_v51, %v6568_v62  ;;  %v6906_v62 = vrot.slane %v10509_v4, %v11384_v17 }
 0x307   : > { %v6712_v41 = vrot.slane %v6676_v29, 2  ;;  %7572 = vlog2.f32 %v7024_v45  ;;  %v6770_v57 = vsub.f32 %v6749_v21, %v417_v10 }
 0x308   : > { %v6747_v58 = vadd.f32 %v6711_v12, %v6101_v15  ;;  %v6771_v59 = vsub.f32 %v6750_v37, %v418_v56 }
 0x309   : > { %v6748_v6 = vadd.f32 %v6712_v41, %v6103_v52  ;;  %v6842_v54 = vmul.f32 %v6806_v16, %v6770_v57 }
 0x30a   : > { %v6768_v18 = vsub.f32 %v6747_v58, %v415_v42  ;;  %v6843_v63 = vmul.f32 %v6807_v11, %v6771_v59 }
 0x30b   : > { %v6769_v10 = vsub.f32 %v6748_v6, %v416_v47  ;;  %v6953_v26 = vmul.f32 %v6914_v46, %v6842_v54 }
 0x30c   : > { %v6840_v15 = vmul.f32 %v6804_v36, %v6768_v18  ;;  %v6954_v48 = vmul.f32 %v6918_v8, %v6843_v63 }
 0x30d   : > { %v6841_v60 = vmul.f32 %v6805_v30, %v6769_v10  ;;  %v7567_v44 = vpop.eup %7566  ;;  %6971 = vst [vmem:[%s10338_s17 + $0x80] sm:$0x3] %v6953_v26 }
 0x30e   : > { %v6951_v16 = vmul.f32 %v6906_v62, %v6840_v15  ;;  %v7569_v40 = vpop.eup %7568  ;;  %v7060_v34 = vmul.f32 0.6931472, %v7567_v44  ;;  %6972 = vst [vmem:[%s10338_s17 + $0x88] sm:$0x3] %v6954_v48 }
 0x30f   : > { %v6952_v17 = vmul.f32 %v6910_v50, %v6841_v60  ;;  %v7062_v43 = vmul.f32 0.6931472, %v7569_v40 }
 0x310   : > { %v7571_v39 = vpop.eup %7570  ;;  %6969 = vst [vmem:[%s10338_s17 + $0x70] sm:$0x3] %v6951_v16  ;;  %v7079_v35 = vmul.f32 %v7060_v34, %v6914_v46 }
 0x311   : > { %v7573_v4 = vpop.eup %7572  ;;  %v7056_v52 = vmul.f32 0.6931472, %v7571_v39  ;;  %6970 = vst [vmem:[%s10338_s17 + $0x78] sm:$0x3] %v6952_v17  ;;  %v7080_v9 = vmul.f32 %v7062_v43, %v6918_v8 }
 0x312   : > { %v7058_v0 = vmul.f32 0.6931472, %v7573_v4  ;;  %7097 = vst [vmem:[%s10338_s17 + $0x80] sm:$0xc] %v7079_v35 }
 0x313   : > { %v7077_v31 = vmul.f32 %v7056_v52, %v6906_v62  ;;  %7098 = vst [vmem:[%s10338_s17 + $0x88] sm:$0xc] %v7080_v9 }
 0x314   : > { %v7078_v5 = vmul.f32 %v7058_v0, %v6910_v50 }
 0x315   : > { %7095 = vst [vmem:[%s10338_s17 + $0x70] sm:$0xc] %v7077_v31 }
 0x316   : > { %7096 = vst [vmem:[%s10338_s17 + $0x78] sm:$0xc] %v7078_v5 }
 0x317   : > { %7663 = shalt.err (!%p7660_p10)
}
 0x318   : > { %s7664_s6 = scalar_lea.hbm %s10607_s29, 2304  ;;  %s7668_s21 = scalar_lea.hbm %s10655_s2, 4608 }
 0x319   : > { %p7665_p1 = scmp.ne.s32.totalorder %s10607_s29, %s7664_s6  ;;  %p7669_p3 = scmp.lt.u32.totalorder %s10607_s29, %s10655_s2 }
 0x31a   : > { %p7670_p4 = scmp.lt.u32.totalorder %s7668_s21, %s7664_s6  ;;  %p7672_p11 = scmp.lt.u32.totalorder %s7664_s6, %s10607_s29 }
 0x31b   : > { %p7666_p2 = pnand %p7665_p1, %p7842_p8 }
 0x31c   : > { %p7671_p6 = por %p7670_p4, %p7669_p3 }
 0x31d   : > { %p7667_p7 = pneg %p7666_p2 }
 0x31e   : > { %p7673_p9 = por %p7672_p11, %p7671_p6 }
 0x320   : > { %p7674_p12 = pnand %p7673_p9, %p7667_p7 }
 0x322   : > { %7677 = shalt.err (!%p7674_p12)
}
 0x323   : > { %7435 = dma.vmem_to_hbm [thread:$0]  (%p7842_p8), %s10609_s24, 2304, %s10607_s29, %s7113_s13  }
 0x324 PF: > { %s7139_s23 = sand.u32 1, %s7708_s9   ;;  %p11395_p13 = scmp.ne.s32.totalorder %s10862_s16, 0 }
 0x325   : > { %p11396_p0 = scmp.ge.s32.totalorder %s7720_s12, 2  ;;  %s7140_s26 = scalar_lea.sflag [#allocation4], %s7139_s23 }
 0x327   : > { %p7446_p5 = pnand %p11396_p0, %p11395_p13 }
 0x329   : > { %7703 = dma.done.wait (!%p7446_p5), %s7140_s26, 2304  }
 0x32a   : > { %7705 = vsyncadd (!%p7446_p5), %s7140_s26, 4294964992  ;;  %p16_p10 = scmp.ge.s32.totalorder %s7798_s20, 4   ;;  %s11397_s9 = smov %s7712_s10 }
 0x32b   : > { %s11398_s10 = smov %s7716_s11  ;;  %s11399_s11 = smov %s7834_s7 }
 0x32c   : > { %s11400_s12 = smov %s7798_s20  ;;  %18 = sbr.rel (!%p16_p10) target bundleno = 6 (0x6), region = 84 }
 0x333   :  { %7145 = vsyncpa [#allocation3], 1 }
 0x334   :  { %7147 = vsyncpa [#allocation3 + $0x1], 1 }
 0x335   :  { %7148 = vsyncpa [#allocation6], 1 }
 0x336   :  { %7150 = vsyncpa [#allocation6 + $0x1], 1 }
 0x337   :  { %7151 = vsyncpa [#allocation4], 1 }
 0x338   :  { %7153 = vsyncpa [#allocation4 + $0x1], 1 }

</bundles_post_ra>
